<compile_context>
chip_gen: v7x
topology: tpu7x:2x2x1
jax: 0.10.0
libtpu: 0.0.40
codegen_flags: <defaults>
</compile_context>

<pallas_src>
import jax
import jax.numpy as jnp
from jax.experimental import pallas as pl
from jax.experimental.pallas import tpu as pltpu


def _round_up(x, m):
    return (x + m - 1) // m * m


# --------------------------------------------------------------------------
# Kernel: one grid step = one (block_rows, in_dim) slab of the batch.
# --------------------------------------------------------------------------
def _classifier_kernel(x_ref, w1_ref, b1_ref, w2_ref, b2_ref, out_ref):
    # h = ReLU(x @ W1 + b1)   -- inputs already in stored (bf16/f32) dtype,
    # f32 MXU accumulation.
    h = jnp.dot(x_ref[...], w1_ref[...], preferred_element_type=jnp.float32)
    h = jnp.maximum(h + b1_ref[...], 0.0)

    # TODO(synk): training-mode dropout(p) not implemented; eval (identity) semantics.

    # logits = h @ W2 + b2
    y = jnp.dot(h.astype(w2_ref.dtype), w2_ref[...],
                preferred_element_type=jnp.float32)
    out_ref[...] = (y + b2_ref[...]).astype(out_ref.dtype)


def _build_classifier_call(n_pad, in_dim, hid, out_pad, block_rows,
                           weight_buffer_count, vmem_limit, cost):
    def const_spec(shape):
        # Grid-invariant operands: constant index_map -> fetched once and kept
        # resident.  Buffered(1) avoids allocating a useless second buffer.
        if weight_buffer_count == 1:
            return pl.BlockSpec(shape, lambda i: (0, 0),
                                pipeline_mode=pl.Buffered(1))
        return pl.BlockSpec(shape, lambda i: (0, 0))

    return pl.pallas_call(
        _classifier_kernel,
        out_shape=jax.ShapeDtypeStruct((n_pad, out_pad), jnp.float32),
        grid_spec=pltpu.PrefetchScalarGridSpec(
            num_scalar_prefetch=0,
            grid=(n_pad // block_rows,),
            in_specs=[
                pl.BlockSpec((block_rows, in_dim), lambda i: (i, 0)),  # x slab
                const_spec((in_dim, hid)),                             # W1
                const_spec((1, hid)),                                  # b1
                const_spec((hid, out_pad)),                            # W2
                const_spec((1, out_pad)),                              # b2
            ],
            out_specs=pl.BlockSpec((block_rows, out_pad), lambda i: (i, 0)),
        ),
        compiler_params=pltpu.CompilerParams(
            dimension_semantics=("parallel",),
            vmem_limit_bytes=vmem_limit),
        cost_estimate=cost,
    )


# --------------------------------------------------------------------------
# Wrapper
# --------------------------------------------------------------------------
def simple_classifier(x, params, *, block_rows=512):
    """x: [N, in_dim] -> logits [N, out_dim] (f32)."""
    w1, b1, w2, b2 = params["w1"], params["b1"], params["w2"], params["b2"]
    N, in_dim = x.shape
    hid = w1.shape[1]
    out_dim = w2.shape[1]
    store_dtype = w1.dtype
    store_bytes = jnp.dtype(store_dtype).itemsize

    # Lane-dense logits: pad the class dim to a multiple of 128 so the output
    # is written with full (unmasked) vector stores; slice back afterwards.
    out_pad = _round_up(out_dim, 128)
    if out_pad != out_dim:
        w2 = jnp.pad(w2, ((0, 0), (0, out_pad - out_dim)))
        b2 = jnp.pad(b2, ((0, 0), (0, out_pad - out_dim)))

    # Batch tiling: clamp the tile to the (sublane-aligned) batch and zero-pad
    # ragged N; padded rows are sliced off at the end.
    block_rows = max(8, min(block_rows, _round_up(N, 8)))
    n_pad = _round_up(N, block_rows)
    x = x.astype(store_dtype)              # bf16 x halves per-step HBM DMA
    if n_pad != N:
        x = jnp.pad(x, ((0, n_pad - N), (0, 0)))

    # Dtype-aware VMEM budget: x/out double-buffered, weights single-buffered,
    # plus in-kernel intermediates.  (On v7x, pick block_rows so this stays
    # well under ~56 MiB per TensorCore.)
    vmem_bytes = (
        2 * block_rows * in_dim * store_bytes         # x slab  (x2 buffers)
        + 2 * block_rows * out_pad * 4                # out slab (x2 buffers)
        + in_dim * hid * store_bytes                  # W1 (resident, x1)
        + hid * out_pad * store_bytes                 # W2 (resident, x1)
        + 8 * (_round_up(hid, 128) + out_pad) * 4     # biases (tile-padded)
        + block_rows * hid * (4 + store_bytes)        # h (f32) + bf16 cast
        + block_rows * out_pad * 4                    # y (f32) before store
    )
    vmem_limit = int(min(max(int(1.5 * vmem_bytes) + (2 << 20), 32 << 20),
                         96 << 20))

    # Dtype-aware cost estimate for XLA's scheduler.
    flops = 2 * n_pad * in_dim * hid + 2 * n_pad * hid * out_pad
    bytes_accessed = (n_pad * in_dim * store_bytes
                      + in_dim * hid * store_bytes
                      + hid * out_pad * store_bytes
                      + (hid + out_pad) * 4
                      + n_pad * out_pad * 4)
    cost = pl.CostEstimate(flops=flops, transcendentals=0,
                           bytes_accessed=bytes_accessed)

    try:
        call = _build_classifier_call(n_pad, in_dim, hid, out_pad, block_rows,
                                      1, vmem_limit, cost)
        out = call(x, w1, b1, w2, b2)
    except Exception:
        # Fallback if this JAX/libtpu build rejects single-buffered
        # (pl.Buffered(1)) block specs: default double-buffering.
        call = _build_classifier_call(n_pad, in_dim, hid, out_pad, block_rows,
                                      2, vmem_limit, cost)
        out = call(x, w1, b1, w2, b2)

    return out[:N, :out_dim]


# --------------------------------------------------------------------------
# Parameter construction (mimics nn.Linear + weight_norm(dim=None))
# --------------------------------------------------------------------------
def _weight_norm_linear(key, in_dim, out_dim, store_dtype):
    """Returns (W_eff [in_dim, out_dim] in store_dtype, b [1, out_dim] f32).

    W_eff = g * V / ||V||_F ; g perturbed from ||V||_F so the weight_norm
    reparametrization is actually exercised."""
    kv, kb, kg = jax.random.split(key, 3)
    bound = 1.0 / jnp.sqrt(in_dim)
    V = jax.random.uniform(kv, (out_dim, in_dim), jnp.float32, -bound, bound)
    b = jax.random.uniform(kb, (out_dim,), jnp.float32, -bound, bound)
    g = jnp.linalg.norm(V) * (1.0 + 0.1 * jax.random.uniform(kg, ()))
    W_eff = (g * V / jnp.linalg.norm(V)).T          # [in_dim, out_dim]
    return W_eff.astype(store_dtype), b.reshape(1, out_dim)


def make_params(key, in_dim, hid_dim, out_dim, store_dtype=jnp.bfloat16):
    k1, k2 = jax.random.split(key)
    w1, b1 = _weight_norm_linear(k1, in_dim, hid_dim, store_dtype)
    w2, b2 = _weight_norm_linear(k2, hid_dim, out_dim, store_dtype)
    return {"w1": w1, "b1": b1, "w2": w2, "b2": b2}


def simple_classifier_ref(x, p):
    """Pure-JAX reference (eval-mode forward, same stored dtypes)."""
    dt = p["w1"].dtype
    h = jnp.dot(x.astype(dt), p["w1"], preferred_element_type=jnp.float32)
    h = jnp.maximum(h + p["b1"][0], 0.0)
    y = jnp.dot(h.astype(dt), p["w2"], preferred_element_type=jnp.float32)
    return y + p["b2"][0]


if __name__ == "__main__":
    # Small demo: 2 grid steps of 512 rows, classifier-like out_dim=10 to
    # exercise the lane-padding path.
    N, IN_DIM, HID_DIM, OUT_DIM = 1024, 128, 256, 10

    key = jax.random.PRNGKey(0)
    kx, kp = jax.random.split(key)
    x = jax.random.normal(kx, (N, IN_DIM), jnp.float32)
    params = make_params(kp, IN_DIM, HID_DIM, OUT_DIM,
                         store_dtype=jnp.bfloat16)

    out = simple_classifier(x, params, block_rows=512)
    out = jax.block_until_ready(out)

    ref = simple_classifier_ref(x, params)
    assert out.shape == (N, OUT_DIM)
    # bf16 matmul inputs with f32 accumulation -> loosened tolerance.
    assert jnp.allclose(out, ref, atol=2e-2, rtol=2e-2), "mismatch vs reference"

    print("KERNEL_OK")
</pallas_src>

<mosaic_0001>
module attributes {stable_mosaic.version = 11 : i64} {
  func.func @_classifier_kernel(%arg0: i32, %arg1: memref<512x128xbf16, #tpu.memory_space<vmem>>, %arg2: memref<128x256xbf16, #tpu.memory_space<vmem>>, %arg3: memref<1x256xf32, #tpu.memory_space<vmem>>, %arg4: memref<256x128xbf16, #tpu.memory_space<vmem>>, %arg5: memref<1x128xf32, #tpu.memory_space<vmem>>, %arg6: memref<512x128xf32, #tpu.memory_space<vmem>>) attributes {dimension_semantics = [#tpu.dimension_semantics<parallel>], iteration_bounds = array<i64: 2>, scalar_prefetch = 0 : i64, scratch_operands = 0 : i64, tpu.core_type = #tpu.core_type<tc>, window_params = [{transform_indices = @transform_0, window_bounds = array<i64: 512, 128>}, {pipeline_mode = #tpu.pipeline_mode<synchronous>, transform_indices = @transform_1, window_bounds = array<i64: 128, 256>}, {pipeline_mode = #tpu.pipeline_mode<synchronous>, transform_indices = @transform_2, window_bounds = array<i64: 1, 256>}, {pipeline_mode = #tpu.pipeline_mode<synchronous>, transform_indices = @transform_3, window_bounds = array<i64: 256, 128>}, {pipeline_mode = #tpu.pipeline_mode<synchronous>, transform_indices = @transform_4, window_bounds = array<i64: 1, 128>}, {transform_indices = @transform_5, window_bounds = array<i64: 512, 128>}]} {
    %c0 = arith.constant 0 : index
    %c0_0 = arith.constant 0 : index
    %0 = vector.load %arg1[%c0, %c0_0] : memref<512x128xbf16, #tpu.memory_space<vmem>>, vector<512x128xbf16>
    %c0_1 = arith.constant 0 : index
    %c0_2 = arith.constant 0 : index
    %1 = vector.load %arg2[%c0_1, %c0_2] : memref<128x256xbf16, #tpu.memory_space<vmem>>, vector<128x256xbf16>
    %cst = arith.constant dense<0.000000e+00> : vector<512x256xf32>
    %2 = tpu.matmul %0, %1, %cst {dimension_numbers = #tpu.dot_dimension_numbers<[1], [0], [0], [1], [0, 0, 1, 1], [], []>} : vector<512x128xbf16>, vector<128x256xbf16>, vector<512x256xf32> -> vector<512x256xf32>
    %c0_3 = arith.constant 0 : index
    %c0_4 = arith.constant 0 : index
    %3 = vector.load %arg3[%c0_3, %c0_4] : memref<1x256xf32, #tpu.memory_space<vmem>>, vector<1x256xf32>
    %4 = vector.broadcast %3 : vector<1x256xf32> to vector<512x256xf32>
    %5 = arith.addf %2, %4 : vector<512x256xf32>
    %cst_5 = arith.constant 0.000000e+00 : f32
    %6 = vector.broadcast %cst_5 : f32 to vector<512x256xf32>
    %7 = arith.maximumf %5, %6 : vector<512x256xf32>
    %8 = arith.truncf %7 : vector<512x256xf32> to vector<512x256xbf16>
    %c0_6 = arith.constant 0 : index
    %c0_7 = arith.constant 0 : index
    %9 = vector.load %arg4[%c0_6, %c0_7] : memref<256x128xbf16, #tpu.memory_space<vmem>>, vector<256x128xbf16>
    %cst_8 = arith.constant dense<0.000000e+00> : vector<512x128xf32>
    %10 = tpu.matmul %8, %9, %cst_8 {dimension_numbers = #tpu.dot_dimension_numbers<[1], [0], [0], [1], [0, 0, 1, 1], [], []>} : vector<512x256xbf16>, vector<256x128xbf16>, vector<512x128xf32> -> vector<512x128xf32>
    %c0_9 = arith.constant 0 : index
    %c0_10 = arith.constant 0 : index
    %11 = vector.load %arg5[%c0_9, %c0_10] : memref<1x128xf32, #tpu.memory_space<vmem>>, vector<1x128xf32>
    %12 = vector.broadcast %11 : vector<1x128xf32> to vector<512x128xf32>
    %13 = arith.addf %10, %12 : vector<512x128xf32>
    %c0_11 = arith.constant 0 : index
    %c0_12 = arith.constant 0 : index
    %14 = vector.load %arg6[%c0_11, %c0_12] : memref<512x128xf32, #tpu.memory_space<vmem>>, vector<512x128xf32>
    tpu.vector_store %arg6[%c0_11, %c0_12], %13 {strides = array<i32>} : memref<512x128xf32, #tpu.memory_space<vmem>>, vector<512x128xf32>,
    return
  }
  func.func @transform_0(%arg0: i32) -> (i32, i32) {
    %c0_i32 = arith.constant 0 : i32
    %c0_i32_0 = arith.constant 0 : i32
    return %arg0, %c0_i32 : i32, i32
  }
  func.func @transform_1(%arg0: i32) -> (i32, i32) {
    %c0_i32 = arith.constant 0 : i32
    %c0_i32_0 = arith.constant 0 : i32
    %c0_i32_1 = arith.constant 0 : i32
    return %c0_i32, %c0_i32_0 : i32, i32
  }
  func.func @transform_2(%arg0: i32) -> (i32, i32) {
    %c0_i32 = arith.constant 0 : i32
    %c0_i32_0 = arith.constant 0 : i32
    %c0_i32_1 = arith.constant 0 : i32
    return %c0_i32, %c0_i32_0 : i32, i32
  }
  func.func @transform_3(%arg0: i32) -> (i32, i32) {
    %c0_i32 = arith.constant 0 : i32
    %c0_i32_0 = arith.constant 0 : i32
    %c0_i32_1 = arith.constant 0 : i32
    return %c0_i32, %c0_i32_0 : i32, i32
  }
  func.func @transform_4(%arg0: i32) -> (i32, i32) {
    %c0_i32 = arith.constant 0 : i32
    %c0_i32_0 = arith.constant 0 : i32
    %c0_i32_1 = arith.constant 0 : i32
    return %c0_i32, %c0_i32_0 : i32, i32
  }
  func.func @transform_5(%arg0: i32) -> (i32, i32) {
    %c0_i32 = arith.constant 0 : i32
    %c0_i32_0 = arith.constant 0 : i32
    return %arg0, %c0_i32 : i32, i32
  }
}

module attributes {stable_mosaic.version = 11 : i64} {
  func.func @_classifier_kernel(%arg0: i32, %arg1: memref<512x128xbf16, #tpu.memory_space<vmem>>, %arg2: memref<128x256xbf16, #tpu.memory_space<vmem>>, %arg3: memref<1x256xf32, #tpu.memory_space<vmem>>, %arg4: memref<256x128xbf16, #tpu.memory_space<vmem>>, %arg5: memref<1x128xf32, #tpu.memory_space<vmem>>, %arg6: memref<512x128xf32, #tpu.memory_space<vmem>>) attributes {dimension_semantics = [#tpu.dimension_semantics<parallel>], iteration_bounds = array<i64: 2>, scalar_prefetch = 0 : i64, scratch_operands = 0 : i64, tpu.core_type = #tpu.core_type<tc>, window_params = [{transform_indices = @transform_0, window_bounds = array<i64: 512, 128>}, {pipeline_mode = #tpu.pipeline_mode<synchronous>, transform_indices = @transform_1, window_bounds = array<i64: 128, 256>}, {pipeline_mode = #tpu.pipeline_mode<synchronous>, transform_indices = @transform_2, window_bounds = array<i64: 1, 256>}, {pipeline_mode = #tpu.pipeline_mode<synchronous>, transform_indices = @transform_3, window_bounds = array<i64: 256, 128>}, {pipeline_mode = #tpu.pipeline_mode<synchronous>, transform_indices = @transform_4, window_bounds = array<i64: 1, 128>}, {transform_indices = @transform_5, window_bounds = array<i64: 512, 128>}]} {
    %c0 = arith.constant 0 : index
    %c0_0 = arith.constant 0 : index
    %0 = vector.load %arg1[%c0, %c0_0] : memref<512x128xbf16, #tpu.memory_space<vmem>>, vector<512x128xbf16>
    %c0_1 = arith.constant 0 : index
    %c0_2 = arith.constant 0 : index
    %1 = vector.load %arg2[%c0_1, %c0_2] : memref<128x256xbf16, #tpu.memory_space<vmem>>, vector<128x256xbf16>
    %cst = arith.constant dense<0.000000e+00> : vector<512x256xf32>
    %2 = tpu.matmul %0, %1, %cst {dimension_numbers = #tpu.dot_dimension_numbers<[1], [0], [0], [1], [0, 0, 1, 1], [], []>} : vector<512x128xbf16>, vector<128x256xbf16>, vector<512x256xf32> -> vector<512x256xf32>
    %c0_3 = arith.constant 0 : index
    %c0_4 = arith.constant 0 : index
    %3 = vector.load %arg3[%c0_3, %c0_4] : memref<1x256xf32, #tpu.memory_space<vmem>>, vector<1x256xf32>
    %4 = vector.broadcast %3 : vector<1x256xf32> to vector<512x256xf32>
    %5 = arith.addf %2, %4 : vector<512x256xf32>
    %cst_5 = arith.constant 0.000000e+00 : f32
    %6 = vector.broadcast %cst_5 : f32 to vector<512x256xf32>
    %7 = arith.maximumf %5, %6 : vector<512x256xf32>
    %8 = arith.truncf %7 : vector<512x256xf32> to vector<512x256xbf16>
    %c0_6 = arith.constant 0 : index
    %c0_7 = arith.constant 0 : index
    %9 = vector.load %arg4[%c0_6, %c0_7] : memref<256x128xbf16, #tpu.memory_space<vmem>>, vector<256x128xbf16>
    %cst_8 = arith.constant dense<0.000000e+00> : vector<512x128xf32>
    %10 = tpu.matmul %8, %9, %cst_8 {dimension_numbers = #tpu.dot_dimension_numbers<[1], [0], [0], [1], [0, 0, 1, 1], [], []>} : vector<512x256xbf16>, vector<256x128xbf16>, vector<512x128xf32> -> vector<512x128xf32>
    %c0_9 = arith.constant 0 : index
    %c0_10 = arith.constant 0 : index
    %11 = vector.load %arg5[%c0_9, %c0_10] : memref<1x128xf32, #tpu.memory_space<vmem>>, vector<1x128xf32>
    %12 = vector.broadcast %11 : vector<1x128xf32> to vector<512x128xf32>
    %13 = arith.addf %10, %12 : vector<512x128xf32>
    %c0_11 = arith.constant 0 : index
    %c0_12 = arith.constant 0 : index
    %14 = vector.load %arg6[%c0_11, %c0_12] : memref<512x128xf32, #tpu.memory_space<vmem>>, vector<512x128xf32>
    tpu.vector_store %arg6[%c0_11, %c0_12], %13 {strides = array<i32>} : memref<512x128xf32, #tpu.memory_space<vmem>>, vector<512x128xf32>,
    return
  }
  func.func @transform_0(%arg0: i32) -> (i32, i32) {
    %c0_i32 = arith.constant 0 : i32
    %c0_i32_0 = arith.constant 0 : i32
    return %arg0, %c0_i32 : i32, i32
  }
  func.func @transform_1(%arg0: i32) -> (i32, i32) {
    %c0_i32 = arith.constant 0 : i32
    %c0_i32_0 = arith.constant 0 : i32
    %c0_i32_1 = arith.constant 0 : i32
    return %c0_i32, %c0_i32_0 : i32, i32
  }
  func.func @transform_2(%arg0: i32) -> (i32, i32) {
    %c0_i32 = arith.constant 0 : i32
    %c0_i32_0 = arith.constant 0 : i32
    %c0_i32_1 = arith.constant 0 : i32
    return %c0_i32, %c0_i32_0 : i32, i32
  }
  func.func @transform_3(%arg0: i32) -> (i32, i32) {
    %c0_i32 = arith.constant 0 : i32
    %c0_i32_0 = arith.constant 0 : i32
    %c0_i32_1 = arith.constant 0 : i32
    return %c0_i32, %c0_i32_0 : i32, i32
  }
  func.func @transform_4(%arg0: i32) -> (i32, i32) {
    %c0_i32 = arith.constant 0 : i32
    %c0_i32_0 = arith.constant 0 : i32
    %c0_i32_1 = arith.constant 0 : i32
    return %c0_i32, %c0_i32_0 : i32, i32
  }
  func.func @transform_5(%arg0: i32) -> (i32, i32) {
    %c0_i32 = arith.constant 0 : i32
    %c0_i32_0 = arith.constant 0 : i32
    return %arg0, %c0_i32 : i32, i32
  }
}

</mosaic_0001>

<bundles_post_ra>
// kernel: tpu_custom_call.1
= control target key start
LH: loop header
LB: loop body
LE: loop exit
PB: predicated region body
PF: predicated region fallthrough
CT: control target
= control target key end

     0   :  { %10 = vsyncpa [#allocation3], 0  ;;  %s2862_s0 = inlined_call_operand.hbm [shape: bf16[1024,128], index: 0, kind: input, shape index: {}]   ;;  %s2863_s1 = inlined_call_operand.hbm [shape: bf16[128,256], index: 1, kind: input, shape index: {}]   ;;  %s2864_s2 = inlined_call_operand.vmem [shape: f32[1,256], index: 2, kind: input, shape index: {}]   ;;  %s2865_s3 = inlined_call_operand.hbm [shape: bf16[256,128], index: 3, kind: input, shape index: {}]   ;;  %s2866_s4 = inlined_call_operand.vmem [shape: f32[1,128], index: 4, kind: input, shape index: {}]   ;;  %s2867_s5 = inlined_call_operand.hbm [shape: f32[1024,128], index: 5, kind: output, shape index: {}]  }
   0x1   :  { %12 = vsyncpa [#allocation3 + $0x1], 0 }
   0x2   :  { %13 = vsyncpa [#allocation6], 0 }
   0x3   :  { %14 = vsyncpa [#allocation4], 0 }
   0x4   :  { %16 = vsyncpa [#allocation4 + $0x1], 0  ;;  %s2240_s18 = smov 0   ;;  %s2242_s19 = smov 0  }
   0x5   :  { %s2244_s20 = smov 0   ;;  %s2246_s21 = smov 0  }
   0x6 LB: > { %s2261_s22 = sadd.s32 4294967295, %s2197_s21   ;;  %s1778_s23 = sadd.s32 4294967294, %s2197_s21   ;;  %s2197_s21 = sphi %s2246_s21, %s2887_s21   ;;  %s2193_s20 = sphi %s2244_s20, %s2886_s20   ;;  %s2189_s19 = sphi %s2242_s19, %s2885_s19   ;;  %s2185_s18 = sphi %s2240_s18, %s2884_s18  }
   0x7   : > { %p42_p0 = scmp.ne.s32.totalorder %s2189_s19, %s2185_s18  ;;  %p2868_p1 = scmp.eq.s32.totalorder %s2261_s22, 0 }
   0x8   : > { %p156_p3 = scmp.eq.s32.totalorder %s1778_s23, 1  ;;  %p1779_p5 = scmp.ge.s32.totalorder %s2197_s21, 1 }
   0x9   : > { %p2270_p4 = por %p2868_p1, %p42_p0  ;;  %p163_p7 = scmp.lt.s32.totalorder %s2197_s21, 3 }
   0xa   : > { %p2275_p6 = por %p156_p3, %p42_p0  ;;  %s2199_s27 = smov [#allocation5]  }
   0xb   : > { %s2871_s24 = scalar_select %p2270_p4, 1, 0 }
   0xc   : > { %s2872_s25 = scalar_select %p2275_p6, 1, 0 }
   0xd   : > { %p2280_p8 = pnand %p1779_p5, %p163_p7  ;;  %s175_s28 = sshll.u32 %s2199_s27, 4  ;;  %s2284_s28 = int_to_ptr.vmem [resolvable:$true] %s175_s28 }
   0xe   : > { %s2200_s30 = smov [#allocation7]   ;;  %s2041_s9 = scalar_lea.hbm %s2863_s1, 2048 }
   0xf   : > { %p1907_p9 = pneg %p2280_p8  ;;  %s191_s6 = sshll.u32 %s2200_s30, 4  ;;  %s2295_s6 = int_to_ptr.vmem [resolvable:$true] %s191_s6 }
  0x10   : > { %p2042_p12 = scmp.ne.s32.totalorder %s2863_s1, %s2041_s9  ;;  %p2048_p5 = scmp.lt.u32.totalorder %s2041_s9, %s2863_s1 }
  0x11   : > { %p2291_p11 = pnand %p1907_p9, %p2868_p1 }
  0x13   : > { %p2043_p13 = pneg %p2291_p11 }
  0x15   : > { %p2044_p0 = pnand %p2043_p13, %p2042_p12 }
  0x17   : > { %p2045_p3 = pneg %p2044_p0 }
  0x19   : > { %p2050_p7 = pnand %p2048_p5, %p2045_p3 }
  0x1b   : > { %2053 = shalt.err (!%p2050_p7)
}
  0x1c   : > { %s2054_s14 = scalar_lea.vmem %s2284_s28, 2048  ;;  %p2062_p2 = scmp.lt.s32.totalorder %s2284_s28, %s2284_s28 }
  0x1d   : > { %p2055_p9 = scmp.ne.s32.totalorder %s2284_s28, %s2054_s14  ;;  %p2063_p12 = scmp.lt.s32.totalorder %s2054_s14, %s2054_s14 }
  0x1f   : > { %p2057_p10 = pnand %p2055_p9, %p2043_p13  ;;  %p2064_p0 = por %p2063_p12, %p2062_p2 }
  0x21   : > { %p2058_p1 = pneg %p2057_p10 }
  0x23   : > { %p2065_p6 = pnand %p2064_p0, %p2058_p1 }
  0x25   : > { %2068 = shalt.err (!%p2065_p6)
}
  0x26   : > { %s2201_s15 = smov 128   ;;  %s2202_s16 = smov 8  }
  0x27   : > { %1910 = dma.hbm_to_vmem [thread:$0]  (!%p2291_p11), %s2863_s1, 2048, %s2284_s28, [#allocation6], %s2201_s15, %s2201_s15, %s2202_s16  }
  0x28   : > { %s2069_s7 = scalar_lea.hbm %s2865_s3, 2048 }
  0x29   : > { %p2070_p2 = scmp.ne.s32.totalorder %s2865_s3, %s2069_s7  ;;  %p2076_p10 = scmp.lt.u32.totalorder %s2069_s7, %s2865_s3 }
  0x2b   : > { %p2072_p1 = pnand %p2070_p2, %p2043_p13 }
  0x2d   : > { %p2073_p6 = pneg %p2072_p1 }
  0x2f   : > { %p2078_p3 = pnand %p2076_p10, %p2073_p6 }
  0x31   : > { %2081 = shalt.err (!%p2078_p3)
}
  0x32   : > { %s2082_s28 = scalar_lea.vmem %s2295_s6, 2048  ;;  %p2090_p12 = scmp.lt.s32.totalorder %s2295_s6, %s2295_s6 }
  0x33   : > { %p2083_p5 = scmp.ne.s32.totalorder %s2295_s6, %s2082_s28  ;;  %p2091_p0 = scmp.lt.s32.totalorder %s2082_s28, %s2082_s28 }
  0x35   : > { %p2085_p7 = pnand %p2083_p5, %p2043_p13  ;;  %p2092_p2 = por %p2091_p0, %p2090_p12 }
  0x37   : > { %p2086_p9 = pneg %p2085_p7 }
  0x39   : > { %p2093_p1 = pnand %p2092_p2, %p2086_p9 }
  0x3b   : > { %2096 = shalt.err (!%p2093_p1)
}
  0x3c   : > { %s2203_s12 = smov 64   ;;  %s2204_s13 = smov 4  }
  0x3d   : > { %1913 = dma.hbm_to_vmem [thread:$0]  (!%p2291_p11), %s2865_s3, 2048, %s2295_s6, [#allocation6], %s2203_s12, %s2203_s12, %s2204_s13  }
  0x3e   : > { %s2353_s16 = sadd.s32 1, %s2197_s21   ;;  %s29_s23 = sadd.s32 1, %s2193_s20 }
  0x3f   : > { %s26_s17 = ssub.s32 %s2197_s21, %s2353_s16  ;;  %p36_p6 = scmp.ne.s32.totalorder %s2193_s20, %s2189_s19 }
  0x40   : > { %p27_p13 = scmp.eq.s32.totalorder %s26_s17, 0  ;;  %p37_p10 = scmp.eq.s32.totalorder %s2197_s21, 0 }
  0x41   : > { %p2875_p5 = scmp.eq.s32.totalorder %s2261_s22, 1  ;;  %p1924_p9 = scmp.lt.s32.totalorder %s2197_s21, 2 }
  0x42   : > { %s2362_s27 = scalar_select %p27_p13, %s2193_s20, %s29_s23  }
  0x43   : > { %p38_p3 = por %p37_p10, %p36_p6  ;;  %p2366_p7 = por %p2875_p5, %p36_p6 }
  0x44   : > { %s208_s30 = sand.u32 1, %s2193_s20   ;;  %s1861_s6 = sshll.u32 %s2197_s21, 12 }
  0x45   : > { %s2876_s29 = scalar_select %p2366_p7, 1, 0 }
  0x46   : > { %s1783_s7 = sshll.u32 %s208_s30, 8  ;;  %s2376_s10 = scalar_lea.hbm %s2862_s0, %s1861_s6 }
  0x47   : > { %s212_s11 = scalar_lea.vmem [#allocation2], %s1783_s7  ;;  %p2380_p11 = pnand %p1924_p9, %p38_p3 }
  0x48   : > { %s219_s28 = sshll.u32 %s212_s11, 4  ;;  %s2384_s15 = scalar_lea.sflag [#allocation3], %s208_s30  ;;  %s2378_s28 = int_to_ptr.vmem [resolvable:$true] %s219_s28 }
  0x49   : > { %s2097_s17 = scalar_lea.hbm %s2376_s10, 4096  ;;  %p2099_p0 = pneg %p2380_p11 }
  0x4a   : > { %p2098_p12 = scmp.ne.s32.totalorder %s2376_s10, %s2097_s17  ;;  %s2102_s6 = scalar_lea.hbm %s2862_s0, 8192 }
  0x4b   : > { %p2103_p13 = scmp.lt.u32.totalorder %s2376_s10, %s2862_s0  ;;  %p2104_p6 = scmp.lt.u32.totalorder %s2102_s6, %s2097_s17 }
  0x4c   : > { %p2100_p2 = pnand %p2099_p0, %p2098_p12  ;;  %p2106_p3 = scmp.lt.u32.totalorder %s2097_s17, %s2376_s10 }
  0x4d   : > { %p2105_p10 = por %p2104_p6, %p2103_p13 }
  0x4e   : > { %p2101_p1 = pneg %p2100_p2 }
  0x4f   : > { %p2107_p5 = por %p2106_p3, %p2105_p10 }
  0x51   : > { %p2108_p9 = pnand %p2107_p5, %p2101_p1 }
  0x53   : > { %2111 = shalt.err (!%p2108_p9)
}
  0x54   : > { %s2112_s30 = scalar_lea.vmem %s2378_s28, 4096  ;;  %s2205_s11 = smov [#allocation2]  }
  0x55   : > { %p2113_p12 = scmp.ne.s32.totalorder %s2378_s28, %s2112_s30  ;;  %s2117_s23 = sshll.u32 %s2205_s11, 4  ;;  %s2118_s23 = int_to_ptr.vmem [resolvable:$false] %s2117_s23 }
  0x56   : > { %s2119_s7 = scalar_lea.vmem %s2118_s23, 8192  ;;  %p2120_p4 = scmp.lt.s32.totalorder %s2378_s28, %s2118_s23 }
  0x57   : > { %p2115_p2 = pnand %p2113_p12, %p2099_p0  ;;  %p2121_p13 = scmp.lt.s32.totalorder %s2119_s7, %s2112_s30 }
  0x59   : > { %p2116_p7 = pneg %p2115_p2  ;;  %p2122_p6 = por %p2121_p13, %p2120_p4 }
  0x5b   : > { %p2123_p10 = pnand %p2122_p6, %p2116_p7 }
  0x5d   : > { %2126 = shalt.err (!%p2123_p10)
}
  0x5e   : > { %1917 = dma.hbm_to_vmem [thread:$0]  (!%p2380_p11), %s2376_s10, 4096, %s2378_s28, %s2384_s15, %s2203_s12, %s2203_s12, %s2204_s13  }
  0x5f   : > { %231 = sbr.rel (%p2280_p8) target bundleno = 841 (0x349), region = 40  ;;  %s2418_s17 = sand.u32 (!%p2280_p8), 1, %s2189_s19  }
  0x60   : > { %s1787_s6 = sshll.u32 (!%p2280_p8), %s2418_s17, 8  ;;  %s234_s8 = scalar_lea.sflag (!%p2280_p8), [#allocation3], %s2418_s17 }
  0x61   : > { %s2422_s9 = scalar_lea.vmem (!%p2280_p8), [#allocation2], %s1787_s6  ;;  %p2878_p4 = scmp.ne.s32.totalorder (!%p2280_p8), %s2871_s24, 0 }
  0x66   : > { %2172 = dma.done.wait (%p2878_p4), %s234_s8, 4096  }
  0x67   : > { %2174 = vsyncadd (%p2878_p4), %s234_s8, 4294963200  ;;  %p2879_p7 = scmp.eq.s32.totalorder %s2261_s22, 0 }
  0x69   : > { %2176 = dma.done.wait (%p2879_p7), [#allocation6], 4096   ;;  %p2880_p8 = pmov %p2879_p7 }
  0x6a   : > { %v2206_v0 = vmov 0   ;;  %v1969_v1 = vld [vmem:[#allocation5 + $0x4] ss:$8 sps:$4 sm:$0xff]   ;;  %v1971_v2 = vld [vmem:[#allocation5] ss:$8 sps:$4 sm:$0xff]   ;;  %v1995_v19 = vld [vmem:[%s2422_s9 + $0x10] sm:$0xff]   ;;  %v357_v59 = vlaneseq }
  0x6b   : > { %2178 = vsyncadd (%p2880_p8), [#allocation6], 4294963200  ;;  %671 = vmatprep.mubr.bf16.mxu0 %v2206_v0  ;;  %1863 = vmatprep.subr.bf16.mxu1 %v2206_v0  ;;  %v1972_v3 = vld [vmem:[#allocation5 + $0x14] ss:$8 sps:$4 sm:$0xff]   ;;  %v1974_v4 = vld [vmem:[#allocation5 + $0x10] ss:$8 sps:$4 sm:$0xff]  }
  0x6c   : > { %639 = vmatprep.subr.bf16.mxu0 %v1969_v1  ;;  %v1975_v5 = vld [vmem:[#allocation5 + $0x24] ss:$8 sps:$4 sm:$0xff]   ;;  %v1977_v6 = vld [vmem:[#allocation5 + $0x20] ss:$8 sps:$4 sm:$0xff]   ;;  %v1978_v7 = vld [vmem:[#allocation5 + $0x34] ss:$8 sps:$4 sm:$0xff]  }
  0x6d   : > { %640 = vmatpush1.bf16.msra.mxu0 %v1971_v2  ;;  %v1980_v8 = vld [vmem:[#allocation5 + $0x30] ss:$8 sps:$4 sm:$0xff]   ;;  %v1981_v9 = vld [vmem:[#allocation5 + $0x44] ss:$8 sps:$4 sm:$0xff]   ;;  %v1983_v10 = vld [vmem:[#allocation5 + $0x40] ss:$8 sps:$4 sm:$0xff]  }
  0x6e   : > { %641 = vmatprep.subr.bf16.mxu0 %v1972_v3  ;;  %v1984_v11 = vld [vmem:[#allocation5 + $0x54] ss:$8 sps:$4 sm:$0xff]   ;;  %v1986_v12 = vld [vmem:[#allocation5 + $0x50] ss:$8 sps:$4 sm:$0xff]   ;;  %v1987_v13 = vld [vmem:[#allocation5 + $0x64] ss:$8 sps:$4 sm:$0xff]  }
  0x6f   : > { %v1989_v14 = vld [vmem:[#allocation5 + $0x60] ss:$8 sps:$4 sm:$0xff]   ;;  %v1990_v15 = vld [vmem:[#allocation5 + $0x74] ss:$8 sps:$4 sm:$0xff]   ;;  %v1992_v16 = vld [vmem:[#allocation5 + $0x70] ss:$8 sps:$4 sm:$0xff]  }
  0x70   : > { %v1993_v17 = vld [vmem:[%s2422_s9] sm:$0xff]   ;;  %v1994_v18 = vld [vmem:[%s2422_s9 + $0x8] sm:$0xff]   ;;  %v1996_v20 = vld [vmem:[%s2422_s9 + $0x18] sm:$0xff]   ;;  %v358_v60 = vshrl.u32 %v357_v59, 7  ;;  %s1790_s12 = sshll.u32 %s2418_s17, 9  ;;  %s1862_s14 = sshll.u32 %s2261_s22, 13 }
  0x71   : > { %642 = vmatpush1.bf16.msra.mxu0 %v1974_v4  ;;  %v1997_v21 = vld [vmem:[%s2422_s9 + $0x20] sm:$0xff]   ;;  %v1998_v22 = vld [vmem:[%s2422_s9 + $0x28] sm:$0xff]   ;;  %v1999_v24 = vld [vmem:[%s2422_s9 + $0x30] sm:$0xff]   ;;  %s2674_s28 = scalar_lea.vmem [#allocation8], %s1790_s12  ;;  %s2813_s23 = scalar_lea.hbm %s2867_s5, %s1862_s14 }
  0x72   : > { %643 = vmatprep.subr.bf16.mxu0 %v1975_v5  ;;  %v2015_v23 = vld [vmem:[#allocation7] sm:$0xff]   ;;  %v2017_v25 = vld [vmem:[#allocation7 + $0x8] sm:$0xff]   ;;  %v2018_v26 = vld [vmem:[#allocation7 + $0x10] sm:$0xff]   ;;  %v359_v62 = vsub.s32 0, %v358_v60  ;;  %v363_v1 = vsub.s32 1, %v358_v60  ;;  %s1686_s15 = sshll.u32 %s2674_s28, 4  ;;  %s2815_s15 = int_to_ptr.vmem [resolvable:$true] %s1686_s15 }
  0x73   : > { %1879 = vmatpush1.bf16.msra.mxu1 %v2015_v23  ;;  %v2000_v27 = vld [vmem:[%s2422_s9 + $0x38] sm:$0xff]   ;;  %v2021_v29 = vld [vmem:[#allocation7 + $0x20] sm:$0xff]   ;;  %v2023_v31 = vld [vmem:[#allocation7 + $0x28] sm:$0xff]   ;;  %s1673_s22 = scalar_lea.sflag [#allocation4], %s2418_s17  ;;  %s2127_s7 = scalar_lea.vmem %s2815_s15, 8192 }
  0x74   : > { %1864 = vmatprep.subr.bf16.mxu1 %v2206_v0  ;;  %v2020_v28 = vld [vmem:[#allocation7 + $0x18] sm:$0xff]   ;;  %v2001_v30 = vld [vmem:[%s2422_s9 + $0x40] sm:$0xff]   ;;  %v2024_v32 = vld [vmem:[#allocation7 + $0x30] sm:$0xff]   ;;  %p2128_p11 = scmp.ne.s32.totalorder %s2815_s15, %s2127_s7  ;;  %p2881_p0 = scmp.ne.s32.totalorder %s2876_s29, 0 }
  0x75   : > { %644 = vmatpush1.bf16.msra.mxu0 %v1977_v6  ;;  %v2002_v33 = vld [vmem:[%s2422_s9 + $0x48] sm:$0xff]   ;;  %v2026_v34 = vld [vmem:[#allocation7 + $0x38] sm:$0xff]   ;;  %v2027_v35 = vld [vmem:[#allocation7 + $0x40] sm:$0xff]   ;;  %s2207_s6 = smov [#allocation8]  }
  0x76   : > { %645 = vmatprep.subr.bf16.mxu0 %v1978_v7  ;;  %v2003_v36 = vld [vmem:[%s2422_s9 + $0x50] sm:$0xff]   ;;  %v2029_v37 = vld [vmem:[#allocation7 + $0x48] sm:$0xff]   ;;  %v2004_v38 = vld [vmem:[%s2422_s9 + $0x58] sm:$0xff]   ;;  %p2129_p1 = pnand %p2128_p11, %p2881_p0  ;;  %s2131_s8 = sshll.u32 %s2207_s6, 4  ;;  %s2132_s8 = int_to_ptr.vmem [resolvable:$false] %s2131_s8 }
  0x77   : > { %1880 = vmatpush1.bf16.msra.mxu1 %v2017_v25  ;;  %v2030_v39 = vld [vmem:[#allocation7 + $0x50] sm:$0xff]   ;;  %v2032_v40 = vld [vmem:[#allocation7 + $0x58] sm:$0xff]   ;;  %v2005_v41 = vld [vmem:[%s2422_s9 + $0x60] sm:$0xff]   ;;  %p2134_p5 = scmp.lt.s32.totalorder %s2815_s15, %s2132_s8 }
  0x78   : > { %1865 = vmatprep.subr.bf16.mxu1 %v2206_v0  ;;  %v2033_v42 = vld [vmem:[#allocation7 + $0x60] sm:$0xff]   ;;  %v2035_v43 = vld [vmem:[#allocation7 + $0x68] sm:$0xff]   ;;  %v2036_v45 = vld [vmem:[#allocation7 + $0x70] sm:$0xff]   ;;  %p2130_p3 = pneg %p2129_p1 }
  0x79   : > { %646 = vmatpush1.bf16.msra.mxu0 %v1980_v8  ;;  %v2006_v44 = vld [vmem:[%s2422_s9 + $0x68] sm:$0xff]   ;;  %v2038_v46 = vld [vmem:[#allocation7 + $0x78] sm:$0xff]   ;;  %v2007_v47 = vld [vmem:[%s2422_s9 + $0x70] sm:$0xff]  }
  0x7a   : > { %647 = vmatprep.subr.bf16.mxu0 %v1981_v9  ;;  %v2008_v48 = vld [vmem:[%s2422_s9 + $0x78] sm:$0xff]   ;;  %v2009_v49 = vld [vmem:[%s2422_s9 + $0x80] sm:$0xff]   ;;  %v2010_v50 = vld [vmem:[%s2422_s9 + $0x88] sm:$0xff]  }
  0x7b   : > { %1881 = vmatpush1.bf16.msra.mxu1 %v2018_v26  ;;  %v2011_v51 = vld [vmem:[%s2422_s9 + $0x90] sm:$0xff]   ;;  %v2012_v52 = vld [vmem:[%s2422_s9 + $0x98] sm:$0xff]   ;;  %v2013_v53 = vld [vmem:[%s2422_s9 + $0xa0] sm:$0xff]  }
  0x7c   : > { %1866 = vmatprep.subr.bf16.mxu1 %v2206_v0  ;;  %v2014_v54 = vld [vmem:[%s2422_s9 + $0xa8] sm:$0xff]   ;;  %v2016_v55 = vld [vmem:[%s2422_s9 + $0xb0] sm:$0xff]   ;;  %v2019_v56 = vld [vmem:[%s2422_s9 + $0xb8] sm:$0xff]  }
  0x7d   : > { %648 = vmatpush1.bf16.msra.mxu0 %v1983_v10  ;;  %v2022_v57 = vld [vmem:[%s2422_s9 + $0xc0] sm:$0xff]   ;;  %v2025_v58 = vld [vmem:[%s2422_s9 + $0xc8] sm:$0xff]   ;;  %v2028_v61 = vld [vmem:[%s2422_s9 + $0xd0] sm:$0xff]  }
  0x7e   : > { %649 = vmatprep.subr.bf16.mxu0 %v1984_v11  ;;  %v355_v63 = vld [vmem:[%s2864_s2] sm:$0x3]  ;;  %v2031_v7 = vld [vmem:[%s2422_s9 + $0xd8] sm:$0xff]  }
  0x7f   : > { %1882 = vmatpush1.bf16.msra.mxu1 %v2020_v28  ;;  %v2521_v2 = vrot.slane %v355_v63, %v359_v62  ;;  %v2523_v3 = vrot.slane %v355_v63, %v363_v1 }
  0x80   : > { %1867 = vmatprep.subr.bf16.mxu1 %v2206_v0 }
  0x81   : > { %650 = vmatpush1.bf16.msra.mxu0 %v1986_v12 }
  0x82   : > { %651 = vmatprep.subr.bf16.mxu0 %v1987_v13 }
  0x83   : > { %1883 = vmatpush1.bf16.msra.mxu1 %v2021_v29 }
  0x84   : > { %1868 = vmatprep.subr.bf16.mxu1 %v2206_v0 }
  0x85   : > { %652 = vmatpush1.bf16.msra.mxu0 %v1989_v14 }
  0x86   : > { %653 = vmatprep.subr.bf16.mxu0 %v1990_v15 }
  0x87   : > { %1884 = vmatpush1.bf16.msra.mxu1 %v2023_v31 }
  0x88   : > { %1869 = vmatprep.subr.bf16.mxu1 %v2206_v0 }
  0x89   : > { %654 = vmatpush1.bf16.msra.mxu0 %v1992_v16 }
  0x8a   : > { %1319 = vmatprep.subr.bf16.mxu0 %v2206_v0 }
  0x8b   : > { %1885 = vmatpush1.bf16.msra.mxu1 %v2024_v32 }
  0x8c   : > { %672 = vmatmul.mubr.bf16.vlgmr.msra.gmra.mrb[0].mxu0 %v1993_v17  ;;  %1870 = vmatprep.subr.bf16.mxu1 %v2206_v0 }
  0x8d   : > { %681 = vmatprep.mubr.bf16.mxu0 %v2206_v0  ;;  %1320 = vmatpush1.bf16.msra.mxu0 %v2015_v23 }
  0x8e   : > { %1321 = vmatprep.subr.bf16.mxu0 %v2206_v0 }
  0x8f   : > { %1886 = vmatpush1.bf16.msra.mxu1 %v2026_v34 }
  0x90   : > { %1871 = vmatprep.subr.bf16.mxu1 %v2206_v0 }
  0x91   : > { %1322 = vmatpush1.bf16.msra.mxu0 %v2017_v25 }
  0x92   : > { %1323 = vmatprep.subr.bf16.mxu0 %v2206_v0 }
  0x93   : > { %1887 = vmatpush1.bf16.msra.mxu1 %v2027_v35 }
  0x94   : > { %682 = vmatmul.mubr.bf16.gmra.mrb[4].mxu0 %v1994_v18  ;;  %1872 = vmatprep.subr.bf16.mxu1 %v2206_v0 }
  0x95   : > { %691 = vmatprep.mubr.bf16.mxu0 %v2206_v0  ;;  %1324 = vmatpush1.bf16.msra.mxu0 %v2018_v26 }
  0x96   : > { %1325 = vmatprep.subr.bf16.mxu0 %v2206_v0 }
  0x97   : > { %1888 = vmatpush1.bf16.msra.mxu1 %v2029_v37 }
  0x98   : > { %1873 = vmatprep.subr.bf16.mxu1 %v2206_v0 }
  0x99   : > { %1326 = vmatpush1.bf16.msra.mxu0 %v2020_v28 }
  0x9a   : > { %1327 = vmatprep.subr.bf16.mxu0 %v2206_v0 }
  0x9b   : > { %1889 = vmatpush1.bf16.msra.mxu1 %v2030_v39 }
  0x9c   : > { %692 = vmatmul.mubr.bf16.gmra.mrb[8].mxu0 %v1995_v19  ;;  %1874 = vmatprep.subr.bf16.mxu1 %v2206_v0 }
  0x9d   : > { %701 = vmatprep.mubr.bf16.mxu0 %v2206_v0  ;;  %1328 = vmatpush1.bf16.msra.mxu0 %v2021_v29 }
  0x9e   : > { %1329 = vmatprep.subr.bf16.mxu0 %v2206_v0 }
  0x9f   : > { %1890 = vmatpush1.bf16.msra.mxu1 %v2032_v40 }
  0xa0   : > { %1875 = vmatprep.subr.bf16.mxu1 %v2206_v0 }
  0xa1   : > { %1330 = vmatpush1.bf16.msra.mxu0 %v2023_v31 }
  0xa2   : > { %1331 = vmatprep.subr.bf16.mxu0 %v2206_v0 }
  0xa3   : > { %1891 = vmatpush1.bf16.msra.mxu1 %v2033_v42 }
  0xa4   : > { %702 = vmatmul.mubr.bf16.gmra.mrb[12].mxu0 %v1996_v20  ;;  %1876 = vmatprep.subr.bf16.mxu1 %v2206_v0 }
  0xa5   : > { %711 = vmatprep.mubr.bf16.mxu0 %v2206_v0  ;;  %1332 = vmatpush1.bf16.msra.mxu0 %v2024_v32 }
  0xa6   : > { %1333 = vmatprep.subr.bf16.mxu0 %v2206_v0 }
  0xa7   : > { %1892 = vmatpush1.bf16.msra.mxu1 %v2035_v43 }
  0xa8   : > { %1877 = vmatprep.subr.bf16.mxu1 %v2206_v0 }
  0xa9   : > { %1334 = vmatpush1.bf16.msra.mxu0 %v2026_v34 }
  0xaa   : > { %1335 = vmatprep.subr.bf16.mxu0 %v2206_v0 }
  0xab   : > { %1893 = vmatpush1.bf16.msra.mxu1 %v2036_v45 }
  0xac   : > { %712 = vmatmul.mubr.bf16.gmra.mrb[16].mxu0 %v1997_v21  ;;  %1878 = vmatprep.subr.bf16.mxu1 %v2206_v0 }
  0xad   : > { %721 = vmatprep.mubr.bf16.mxu0 %v2206_v0  ;;  %1336 = vmatpush1.bf16.msra.mxu0 %v2027_v35 }
  0xae   : > { %1337 = vmatprep.subr.bf16.mxu0 %v2206_v0 }
  0xaf   : > { %1894 = vmatpush1.bf16.msra.mxu1 %v2038_v46 }
  0xb1   : > { %1338 = vmatpush1.bf16.msra.mxu0 %v2029_v37  ;;  %v2037_v37 = vld [vmem:[%s2422_s9 + $0xe8] sm:$0xff]  }
  0xb2   : > { %1339 = vmatprep.subr.bf16.mxu0 %v2206_v0 }
  0xb4   : > { %722 = vmatmul.mubr.bf16.gmra.mrb[20].mxu0 %v1998_v22  ;;  %v2034_v22 = vld [vmem:[%s2422_s9 + $0xe0] sm:$0xff]  }
  0xb5   : > { %731 = vmatprep.mubr.bf16.mxu0 %v2206_v0  ;;  %1340 = vmatpush1.bf16.msra.mxu0 %v2030_v39 }
  0xb6   : > { %1341 = vmatprep.subr.bf16.mxu0 %v2206_v0 }
  0xb9   : > { %1342 = vmatpush1.bf16.msra.mxu0 %v2032_v40 }
  0xba   : > { %1343 = vmatprep.subr.bf16.mxu0 %v2206_v0 }
  0xbc   : > { %732 = vmatmul.mubr.bf16.gmra.mrb[24].mxu0 %v1999_v24 }
  0xbd   : > { %741 = vmatprep.mubr.bf16.mxu0 %v2206_v0  ;;  %1344 = vmatpush1.bf16.msra.mxu0 %v2033_v42 }
  0xbe   : > { %1345 = vmatprep.subr.bf16.mxu0 %v2206_v0 }
  0xc1   : > { %1346 = vmatpush1.bf16.msra.mxu0 %v2035_v43 }
  0xc2   : > { %1347 = vmatprep.subr.bf16.mxu0 %v2206_v0 }
  0xc4   : > { %742 = vmatmul.mubr.bf16.gmra.mrb[28].mxu0 %v2000_v27 }
  0xc5   : > { %751 = vmatprep.mubr.bf16.mxu0 %v2206_v0  ;;  %1348 = vmatpush1.bf16.msra.mxu0 %v2036_v45 }
  0xc6   : > { %1349 = vmatprep.subr.bf16.mxu0 %v2206_v0 }
  0xc9   : > { %1350 = vmatpush1.bf16.msra.mxu0 %v2038_v46 }
  0xcc   : > { %752 = vmatmul.mubr.bf16.gmra.mrb[32].mxu0 %v2001_v30 }
  0xcd   : > { %761 = vmatprep.mubr.bf16.mxu0 %v2206_v0 }
  0xd4   : > { %762 = vmatmul.mubr.bf16.gmra.mrb[36].mxu0 %v2002_v33 }
  0xd5   : > { %771 = vmatprep.mubr.bf16.mxu0 %v2206_v0 }
  0xdc   : > { %772 = vmatmul.mubr.bf16.gmra.mrb[40].mxu0 %v2003_v36 }
  0xdd   : > { %781 = vmatprep.mubr.bf16.mxu0 %v2206_v0 }
  0xe4   : > { %782 = vmatmul.mubr.bf16.gmra.mrb[44].mxu0 %v2004_v38 }
  0xe5   : > { %791 = vmatprep.mubr.bf16.mxu0 %v2206_v0 }
  0xec   : > { %792 = vmatmul.mubr.bf16.gmra.mrb[48].mxu0 %v2005_v41 }
  0xed   : > { %801 = vmatprep.mubr.bf16.mxu0 %v2206_v0 }
  0xf4   : > { %802 = vmatmul.mubr.bf16.gmra.mrb[52].mxu0 %v2006_v44 }
  0xf5   : > { %811 = vmatprep.mubr.bf16.mxu0 %v2206_v0 }
  0xfc   : > { %812 = vmatmul.mubr.bf16.gmra.mrb[56].mxu0 %v2007_v47 }
  0xfd   : > { %821 = vmatprep.mubr.bf16.mxu0 %v2206_v0 }
 0x104   : > { %822 = vmatmul.mubr.bf16.gmra.mrb[60].mxu0 %v2008_v48 }
 0x105   : > { %831 = vmatprep.mubr.bf16.mxu0 %v2206_v0 }
 0x10c   : > { %832 = vmatmul.mubr.bf16.gmra.mrb[64].mxu0 %v2009_v49 }
 0x10d   : > { %841 = vmatprep.mubr.bf16.mxu0 %v2206_v0 }
 0x114   : > { %842 = vmatmul.mubr.bf16.gmra.mrb[68].mxu0 %v2010_v50 }
 0x115   : > { %851 = vmatprep.mubr.bf16.mxu0 %v2206_v0 }
 0x11c   : > { %852 = vmatmul.mubr.bf16.gmra.mrb[72].mxu0 %v2011_v51 }
 0x11d   : > { %861 = vmatprep.mubr.bf16.mxu0 %v2206_v0 }
 0x124   : > { %862 = vmatmul.mubr.bf16.gmra.mrb[76].mxu0 %v2012_v52  ;;  %v2039_v52 = vld [vmem:[%s2422_s9 + $0xf0] sm:$0xff]  }
 0x125   : > { %871 = vmatprep.mubr.bf16.mxu0 %v2206_v0 }
 0x12c   : > { %872 = vmatmul.mubr.bf16.gmra.mrb[80].mxu0 %v2013_v53 }
 0x12d   : > { %881 = vmatprep.mubr.bf16.mxu0 %v2206_v0 }
 0x134   : > { %882 = vmatmul.mubr.bf16.gmra.mrb[84].mxu0 %v2014_v54 }
 0x135   : > { %891 = vmatprep.mubr.bf16.mxu0 %v2206_v0 }
 0x13c   : > { %892 = vmatmul.mubr.bf16.gmra.mrb[88].mxu0 %v2016_v55 }
 0x13d   : > { %901 = vmatprep.mubr.bf16.mxu0 %v2206_v0 }
 0x144   : > { %902 = vmatmul.mubr.bf16.gmra.mrb[92].mxu0 %v2019_v56 }
 0x145   : > { %911 = vmatprep.mubr.bf16.mxu0 %v2206_v0 }
 0x14c   : > { %912 = vmatmul.mubr.bf16.gmra.mrb[96].mxu0 %v2022_v57 }
 0x14d   : > { %921 = vmatprep.mubr.bf16.mxu0 %v2206_v0 }
 0x154   : > { %922 = vmatmul.mubr.bf16.gmra.mrb[100].mxu0 %v2025_v58 }
 0x155   : > { %931 = vmatprep.mubr.bf16.mxu0 %v2206_v0 }
 0x15c   : > { %932 = vmatmul.mubr.bf16.gmra.mrb[104].mxu0 %v2028_v61 }
 0x15d   : > { %941 = vmatprep.mubr.bf16.mxu0 %v2206_v0 }
 0x15f   : > { %v673_v4 = vpop.f32.mrb[0].mxu0 }
 0x160   : > { %v674_v5 = vadd.f32 %v673_v4, %v2521_v2  ;;  %v675_v6 = vpop.f32.mrb[1].mxu0 }
 0x161   : > { %v676_v8 = vadd.f32 %v675_v6, %v2523_v3  ;;  %v677_v9 = vpop.f32.mrb[2].mxu0  ;;  %v2040_v6 = vld [vmem:[%s2422_s9 + $0xf8] sm:$0xff]   ;;  %s2133_s9 = scalar_lea.vmem %s2132_s8, 16384 }
 0x162   : > { %v678_v10 = vadd.f32 %v677_v9, %v2521_v2  ;;  %v679_v11 = vpop.f32.mrb[3].mxu0  ;;  %v992_v13 = vmax.f32 %v674_v5, 0.0  ;;  %p2135_p9 = scmp.lt.s32.totalorder %s2133_s9, %s2127_s7 }
 0x163   : > { %v680_v12 = vadd.f32 %v679_v11, %v2523_v3  ;;  %v993_v15 = vmax.f32 %v676_v8, 0.0 }
 0x164   : > { %v994_v14 = vmax.f32 %v678_v10, 0.0  ;;  %942 = vmatmul.mubr.bf16.gmra.mrb[108].mxu0 %v2031_v7  ;;  %p2136_p12 = por %p2135_p9, %p2134_p5 }
 0x165   : > { %v995_v16 = vmax.f32 %v680_v12, 0.0  ;;  %951 = vmatprep.mubr.bf16.mxu0 %v2206_v0 }
 0x166   : > { %v2532_v17 = vpack.c.bf16 %v994_v14, %v992_v13  ;;  %p2137_p2 = pnand %p2136_p12, %p2130_p3 }
 0x167   : > { %v2534_v18 = vpack.c.bf16 %v995_v16, %v993_v15  ;;  %v683_v19 = vpop.f32.mrb[4].mxu0 }
 0x168   : > { %v684_v20 = vadd.f32 %v683_v19, %v2521_v2  ;;  %v685_v21 = vpop.f32.mrb[5].mxu0 }
 0x169   : > { %v686_v23 = vadd.f32 %v685_v21, %v2523_v3  ;;  %v687_v24 = vpop.f32.mrb[6].mxu0 }
 0x16a   : > { %v688_v25 = vadd.f32 %v687_v24, %v2521_v2  ;;  %v689_v26 = vpop.f32.mrb[7].mxu0  ;;  %v996_v28 = vmax.f32 %v684_v20, 0.0 }
 0x16b   : > { %v690_v27 = vadd.f32 %v689_v26, %v2523_v3  ;;  %v997_v30 = vmax.f32 %v686_v23, 0.0 }
 0x16c   : > { %v998_v29 = vmax.f32 %v688_v25, 0.0  ;;  %952 = vmatmul.mubr.bf16.gmra.mrb[112].mxu0 %v2034_v22 }
 0x16d   : > { %v999_v31 = vmax.f32 %v690_v27, 0.0  ;;  %961 = vmatprep.mubr.bf16.mxu0 %v2206_v0 }
 0x16e   : > { %v2542_v32 = vpack.c.bf16 %v998_v29, %v996_v28 }
 0x16f   : > { %v2544_v33 = vpack.c.bf16 %v999_v31, %v997_v30  ;;  %v693_v34 = vpop.f32.mrb[8].mxu0 }
 0x170   : > { %v694_v35 = vadd.f32 %v693_v34, %v2521_v2  ;;  %v695_v36 = vpop.f32.mrb[9].mxu0 }
 0x171   : > { %v696_v38 = vadd.f32 %v695_v36, %v2523_v3  ;;  %v697_v39 = vpop.f32.mrb[10].mxu0 }
 0x172   : > { %v698_v40 = vadd.f32 %v697_v39, %v2521_v2  ;;  %v699_v41 = vpop.f32.mrb[11].mxu0  ;;  %v1000_v43 = vmax.f32 %v694_v35, 0.0 }
 0x173   : > { %v700_v42 = vadd.f32 %v699_v41, %v2523_v3  ;;  %v1001_v45 = vmax.f32 %v696_v38, 0.0 }
 0x174   : > { %v1002_v44 = vmax.f32 %v698_v40, 0.0  ;;  %962 = vmatmul.mubr.bf16.gmra.mrb[116].mxu0 %v2037_v37 }
 0x175   : > { %v1003_v46 = vmax.f32 %v700_v42, 0.0  ;;  %971 = vmatprep.mubr.bf16.mxu0 %v2206_v0 }
 0x176   : > { %v1124_v47 = vpack.c.bf16 %v1002_v44, %v1000_v43 }
 0x177   : > { %v703_v48 = vpop.f32.mrb[12].mxu0  ;;  %v1125_v49 = vpack.c.bf16 %v1003_v46, %v1001_v45 }
 0x178   : > { %v704_v50 = vadd.f32 %v703_v48, %v2521_v2  ;;  %v705_v51 = vpop.f32.mrb[13].mxu0 }
 0x179   : > { %v706_v53 = vadd.f32 %v705_v51, %v2523_v3  ;;  %v707_v54 = vpop.f32.mrb[14].mxu0  ;;  %1367 = vmatprep.mubr.bf16.mxu1 %v1125_v49 }
 0x17a   : > { %v708_v55 = vadd.f32 %v707_v54, %v2521_v2  ;;  %v709_v56 = vpop.f32.mrb[15].mxu0  ;;  %1368 = vmatmul.mubr.bf16.vlgmr.msra.gmra.mrb[0].mxu1 %v1124_v47  ;;  %v1004_v58 = vmax.f32 %v704_v50, 0.0 }
 0x17b   : > { %v710_v57 = vadd.f32 %v709_v56, %v2523_v3  ;;  %v1005_v60 = vmax.f32 %v706_v53, 0.0 }
 0x17c   : > { %v1006_v59 = vmax.f32 %v708_v55, 0.0  ;;  %972 = vmatmul.mubr.bf16.gmra.mrb[120].mxu0 %v2039_v52 }
 0x17d   : > { %v1007_v61 = vmax.f32 %v710_v57, 0.0  ;;  %981 = vmatprep.mubr.bf16.mxu0 %v2206_v0 }
 0x17e   : > { %v1126_v62 = vpack.c.bf16 %v1006_v59, %v1004_v58 }
 0x17f   : > { %v1127_v63 = vpack.c.bf16 %v1007_v61, %v1005_v60  ;;  %v713_v1 = vpop.f32.mrb[16].mxu0 }
 0x180   : > { %v714_v4 = vadd.f32 %v713_v1, %v2521_v2  ;;  %v715_v5 = vpop.f32.mrb[17].mxu0 }
 0x181   : > { %v716_v7 = vadd.f32 %v715_v5, %v2523_v3  ;;  %v717_v8 = vpop.f32.mrb[18].mxu0  ;;  %1375 = vmatprep.mubr.bf16.mxu1 %v1127_v63 }
 0x182   : > { %v718_v9 = vadd.f32 %v717_v8, %v2521_v2  ;;  %v719_v10 = vpop.f32.mrb[19].mxu0  ;;  %1376 = vmatmul.mubr.bf16.gmra.mrb[4].mxu1 %v1126_v62  ;;  %v1008_v12 = vmax.f32 %v714_v4, 0.0 }
 0x183   : > { %v720_v11 = vadd.f32 %v719_v10, %v2523_v3  ;;  %v1009_v0 = vmax.f32 %v716_v7, 0.0 }
 0x184   : > { %v1010_v13 = vmax.f32 %v718_v9, 0.0  ;;  %982 = vmatmul.mubr.bf16.gmra.mrb[124].mxu0 %v2040_v6 }
 0x185   : > { %v1011_v14 = vmax.f32 %v720_v11, 0.0  ;;  %1351 = vmatprep.mubr.bf16.mxu0 %v2534_v18 }
 0x186   : > { %v1128_v15 = vpack.c.bf16 %v1010_v13, %v1008_v12 }
 0x187   : > { %v1129_v16 = vpack.c.bf16 %v1011_v14, %v1009_v0  ;;  %v723_v19 = vpop.f32.mrb[20].mxu0 }
 0x188   : > { %v724_v20 = vadd.f32 %v723_v19, %v2521_v2  ;;  %v725_v21 = vpop.f32.mrb[21].mxu0 }
 0x189   : > { %v726_v22 = vadd.f32 %v725_v21, %v2523_v3  ;;  %v727_v23 = vpop.f32.mrb[22].mxu0  ;;  %1383 = vmatprep.mubr.bf16.mxu1 %v1129_v16 }
 0x18a   : > { %v728_v24 = vadd.f32 %v727_v23, %v2521_v2  ;;  %v729_v25 = vpop.f32.mrb[23].mxu0  ;;  %1384 = vmatmul.mubr.bf16.gmra.mrb[8].mxu1 %v1128_v15  ;;  %v1012_v27 = vmax.f32 %v724_v20, 0.0 }
 0x18b   : > { %v730_v26 = vadd.f32 %v729_v25, %v2523_v3  ;;  %v1013_v18 = vmax.f32 %v726_v22, 0.0 }
 0x18c   : > { %v1014_v28 = vmax.f32 %v728_v24, 0.0  ;;  %1352 = vmatmul.mubr.bf16.vlgmr.msra.gmra.mrb[128].mxu0 %v2532_v17 }
 0x18d   : > { %v1015_v29 = vmax.f32 %v730_v26, 0.0  ;;  %1359 = vmatprep.mubr.bf16.mxu0 %v2544_v33 }
 0x18e   : > { %v1130_v30 = vpack.c.bf16 %v1014_v28, %v1012_v27 }
 0x18f   : > { %v1131_v31 = vpack.c.bf16 %v1015_v29, %v1013_v18  ;;  %v733_v34 = vpop.f32.mrb[24].mxu0 }
 0x190   : > { %v734_v35 = vadd.f32 %v733_v34, %v2521_v2  ;;  %v735_v36 = vpop.f32.mrb[25].mxu0 }
 0x191   : > { %v736_v37 = vadd.f32 %v735_v36, %v2523_v3  ;;  %v737_v38 = vpop.f32.mrb[26].mxu0  ;;  %1391 = vmatprep.mubr.bf16.mxu1 %v1131_v31 }
 0x192   : > { %v738_v39 = vadd.f32 %v737_v38, %v2521_v2  ;;  %v739_v40 = vpop.f32.mrb[27].mxu0  ;;  %1392 = vmatmul.mubr.bf16.gmra.mrb[12].mxu1 %v1130_v30  ;;  %v1016_v41 = vmax.f32 %v734_v35, 0.0 }
 0x193   : > { %v740_v17 = vadd.f32 %v739_v40, %v2523_v3  ;;  %v1017_v33 = vmax.f32 %v736_v37, 0.0 }
 0x194   : > { %v1018_v42 = vmax.f32 %v738_v39, 0.0  ;;  %1360 = vmatmul.mubr.bf16.gmra.mrb[132].mxu0 %v2542_v32 }
 0x195   : > { %v1019_v43 = vmax.f32 %v740_v17, 0.0 }
 0x196   : > { %v1132_v44 = vpack.c.bf16 %v1018_v42, %v1016_v41 }
 0x197   : > { %v1133_v45 = vpack.c.bf16 %v1019_v43, %v1017_v33  ;;  %v743_v46 = vpop.f32.mrb[28].mxu0 }
 0x198   : > { %v744_v47 = vadd.f32 %v743_v46, %v2521_v2  ;;  %v745_v48 = vpop.f32.mrb[29].mxu0 }
 0x199   : > { %v746_v49 = vadd.f32 %v745_v48, %v2523_v3  ;;  %v747_v50 = vpop.f32.mrb[30].mxu0  ;;  %1399 = vmatprep.mubr.bf16.mxu1 %v1133_v45 }
 0x19a   : > { %v748_v51 = vadd.f32 %v747_v50, %v2521_v2  ;;  %v749_v52 = vpop.f32.mrb[31].mxu0  ;;  %1400 = vmatmul.mubr.bf16.gmra.mrb[16].mxu1 %v1132_v44  ;;  %v1020_v54 = vmax.f32 %v744_v47, 0.0 }
 0x19b   : > { %v750_v53 = vadd.f32 %v749_v52, %v2523_v3  ;;  %v1021_v55 = vmax.f32 %v746_v49, 0.0 }
 0x19c   : > { %v1022_v32 = vmax.f32 %v748_v51, 0.0 }
 0x19d   : > { %v1023_v56 = vmax.f32 %v750_v53, 0.0 }
 0x19e   : > { %v1134_v57 = vpack.c.bf16 %v1022_v32, %v1020_v54 }
 0x19f   : > { %v1135_v58 = vpack.c.bf16 %v1023_v56, %v1021_v55  ;;  %v753_v59 = vpop.f32.mrb[32].mxu0 }
 0x1a0   : > { %v754_v60 = vadd.f32 %v753_v59, %v2521_v2  ;;  %v755_v61 = vpop.f32.mrb[33].mxu0 }
 0x1a1   : > { %v756_v62 = vadd.f32 %v755_v61, %v2523_v3  ;;  %v757_v63 = vpop.f32.mrb[34].mxu0  ;;  %1407 = vmatprep.mubr.bf16.mxu1 %v1135_v58 }
 0x1a2   : > { %v758_v1 = vadd.f32 %v757_v63, %v2521_v2  ;;  %v759_v4 = vpop.f32.mrb[35].mxu0  ;;  %1408 = vmatmul.mubr.bf16.gmra.mrb[20].mxu1 %v1134_v57  ;;  %v1024_v6 = vmax.f32 %v754_v60, 0.0 }
 0x1a3   : > { %v760_v5 = vadd.f32 %v759_v4, %v2523_v3  ;;  %v1025_v8 = vmax.f32 %v756_v62, 0.0 }
 0x1a4   : > { %v1026_v7 = vmax.f32 %v758_v1, 0.0 }
 0x1a5   : > { %v1027_v9 = vmax.f32 %v760_v5, 0.0 }
 0x1a6   : > { %v1136_v10 = vpack.c.bf16 %v1026_v7, %v1024_v6 }
 0x1a7   : > { %v1137_v11 = vpack.c.bf16 %v1027_v9, %v1025_v8  ;;  %v763_v12 = vpop.f32.mrb[36].mxu0 }
 0x1a8   : > { %v764_v13 = vadd.f32 %v763_v12, %v2521_v2  ;;  %v765_v0 = vpop.f32.mrb[37].mxu0 }
 0x1a9   : > { %v766_v14 = vadd.f32 %v765_v0, %v2523_v3  ;;  %v767_v15 = vpop.f32.mrb[38].mxu0  ;;  %1415 = vmatprep.mubr.bf16.mxu1 %v1137_v11 }
 0x1aa   : > { %v768_v16 = vadd.f32 %v767_v15, %v2521_v2  ;;  %v769_v19 = vpop.f32.mrb[39].mxu0  ;;  %1416 = vmatmul.mubr.bf16.gmra.mrb[24].mxu1 %v1136_v10  ;;  %v1028_v21 = vmax.f32 %v764_v13, 0.0 }
 0x1ab   : > { %v770_v20 = vadd.f32 %v769_v19, %v2523_v3  ;;  %v1029_v23 = vmax.f32 %v766_v14, 0.0 }
 0x1ac   : > { %v1030_v22 = vmax.f32 %v768_v16, 0.0 }
 0x1ad   : > { %v1031_v24 = vmax.f32 %v770_v20, 0.0 }
 0x1ae   : > { %v1138_v25 = vpack.c.bf16 %v1030_v22, %v1028_v21 }
 0x1af   : > { %v1139_v26 = vpack.c.bf16 %v1031_v24, %v1029_v23  ;;  %v773_v27 = vpop.f32.mrb[40].mxu0 }
 0x1b0   : > { %v774_v28 = vadd.f32 %v773_v27, %v2521_v2  ;;  %v775_v18 = vpop.f32.mrb[41].mxu0 }
 0x1b1   : > { %v776_v29 = vadd.f32 %v775_v18, %v2523_v3  ;;  %v777_v30 = vpop.f32.mrb[42].mxu0  ;;  %1423 = vmatprep.mubr.bf16.mxu1 %v1139_v26 }
 0x1b2   : > { %v778_v31 = vadd.f32 %v777_v30, %v2521_v2  ;;  %v779_v34 = vpop.f32.mrb[43].mxu0  ;;  %1424 = vmatmul.mubr.bf16.gmra.mrb[28].mxu1 %v1138_v25  ;;  %v1032_v36 = vmax.f32 %v774_v28, 0.0 }
 0x1b3   : > { %v780_v35 = vadd.f32 %v779_v34, %v2523_v3  ;;  %v1033_v38 = vmax.f32 %v776_v29, 0.0 }
 0x1b4   : > { %v1034_v37 = vmax.f32 %v778_v31, 0.0 }
 0x1b5   : > { %v1035_v39 = vmax.f32 %v780_v35, 0.0 }
 0x1b6   : > { %v1140_v40 = vpack.c.bf16 %v1034_v37, %v1032_v36 }
 0x1b7   : > { %v1141_v17 = vpack.c.bf16 %v1035_v39, %v1033_v38  ;;  %v783_v41 = vpop.f32.mrb[44].mxu0 }
 0x1b8   : > { %v784_v42 = vadd.f32 %v783_v41, %v2521_v2  ;;  %v785_v33 = vpop.f32.mrb[45].mxu0 }
 0x1b9   : > { %v786_v43 = vadd.f32 %v785_v33, %v2523_v3  ;;  %v787_v44 = vpop.f32.mrb[46].mxu0  ;;  %1431 = vmatprep.mubr.bf16.mxu1 %v1141_v17 }
 0x1ba   : > { %v788_v45 = vadd.f32 %v787_v44, %v2521_v2  ;;  %v789_v46 = vpop.f32.mrb[47].mxu0  ;;  %1432 = vmatmul.mubr.bf16.gmra.mrb[32].mxu1 %v1140_v40  ;;  %v1036_v48 = vmax.f32 %v784_v42, 0.0 }
 0x1bb   : > { %v790_v47 = vadd.f32 %v789_v46, %v2523_v3  ;;  %v1037_v50 = vmax.f32 %v786_v43, 0.0 }
 0x1bc   : > { %v1038_v49 = vmax.f32 %v788_v45, 0.0 }
 0x1bd   : > { %v1039_v51 = vmax.f32 %v790_v47, 0.0 }
 0x1be   : > { %v1142_v52 = vpack.c.bf16 %v1038_v49, %v1036_v48 }
 0x1bf   : > { %v1143_v53 = vpack.c.bf16 %v1039_v51, %v1037_v50  ;;  %v793_v54 = vpop.f32.mrb[48].mxu0 }
 0x1c0   : > { %v794_v32 = vadd.f32 %v793_v54, %v2521_v2  ;;  %v795_v55 = vpop.f32.mrb[49].mxu0 }
 0x1c1   : > { %v796_v56 = vadd.f32 %v795_v55, %v2523_v3  ;;  %v797_v57 = vpop.f32.mrb[50].mxu0  ;;  %1439 = vmatprep.mubr.bf16.mxu1 %v1143_v53 }
 0x1c2   : > { %v798_v58 = vadd.f32 %v797_v57, %v2521_v2  ;;  %v799_v59 = vpop.f32.mrb[51].mxu0  ;;  %1440 = vmatmul.mubr.bf16.gmra.mrb[36].mxu1 %v1142_v52  ;;  %v1040_v61 = vmax.f32 %v794_v32, 0.0 }
 0x1c3   : > { %v800_v60 = vadd.f32 %v799_v59, %v2523_v3  ;;  %v1041_v63 = vmax.f32 %v796_v56, 0.0 }
 0x1c4   : > { %v1042_v62 = vmax.f32 %v798_v58, 0.0 }
 0x1c5   : > { %v1043_v1 = vmax.f32 %v800_v60, 0.0 }
 0x1c6   : > { %v1144_v4 = vpack.c.bf16 %v1042_v62, %v1040_v61 }
 0x1c7   : > { %v1145_v5 = vpack.c.bf16 %v1043_v1, %v1041_v63  ;;  %v803_v6 = vpop.f32.mrb[52].mxu0 }
 0x1c8   : > { %v804_v7 = vadd.f32 %v803_v6, %v2521_v2  ;;  %v805_v8 = vpop.f32.mrb[53].mxu0 }
 0x1c9   : > { %v806_v9 = vadd.f32 %v805_v8, %v2523_v3  ;;  %v807_v10 = vpop.f32.mrb[54].mxu0  ;;  %1447 = vmatprep.mubr.bf16.mxu1 %v1145_v5 }
 0x1ca   : > { %v808_v11 = vadd.f32 %v807_v10, %v2521_v2  ;;  %v809_v12 = vpop.f32.mrb[55].mxu0  ;;  %1448 = vmatmul.mubr.bf16.gmra.mrb[40].mxu1 %v1144_v4  ;;  %v1044_v0 = vmax.f32 %v804_v7, 0.0 }
 0x1cb   : > { %v810_v13 = vadd.f32 %v809_v12, %v2523_v3  ;;  %v1045_v15 = vmax.f32 %v806_v9, 0.0 }
 0x1cc   : > { %v1046_v14 = vmax.f32 %v808_v11, 0.0 }
 0x1cd   : > { %v1047_v16 = vmax.f32 %v810_v13, 0.0 }
 0x1ce   : > { %v1146_v19 = vpack.c.bf16 %v1046_v14, %v1044_v0 }
 0x1cf   : > { %v1147_v20 = vpack.c.bf16 %v1047_v16, %v1045_v15  ;;  %v813_v21 = vpop.f32.mrb[56].mxu0 }
 0x1d0   : > { %v814_v22 = vadd.f32 %v813_v21, %v2521_v2  ;;  %v815_v23 = vpop.f32.mrb[57].mxu0 }
 0x1d1   : > { %v816_v24 = vadd.f32 %v815_v23, %v2523_v3  ;;  %v817_v25 = vpop.f32.mrb[58].mxu0  ;;  %1455 = vmatprep.mubr.bf16.mxu1 %v1147_v20 }
 0x1d2   : > { %v818_v26 = vadd.f32 %v817_v25, %v2521_v2  ;;  %v819_v27 = vpop.f32.mrb[59].mxu0  ;;  %1456 = vmatmul.mubr.bf16.gmra.mrb[44].mxu1 %v1146_v19  ;;  %v1048_v18 = vmax.f32 %v814_v22, 0.0 }
 0x1d3   : > { %v820_v28 = vadd.f32 %v819_v27, %v2523_v3  ;;  %v1049_v30 = vmax.f32 %v816_v24, 0.0 }
 0x1d4   : > { %v1050_v29 = vmax.f32 %v818_v26, 0.0 }
 0x1d5   : > { %v1051_v31 = vmax.f32 %v820_v28, 0.0 }
 0x1d6   : > { %v1148_v34 = vpack.c.bf16 %v1050_v29, %v1048_v18 }
 0x1d7   : > { %v1149_v35 = vpack.c.bf16 %v1051_v31, %v1049_v30  ;;  %v823_v36 = vpop.f32.mrb[60].mxu0 }
 0x1d8   : > { %v824_v37 = vadd.f32 %v823_v36, %v2521_v2  ;;  %v825_v38 = vpop.f32.mrb[61].mxu0 }
 0x1d9   : > { %v826_v39 = vadd.f32 %v825_v38, %v2523_v3  ;;  %v827_v40 = vpop.f32.mrb[62].mxu0  ;;  %1463 = vmatprep.mubr.bf16.mxu1 %v1149_v35 }
 0x1da   : > { %v828_v17 = vadd.f32 %v827_v40, %v2521_v2  ;;  %v829_v41 = vpop.f32.mrb[63].mxu0  ;;  %1464 = vmatmul.mubr.bf16.gmra.mrb[48].mxu1 %v1148_v34  ;;  %v1052_v33 = vmax.f32 %v824_v37, 0.0 }
 0x1db   : > { %v830_v42 = vadd.f32 %v829_v41, %v2523_v3  ;;  %v1053_v44 = vmax.f32 %v826_v39, 0.0 }
 0x1dc   : > { %v1054_v43 = vmax.f32 %v828_v17, 0.0 }
 0x1dd   : > { %v1055_v45 = vmax.f32 %v830_v42, 0.0 }
 0x1de   : > { %v1150_v46 = vpack.c.bf16 %v1054_v43, %v1052_v33 }
 0x1df   : > { %v1151_v47 = vpack.c.bf16 %v1055_v45, %v1053_v44  ;;  %v833_v48 = vpop.f32.mrb[64].mxu0 }
 0x1e0   : > { %v834_v49 = vadd.f32 %v833_v48, %v2521_v2  ;;  %v835_v50 = vpop.f32.mrb[65].mxu0 }
 0x1e1   : > { %v836_v51 = vadd.f32 %v835_v50, %v2523_v3  ;;  %v837_v52 = vpop.f32.mrb[66].mxu0  ;;  %1471 = vmatprep.mubr.bf16.mxu1 %v1151_v47 }
 0x1e2   : > { %v838_v53 = vadd.f32 %v837_v52, %v2521_v2  ;;  %v839_v54 = vpop.f32.mrb[67].mxu0  ;;  %1472 = vmatmul.mubr.bf16.gmra.mrb[52].mxu1 %v1150_v46  ;;  %v1056_v55 = vmax.f32 %v834_v49, 0.0 }
 0x1e3   : > { %v840_v32 = vadd.f32 %v839_v54, %v2523_v3  ;;  %v1057_v57 = vmax.f32 %v836_v51, 0.0 }
 0x1e4   : > { %v1058_v56 = vmax.f32 %v838_v53, 0.0 }
 0x1e5   : > { %v1059_v58 = vmax.f32 %v840_v32, 0.0 }
 0x1e6   : > { %v1152_v59 = vpack.c.bf16 %v1058_v56, %v1056_v55 }
 0x1e7   : > { %v1153_v60 = vpack.c.bf16 %v1059_v58, %v1057_v57  ;;  %v843_v61 = vpop.f32.mrb[68].mxu0 }
 0x1e8   : > { %v844_v62 = vadd.f32 %v843_v61, %v2521_v2  ;;  %v845_v63 = vpop.f32.mrb[69].mxu0 }
 0x1e9   : > { %v846_v1 = vadd.f32 %v845_v63, %v2523_v3  ;;  %v847_v4 = vpop.f32.mrb[70].mxu0  ;;  %1479 = vmatprep.mubr.bf16.mxu1 %v1153_v60 }
 0x1ea   : > { %v848_v5 = vadd.f32 %v847_v4, %v2521_v2  ;;  %v849_v6 = vpop.f32.mrb[71].mxu0  ;;  %1480 = vmatmul.mubr.bf16.gmra.mrb[56].mxu1 %v1152_v59  ;;  %v1060_v8 = vmax.f32 %v844_v62, 0.0 }
 0x1eb   : > { %v850_v7 = vadd.f32 %v849_v6, %v2523_v3  ;;  %v1061_v10 = vmax.f32 %v846_v1, 0.0 }
 0x1ec   : > { %v1062_v9 = vmax.f32 %v848_v5, 0.0 }
 0x1ed   : > { %v1063_v11 = vmax.f32 %v850_v7, 0.0 }
 0x1ee   : > { %v1154_v12 = vpack.c.bf16 %v1062_v9, %v1060_v8 }
 0x1ef   : > { %v1155_v13 = vpack.c.bf16 %v1063_v11, %v1061_v10  ;;  %v853_v0 = vpop.f32.mrb[72].mxu0 }
 0x1f0   : > { %v854_v14 = vadd.f32 %v853_v0, %v2521_v2  ;;  %v855_v15 = vpop.f32.mrb[73].mxu0 }
 0x1f1   : > { %v856_v16 = vadd.f32 %v855_v15, %v2523_v3  ;;  %v857_v19 = vpop.f32.mrb[74].mxu0  ;;  %1487 = vmatprep.mubr.bf16.mxu1 %v1155_v13 }
 0x1f2   : > { %v858_v20 = vadd.f32 %v857_v19, %v2521_v2  ;;  %v859_v21 = vpop.f32.mrb[75].mxu0  ;;  %1488 = vmatmul.mubr.bf16.gmra.mrb[60].mxu1 %v1154_v12  ;;  %v1064_v23 = vmax.f32 %v854_v14, 0.0 }
 0x1f3   : > { %v860_v22 = vadd.f32 %v859_v21, %v2523_v3  ;;  %v1065_v25 = vmax.f32 %v856_v16, 0.0 }
 0x1f4   : > { %v1066_v24 = vmax.f32 %v858_v20, 0.0 }
 0x1f5   : > { %v1067_v26 = vmax.f32 %v860_v22, 0.0 }
 0x1f6   : > { %v1156_v27 = vpack.c.bf16 %v1066_v24, %v1064_v23 }
 0x1f7   : > { %v1157_v28 = vpack.c.bf16 %v1067_v26, %v1065_v25  ;;  %v863_v18 = vpop.f32.mrb[76].mxu0 }
 0x1f8   : > { %v864_v29 = vadd.f32 %v863_v18, %v2521_v2  ;;  %v865_v30 = vpop.f32.mrb[77].mxu0 }
 0x1f9   : > { %v866_v31 = vadd.f32 %v865_v30, %v2523_v3  ;;  %v867_v34 = vpop.f32.mrb[78].mxu0  ;;  %1495 = vmatprep.mubr.bf16.mxu1 %v1157_v28 }
 0x1fa   : > { %v868_v35 = vadd.f32 %v867_v34, %v2521_v2  ;;  %v869_v36 = vpop.f32.mrb[79].mxu0  ;;  %1496 = vmatmul.mubr.bf16.gmra.mrb[64].mxu1 %v1156_v27  ;;  %v1068_v38 = vmax.f32 %v864_v29, 0.0 }
 0x1fb   : > { %v870_v37 = vadd.f32 %v869_v36, %v2523_v3  ;;  %v1069_v40 = vmax.f32 %v866_v31, 0.0 }
 0x1fc   : > { %v1070_v39 = vmax.f32 %v868_v35, 0.0 }
 0x1fd   : > { %v1071_v17 = vmax.f32 %v870_v37, 0.0 }
 0x1fe   : > { %v1158_v41 = vpack.c.bf16 %v1070_v39, %v1068_v38 }
 0x1ff   : > { %v1159_v42 = vpack.c.bf16 %v1071_v17, %v1069_v40  ;;  %v873_v33 = vpop.f32.mrb[80].mxu0 }
 0x200   : > { %v874_v43 = vadd.f32 %v873_v33, %v2521_v2  ;;  %v875_v44 = vpop.f32.mrb[81].mxu0 }
 0x201   : > { %v876_v45 = vadd.f32 %v875_v44, %v2523_v3  ;;  %v877_v46 = vpop.f32.mrb[82].mxu0  ;;  %1503 = vmatprep.mubr.bf16.mxu1 %v1159_v42 }
 0x202   : > { %v878_v47 = vadd.f32 %v877_v46, %v2521_v2  ;;  %v879_v48 = vpop.f32.mrb[83].mxu0  ;;  %1504 = vmatmul.mubr.bf16.gmra.mrb[68].mxu1 %v1158_v41  ;;  %v1072_v50 = vmax.f32 %v874_v43, 0.0 }
 0x203   : > { %v880_v49 = vadd.f32 %v879_v48, %v2523_v3  ;;  %v1073_v52 = vmax.f32 %v876_v45, 0.0 }
 0x204   : > { %v1074_v51 = vmax.f32 %v878_v47, 0.0 }
 0x205   : > { %v1075_v53 = vmax.f32 %v880_v49, 0.0 }
 0x206   : > { %v1160_v54 = vpack.c.bf16 %v1074_v51, %v1072_v50 }
 0x207   : > { %v1161_v32 = vpack.c.bf16 %v1075_v53, %v1073_v52  ;;  %v883_v55 = vpop.f32.mrb[84].mxu0 }
 0x208   : > { %v884_v56 = vadd.f32 %v883_v55, %v2521_v2  ;;  %v885_v57 = vpop.f32.mrb[85].mxu0 }
 0x209   : > { %v886_v58 = vadd.f32 %v885_v57, %v2523_v3  ;;  %v887_v59 = vpop.f32.mrb[86].mxu0  ;;  %1511 = vmatprep.mubr.bf16.mxu1 %v1161_v32 }
 0x20a   : > { %v888_v60 = vadd.f32 %v887_v59, %v2521_v2  ;;  %v889_v61 = vpop.f32.mrb[87].mxu0  ;;  %1512 = vmatmul.mubr.bf16.gmra.mrb[72].mxu1 %v1160_v54  ;;  %v1076_v63 = vmax.f32 %v884_v56, 0.0 }
 0x20b   : > { %v890_v62 = vadd.f32 %v889_v61, %v2523_v3  ;;  %v1077_v4 = vmax.f32 %v886_v58, 0.0 }
 0x20c   : > { %v1078_v1 = vmax.f32 %v888_v60, 0.0 }
 0x20d   : > { %v1079_v5 = vmax.f32 %v890_v62, 0.0 }
 0x20e   : > { %v1162_v6 = vpack.c.bf16 %v1078_v1, %v1076_v63 }
 0x20f   : > { %v1163_v7 = vpack.c.bf16 %v1079_v5, %v1077_v4  ;;  %v893_v8 = vpop.f32.mrb[88].mxu0 }
 0x210   : > { %v894_v9 = vadd.f32 %v893_v8, %v2521_v2  ;;  %v895_v10 = vpop.f32.mrb[89].mxu0 }
 0x211   : > { %v896_v11 = vadd.f32 %v895_v10, %v2523_v3  ;;  %v897_v12 = vpop.f32.mrb[90].mxu0  ;;  %1519 = vmatprep.mubr.bf16.mxu1 %v1163_v7 }
 0x212   : > { %v898_v13 = vadd.f32 %v897_v12, %v2521_v2  ;;  %v899_v0 = vpop.f32.mrb[91].mxu0  ;;  %1520 = vmatmul.mubr.bf16.gmra.mrb[76].mxu1 %v1162_v6  ;;  %v1080_v15 = vmax.f32 %v894_v9, 0.0 }
 0x213   : > { %v900_v14 = vadd.f32 %v899_v0, %v2523_v3  ;;  %v1081_v19 = vmax.f32 %v896_v11, 0.0 }
 0x214   : > { %v1082_v16 = vmax.f32 %v898_v13, 0.0 }
 0x215   : > { %v1083_v20 = vmax.f32 %v900_v14, 0.0 }
 0x216   : > { %v1164_v21 = vpack.c.bf16 %v1082_v16, %v1080_v15 }
 0x217   : > { %v1165_v22 = vpack.c.bf16 %v1083_v20, %v1081_v19  ;;  %v903_v23 = vpop.f32.mrb[92].mxu0 }
 0x218   : > { %v904_v24 = vadd.f32 %v903_v23, %v2521_v2  ;;  %v905_v25 = vpop.f32.mrb[93].mxu0 }
 0x219   : > { %v906_v26 = vadd.f32 %v905_v25, %v2523_v3  ;;  %v907_v27 = vpop.f32.mrb[94].mxu0  ;;  %1527 = vmatprep.mubr.bf16.mxu1 %v1165_v22 }
 0x21a   : > { %v908_v28 = vadd.f32 %v907_v27, %v2521_v2  ;;  %v909_v18 = vpop.f32.mrb[95].mxu0  ;;  %1528 = vmatmul.mubr.bf16.gmra.mrb[80].mxu1 %v1164_v21  ;;  %v1084_v30 = vmax.f32 %v904_v24, 0.0 }
 0x21b   : > { %v910_v29 = vadd.f32 %v909_v18, %v2523_v3  ;;  %v1085_v34 = vmax.f32 %v906_v26, 0.0 }
 0x21c   : > { %v1086_v31 = vmax.f32 %v908_v28, 0.0 }
 0x21d   : > { %v1087_v35 = vmax.f32 %v910_v29, 0.0 }
 0x21e   : > { %v1166_v36 = vpack.c.bf16 %v1086_v31, %v1084_v30 }
 0x21f   : > { %v1167_v37 = vpack.c.bf16 %v1087_v35, %v1085_v34  ;;  %v913_v38 = vpop.f32.mrb[96].mxu0 }
 0x220   : > { %v914_v39 = vadd.f32 %v913_v38, %v2521_v2  ;;  %v915_v40 = vpop.f32.mrb[97].mxu0 }
 0x221   : > { %v916_v17 = vadd.f32 %v915_v40, %v2523_v3  ;;  %v917_v41 = vpop.f32.mrb[98].mxu0  ;;  %1535 = vmatprep.mubr.bf16.mxu1 %v1167_v37 }
 0x222   : > { %v918_v42 = vadd.f32 %v917_v41, %v2521_v2  ;;  %v919_v33 = vpop.f32.mrb[99].mxu0  ;;  %1536 = vmatmul.mubr.bf16.gmra.mrb[84].mxu1 %v1166_v36  ;;  %v1088_v44 = vmax.f32 %v914_v39, 0.0 }
 0x223   : > { %v920_v43 = vadd.f32 %v919_v33, %v2523_v3  ;;  %v1089_v46 = vmax.f32 %v916_v17, 0.0 }
 0x224   : > { %v1090_v45 = vmax.f32 %v918_v42, 0.0 }
 0x225   : > { %v1091_v47 = vmax.f32 %v920_v43, 0.0 }
 0x226   : > { %v1168_v48 = vpack.c.bf16 %v1090_v45, %v1088_v44 }
 0x227   : > { %v1169_v49 = vpack.c.bf16 %v1091_v47, %v1089_v46  ;;  %v923_v50 = vpop.f32.mrb[100].mxu0 }
 0x228   : > { %v924_v51 = vadd.f32 %v923_v50, %v2521_v2  ;;  %v925_v52 = vpop.f32.mrb[101].mxu0 }
 0x229   : > { %v926_v53 = vadd.f32 %v925_v52, %v2523_v3  ;;  %v927_v54 = vpop.f32.mrb[102].mxu0  ;;  %1543 = vmatprep.mubr.bf16.mxu1 %v1169_v49  ;;  %v2671_v52 = vld [vmem:[%s2866_s4] ss:$0 sm:$0xff] }
 0x22a   : > { %v928_v32 = vadd.f32 %v927_v54, %v2521_v2  ;;  %v929_v55 = vpop.f32.mrb[103].mxu0  ;;  %1544 = vmatmul.mubr.bf16.gmra.mrb[88].mxu1 %v1168_v48  ;;  %v1092_v57 = vmax.f32 %v924_v51, 0.0 }
 0x22b   : > { %v930_v56 = vadd.f32 %v929_v55, %v2523_v3  ;;  %v1093_v59 = vmax.f32 %v926_v53, 0.0 }
 0x22c   : > { %v1094_v58 = vmax.f32 %v928_v32, 0.0 }
 0x22d   : > { %v1095_v60 = vmax.f32 %v930_v56, 0.0 }
 0x22e   : > { %v1170_v61 = vpack.c.bf16 %v1094_v58, %v1092_v57 }
 0x22f   : > { %v1171_v62 = vpack.c.bf16 %v1095_v60, %v1093_v59  ;;  %v933_v63 = vpop.f32.mrb[104].mxu0 }
 0x230   : > { %v934_v1 = vadd.f32 %v933_v63, %v2521_v2  ;;  %v935_v4 = vpop.f32.mrb[105].mxu0 }
 0x231   : > { %v936_v5 = vadd.f32 %v935_v4, %v2523_v3  ;;  %v937_v6 = vpop.f32.mrb[106].mxu0  ;;  %1551 = vmatprep.mubr.bf16.mxu1 %v1171_v62 }
 0x232   : > { %v938_v7 = vadd.f32 %v937_v6, %v2521_v2  ;;  %v939_v8 = vpop.f32.mrb[107].mxu0  ;;  %1552 = vmatmul.mubr.bf16.gmra.mrb[92].mxu1 %v1170_v61  ;;  %v1096_v10 = vmax.f32 %v934_v1, 0.0 }
 0x233   : > { %v940_v9 = vadd.f32 %v939_v8, %v2523_v3  ;;  %v1097_v12 = vmax.f32 %v936_v5, 0.0 }
 0x234   : > { %v1098_v11 = vmax.f32 %v938_v7, 0.0 }
 0x235   : > { %v1099_v13 = vmax.f32 %v940_v9, 0.0 }
 0x236   : > { %v1172_v0 = vpack.c.bf16 %v1098_v11, %v1096_v10 }
 0x237   : > { %v1173_v14 = vpack.c.bf16 %v1099_v13, %v1097_v12  ;;  %v943_v15 = vpop.f32.mrb[108].mxu0 }
 0x238   : > { %v944_v16 = vadd.f32 %v943_v15, %v2521_v2  ;;  %v945_v19 = vpop.f32.mrb[109].mxu0 }
 0x239   : > { %v946_v20 = vadd.f32 %v945_v19, %v2523_v3  ;;  %v947_v21 = vpop.f32.mrb[110].mxu0  ;;  %1559 = vmatprep.mubr.bf16.mxu1 %v1173_v14 }
 0x23a   : > { %v948_v22 = vadd.f32 %v947_v21, %v2521_v2  ;;  %v949_v23 = vpop.f32.mrb[111].mxu0  ;;  %1560 = vmatmul.mubr.bf16.gmra.mrb[96].mxu1 %v1172_v0  ;;  %v1100_v25 = vmax.f32 %v944_v16, 0.0 }
 0x23b   : > { %v950_v24 = vadd.f32 %v949_v23, %v2523_v3  ;;  %v1101_v27 = vmax.f32 %v946_v20, 0.0 }
 0x23c   : > { %v1102_v26 = vmax.f32 %v948_v22, 0.0 }
 0x23d   : > { %v1103_v28 = vmax.f32 %v950_v24, 0.0 }
 0x23e   : > { %v1174_v18 = vpack.c.bf16 %v1102_v26, %v1100_v25 }
 0x23f   : > { %v1175_v29 = vpack.c.bf16 %v1103_v28, %v1101_v27  ;;  %v953_v30 = vpop.f32.mrb[112].mxu0 }
 0x240   : > { %v954_v31 = vadd.f32 %v953_v30, %v2521_v2  ;;  %v955_v34 = vpop.f32.mrb[113].mxu0 }
 0x241   : > { %v956_v35 = vadd.f32 %v955_v34, %v2523_v3  ;;  %v957_v36 = vpop.f32.mrb[114].mxu0  ;;  %1567 = vmatprep.mubr.bf16.mxu1 %v1175_v29 }
 0x242   : > { %v958_v37 = vadd.f32 %v957_v36, %v2521_v2  ;;  %v959_v38 = vpop.f32.mrb[115].mxu0  ;;  %1568 = vmatmul.mubr.bf16.gmra.mrb[100].mxu1 %v1174_v18  ;;  %v1104_v40 = vmax.f32 %v954_v31, 0.0 }
 0x243   : > { %v960_v39 = vadd.f32 %v959_v38, %v2523_v3  ;;  %v1105_v41 = vmax.f32 %v956_v35, 0.0 }
 0x244   : > { %v1106_v17 = vmax.f32 %v958_v37, 0.0 }
 0x245   : > { %v1107_v42 = vmax.f32 %v960_v39, 0.0 }
 0x246   : > { %v1176_v33 = vpack.c.bf16 %v1106_v17, %v1104_v40 }
 0x247   : > { %v1177_v43 = vpack.c.bf16 %v1107_v42, %v1105_v41  ;;  %v963_v44 = vpop.f32.mrb[116].mxu0 }
 0x248   : > { %v964_v45 = vadd.f32 %v963_v44, %v2521_v2  ;;  %v965_v46 = vpop.f32.mrb[117].mxu0 }
 0x249   : > { %v966_v47 = vadd.f32 %v965_v46, %v2523_v3  ;;  %v967_v48 = vpop.f32.mrb[118].mxu0  ;;  %1575 = vmatprep.mubr.bf16.mxu1 %v1177_v43 }
 0x24a   : > { %v968_v49 = vadd.f32 %v967_v48, %v2521_v2  ;;  %v969_v50 = vpop.f32.mrb[119].mxu0  ;;  %1576 = vmatmul.mubr.bf16.gmra.mrb[104].mxu1 %v1176_v33  ;;  %v1108_v53 = vmax.f32 %v964_v45, 0.0 }
 0x24b   : > { %v970_v51 = vadd.f32 %v969_v50, %v2523_v3  ;;  %v1109_v32 = vmax.f32 %v966_v47, 0.0 }
 0x24c   : > { %v1110_v54 = vmax.f32 %v968_v49, 0.0 }
 0x24d   : > { %v1111_v55 = vmax.f32 %v970_v51, 0.0  ;;  %v1369_v56 = vpop.f32.mrb[0].mxu1 }
 0x24e   : > { %v1178_v57 = vpack.c.bf16 %v1110_v54, %v1108_v53  ;;  %v1370_v58 = vadd.f32 %v2671_v52, %v1369_v56  ;;  %v1371_v59 = vpop.f32.mrb[1].mxu1 }
 0x24f   : > { %v1179_v60 = vpack.c.bf16 %v1111_v55, %v1109_v32  ;;  %v973_v61 = vpop.f32.mrb[120].mxu0  ;;  %v1372_v62 = vpop.f32.mrb[2].mxu1 }
 0x250   : > { %1612 = vst [vmem:[%s2674_s28 + $0x20] sm:$0xff] %v1370_v58  ;;  %v974_v63 = vadd.f32 %v973_v61, %v2521_v2  ;;  %v1373_v1 = vadd.f32 %v2671_v52, %v1372_v62  ;;  %v975_v4 = vpop.f32.mrb[121].mxu0  ;;  %v1374_v5 = vpop.f32.mrb[3].mxu1 }
 0x251   : > { %v976_v6 = vadd.f32 %v975_v4, %v2523_v3  ;;  %v977_v7 = vpop.f32.mrb[122].mxu0  ;;  %1583 = vmatprep.mubr.bf16.mxu1 %v1179_v60 }
 0x252   : > { %1613 = vst [vmem:[%s2674_s28 + $0x28] sm:$0xff] %v1373_v1  ;;  %v978_v8 = vadd.f32 %v977_v7, %v2521_v2  ;;  %v979_v9 = vpop.f32.mrb[123].mxu0  ;;  %1584 = vmatmul.mubr.bf16.gmra.mrb[108].mxu1 %v1178_v57  ;;  %v1112_v11 = vmax.f32 %v974_v63, 0.0 }
 0x253   : > { %v980_v10 = vadd.f32 %v979_v9, %v2523_v3  ;;  %v1113_v13 = vmax.f32 %v976_v6, 0.0 }
 0x254   : > { %v1114_v12 = vmax.f32 %v978_v8, 0.0 }
 0x255   : > { %v1115_v0 = vmax.f32 %v980_v10, 0.0  ;;  %v1377_v14 = vpop.f32.mrb[4].mxu1 }
 0x256   : > { %v1180_v15 = vpack.c.bf16 %v1114_v12, %v1112_v11  ;;  %v1378_v16 = vadd.f32 %v2671_v52, %v1377_v14  ;;  %v1379_v19 = vpop.f32.mrb[5].mxu1 }
 0x257   : > { %v1181_v20 = vpack.c.bf16 %v1115_v0, %v1113_v13  ;;  %v983_v21 = vpop.f32.mrb[124].mxu0  ;;  %v1380_v22 = vpop.f32.mrb[6].mxu1 }
 0x258   : > { %1614 = vst [vmem:[%s2674_s28 + $0x30] sm:$0xff] %v1378_v16  ;;  %v984_v23 = vadd.f32 %v983_v21, %v2521_v2  ;;  %v1381_v24 = vadd.f32 %v2671_v52, %v1380_v22  ;;  %v985_v25 = vpop.f32.mrb[125].mxu0  ;;  %v1382_v26 = vpop.f32.mrb[7].mxu1 }
 0x259   : > { %v986_v27 = vadd.f32 %v985_v25, %v2523_v3  ;;  %v987_v28 = vpop.f32.mrb[126].mxu0  ;;  %1591 = vmatprep.mubr.bf16.mxu1 %v1181_v20 }
 0x25a   : > { %1615 = vst [vmem:[%s2674_s28 + $0x38] sm:$0xff] %v1381_v24  ;;  %v988_v18 = vadd.f32 %v987_v28, %v2521_v2  ;;  %v989_v29 = vpop.f32.mrb[127].mxu0  ;;  %1592 = vmatmul.mubr.bf16.gmra.mrb[112].mxu1 %v1180_v15  ;;  %v1116_v31 = vmax.f32 %v984_v23, 0.0 }
 0x25b   : > { %v990_v30 = vadd.f32 %v989_v29, %v2523_v3  ;;  %v1117_v35 = vmax.f32 %v986_v27, 0.0 }
 0x25c   : > { %v1118_v34 = vmax.f32 %v988_v18, 0.0 }
 0x25d   : > { %v1119_v36 = vmax.f32 %v990_v30, 0.0  ;;  %v1385_v37 = vpop.f32.mrb[8].mxu1 }
 0x25e   : > { %v1182_v38 = vpack.c.bf16 %v1118_v34, %v1116_v31  ;;  %v1386_v39 = vadd.f32 %v2671_v52, %v1385_v37  ;;  %v1387_v40 = vpop.f32.mrb[9].mxu1 }
 0x25f   : > { %v1183_v17 = vpack.c.bf16 %v1119_v36, %v1117_v35  ;;  %v1353_v41 = vpop.f32.mrb[128].mxu0  ;;  %v1388_v42 = vpop.f32.mrb[10].mxu1 }
 0x260   : > { %1616 = vst [vmem:[%s2674_s28 + $0x40] sm:$0xff] %v1386_v39  ;;  %v1354_v2 = vadd.f32 %v2671_v52, %v1353_v41  ;;  %v1389_v3 = vadd.f32 %v2671_v52, %v1388_v42  ;;  %v1355_v33 = vpop.f32.mrb[129].mxu0  ;;  %v1390_v43 = vpop.f32.mrb[11].mxu1 }
 0x261   : > { %v1356_v44 = vpop.f32.mrb[130].mxu0  ;;  %1599 = vmatprep.mubr.bf16.mxu1 %v1183_v17 }
 0x262   : > { %1608 = vst [vmem:[%s2674_s28] sm:$0xff] %v1354_v2  ;;  %1617 = vst [vmem:[%s2674_s28 + $0x48] sm:$0xff] %v1389_v3  ;;  %v1357_v45 = vadd.f32 %v2671_v52, %v1356_v44  ;;  %v1358_v46 = vpop.f32.mrb[131].mxu0  ;;  %1600 = vmatmul.mubr.bf16.gmra.mrb[116].mxu1 %v1182_v38 }
 0x264   : > { %1609 = vst [vmem:[%s2674_s28 + $0x8] sm:$0xff] %v1357_v45 }
 0x265   : > { %v1393_v47 = vpop.f32.mrb[12].mxu1 }
 0x266   : > { %v1394_v48 = vadd.f32 %v2671_v52, %v1393_v47  ;;  %v1395_v49 = vpop.f32.mrb[13].mxu1 }
 0x267   : > { %v1361_v50 = vpop.f32.mrb[132].mxu0  ;;  %v1396_v51 = vpop.f32.mrb[14].mxu1 }
 0x268   : > { %1618 = vst [vmem:[%s2674_s28 + $0x50] sm:$0xff] %v1394_v48  ;;  %v1362_v53 = vadd.f32 %v2671_v52, %v1361_v50  ;;  %v1397_v54 = vadd.f32 %v2671_v52, %v1396_v51  ;;  %v1363_v32 = vpop.f32.mrb[133].mxu0  ;;  %v1398_v55 = vpop.f32.mrb[15].mxu1 }
 0x269   : > { %v1364_v56 = vpop.f32.mrb[134].mxu0 }
 0x26a   : > { %1610 = vst [vmem:[%s2674_s28 + $0x10] sm:$0xff] %v1362_v53  ;;  %1619 = vst [vmem:[%s2674_s28 + $0x58] sm:$0xff] %v1397_v54  ;;  %v1365_v57 = vadd.f32 %v2671_v52, %v1364_v56  ;;  %v1366_v58 = vpop.f32.mrb[135].mxu0 }
 0x26c   : > { %1611 = vst [vmem:[%s2674_s28 + $0x18] sm:$0xff] %v1365_v57 }
 0x26d   : > { %v1401_v59 = vpop.f32.mrb[16].mxu1 }
 0x26e   : > { %v1402_v60 = vadd.f32 %v2671_v52, %v1401_v59  ;;  %v1403_v61 = vpop.f32.mrb[17].mxu1 }
 0x26f   : > { %v1404_v62 = vpop.f32.mrb[18].mxu1 }
 0x270   : > { %1620 = vst [vmem:[%s2674_s28 + $0x60] sm:$0xff] %v1402_v60  ;;  %v1405_v63 = vadd.f32 %v2671_v52, %v1404_v62  ;;  %v1406_v1 = vpop.f32.mrb[19].mxu1 }
 0x272   : > { %1621 = vst [vmem:[%s2674_s28 + $0x68] sm:$0xff] %v1405_v63 }
 0x275   : > { %v1409_v4 = vpop.f32.mrb[20].mxu1 }
 0x276   : > { %v1410_v5 = vadd.f32 %v2671_v52, %v1409_v4  ;;  %v1411_v6 = vpop.f32.mrb[21].mxu1 }
 0x277   : > { %v1412_v7 = vpop.f32.mrb[22].mxu1 }
 0x278   : > { %1622 = vst [vmem:[%s2674_s28 + $0x70] sm:$0xff] %v1410_v5  ;;  %v1413_v8 = vadd.f32 %v2671_v52, %v1412_v7  ;;  %v1414_v9 = vpop.f32.mrb[23].mxu1 }
 0x27a   : > { %1623 = vst [vmem:[%s2674_s28 + $0x78] sm:$0xff] %v1413_v8 }
 0x27d   : > { %v1417_v10 = vpop.f32.mrb[24].mxu1 }
 0x27e   : > { %v1418_v11 = vadd.f32 %v2671_v52, %v1417_v10  ;;  %v1419_v12 = vpop.f32.mrb[25].mxu1 }
 0x27f   : > { %v1420_v13 = vpop.f32.mrb[26].mxu1 }
 0x280   : > { %1624 = vst [vmem:[%s2674_s28 + $0x80] sm:$0xff] %v1418_v11  ;;  %v1421_v0 = vadd.f32 %v2671_v52, %v1420_v13  ;;  %v1422_v14 = vpop.f32.mrb[27].mxu1 }
 0x282   : > { %1625 = vst [vmem:[%s2674_s28 + $0x88] sm:$0xff] %v1421_v0 }
 0x285   : > { %v1425_v15 = vpop.f32.mrb[28].mxu1 }
 0x286   : > { %v1426_v16 = vadd.f32 %v2671_v52, %v1425_v15  ;;  %v1427_v19 = vpop.f32.mrb[29].mxu1 }
 0x287   : > { %v1428_v20 = vpop.f32.mrb[30].mxu1 }
 0x288   : > { %1626 = vst [vmem:[%s2674_s28 + $0x90] sm:$0xff] %v1426_v16  ;;  %v1429_v21 = vadd.f32 %v2671_v52, %v1428_v20  ;;  %v1430_v22 = vpop.f32.mrb[31].mxu1 }
 0x28a   : > { %1627 = vst [vmem:[%s2674_s28 + $0x98] sm:$0xff] %v1429_v21 }
 0x28d   : > { %v1433_v23 = vpop.f32.mrb[32].mxu1 }
 0x28e   : > { %v1434_v24 = vadd.f32 %v2671_v52, %v1433_v23  ;;  %v1435_v25 = vpop.f32.mrb[33].mxu1 }
 0x28f   : > { %v1436_v26 = vpop.f32.mrb[34].mxu1 }
 0x290   : > { %1628 = vst [vmem:[%s2674_s28 + $0xa0] sm:$0xff] %v1434_v24  ;;  %v1437_v27 = vadd.f32 %v2671_v52, %v1436_v26  ;;  %v1438_v28 = vpop.f32.mrb[35].mxu1 }
 0x292   : > { %1629 = vst [vmem:[%s2674_s28 + $0xa8] sm:$0xff] %v1437_v27 }
 0x295   : > { %v1441_v18 = vpop.f32.mrb[36].mxu1 }
 0x296   : > { %v1442_v29 = vadd.f32 %v2671_v52, %v1441_v18  ;;  %v1443_v30 = vpop.f32.mrb[37].mxu1 }
 0x297   : > { %v1444_v31 = vpop.f32.mrb[38].mxu1 }
 0x298   : > { %1630 = vst [vmem:[%s2674_s28 + $0xb0] sm:$0xff] %v1442_v29  ;;  %v1445_v34 = vadd.f32 %v2671_v52, %v1444_v31  ;;  %v1446_v35 = vpop.f32.mrb[39].mxu1 }
 0x29a   : > { %1631 = vst [vmem:[%s2674_s28 + $0xb8] sm:$0xff] %v1445_v34 }
 0x29d   : > { %v1449_v36 = vpop.f32.mrb[40].mxu1 }
 0x29e   : > { %v1450_v37 = vadd.f32 %v2671_v52, %v1449_v36  ;;  %v1451_v38 = vpop.f32.mrb[41].mxu1 }
 0x29f   : > { %v1452_v39 = vpop.f32.mrb[42].mxu1 }
 0x2a0   : > { %1632 = vst [vmem:[%s2674_s28 + $0xc0] sm:$0xff] %v1450_v37  ;;  %v1453_v40 = vadd.f32 %v2671_v52, %v1452_v39  ;;  %v1454_v17 = vpop.f32.mrb[43].mxu1 }
 0x2a2   : > { %1633 = vst [vmem:[%s2674_s28 + $0xc8] sm:$0xff] %v1453_v40 }
 0x2a5   : > { %v1457_v41 = vpop.f32.mrb[44].mxu1 }
 0x2a6   : > { %v1458_v42 = vadd.f32 %v2671_v52, %v1457_v41  ;;  %v1459_v2 = vpop.f32.mrb[45].mxu1 }
 0x2a7   : > { %v1460_v3 = vpop.f32.mrb[46].mxu1 }
 0x2a8   : > { %1634 = vst [vmem:[%s2674_s28 + $0xd0] sm:$0xff] %v1458_v42  ;;  %v1461_v33 = vadd.f32 %v2671_v52, %v1460_v3  ;;  %v1462_v43 = vpop.f32.mrb[47].mxu1 }
 0x2aa   : > { %1635 = vst [vmem:[%s2674_s28 + $0xd8] sm:$0xff] %v1461_v33 }
 0x2ad   : > { %v1465_v44 = vpop.f32.mrb[48].mxu1 }
 0x2ae   : > { %v1466_v45 = vadd.f32 %v2671_v52, %v1465_v44  ;;  %v1467_v46 = vpop.f32.mrb[49].mxu1 }
 0x2af   : > { %v1468_v47 = vpop.f32.mrb[50].mxu1 }
 0x2b0   : > { %1636 = vst [vmem:[%s2674_s28 + $0xe0] sm:$0xff] %v1466_v45  ;;  %v1469_v48 = vadd.f32 %v2671_v52, %v1468_v47  ;;  %v1470_v49 = vpop.f32.mrb[51].mxu1 }
 0x2b2   : > { %1637 = vst [vmem:[%s2674_s28 + $0xe8] sm:$0xff] %v1469_v48 }
 0x2b5   : > { %v1473_v50 = vpop.f32.mrb[52].mxu1 }
 0x2b6   : > { %v1474_v51 = vadd.f32 %v2671_v52, %v1473_v50  ;;  %v1475_v53 = vpop.f32.mrb[53].mxu1 }
 0x2b7   : > { %v1476_v54 = vpop.f32.mrb[54].mxu1 }
 0x2b8   : > { %1638 = vst [vmem:[%s2674_s28 + $0xf0] sm:$0xff] %v1474_v51  ;;  %v1477_v32 = vadd.f32 %v2671_v52, %v1476_v54  ;;  %v1478_v55 = vpop.f32.mrb[55].mxu1 }
 0x2ba   : > { %1639 = vst [vmem:[%s2674_s28 + $0xf8] sm:$0xff] %v1477_v32 }
 0x2bd   : > { %v1481_v56 = vpop.f32.mrb[56].mxu1 }
 0x2be   : > { %v1482_v57 = vadd.f32 %v2671_v52, %v1481_v56  ;;  %v1483_v58 = vpop.f32.mrb[57].mxu1 }
 0x2bf   : > { %v1484_v59 = vpop.f32.mrb[58].mxu1 }
 0x2c0   : > { %1640 = vst [vmem:[%s2674_s28 + $0x100] sm:$0xff] %v1482_v57  ;;  %v1485_v60 = vadd.f32 %v2671_v52, %v1484_v59  ;;  %v1486_v61 = vpop.f32.mrb[59].mxu1 }
 0x2c2   : > { %1641 = vst [vmem:[%s2674_s28 + $0x108] sm:$0xff] %v1485_v60 }
 0x2c5   : > { %v1489_v62 = vpop.f32.mrb[60].mxu1 }
 0x2c6   : > { %v1490_v63 = vadd.f32 %v2671_v52, %v1489_v62  ;;  %v1491_v1 = vpop.f32.mrb[61].mxu1 }
 0x2c7   : > { %v1492_v4 = vpop.f32.mrb[62].mxu1 }
 0x2c8   : > { %1642 = vst [vmem:[%s2674_s28 + $0x110] sm:$0xff] %v1490_v63  ;;  %v1493_v5 = vadd.f32 %v2671_v52, %v1492_v4  ;;  %v1494_v6 = vpop.f32.mrb[63].mxu1 }
 0x2ca   : > { %1643 = vst [vmem:[%s2674_s28 + $0x118] sm:$0xff] %v1493_v5 }
 0x2cd   : > { %v1497_v7 = vpop.f32.mrb[64].mxu1 }
 0x2ce   : > { %v1498_v8 = vadd.f32 %v2671_v52, %v1497_v7  ;;  %v1499_v9 = vpop.f32.mrb[65].mxu1 }
 0x2cf   : > { %v1500_v10 = vpop.f32.mrb[66].mxu1 }
 0x2d0   : > { %1644 = vst [vmem:[%s2674_s28 + $0x120] sm:$0xff] %v1498_v8  ;;  %v1501_v11 = vadd.f32 %v2671_v52, %v1500_v10  ;;  %v1502_v12 = vpop.f32.mrb[67].mxu1 }
 0x2d2   : > { %1645 = vst [vmem:[%s2674_s28 + $0x128] sm:$0xff] %v1501_v11 }
 0x2d5   : > { %v1505_v13 = vpop.f32.mrb[68].mxu1 }
 0x2d6   : > { %v1506_v0 = vadd.f32 %v2671_v52, %v1505_v13  ;;  %v1507_v14 = vpop.f32.mrb[69].mxu1 }
 0x2d7   : > { %v1508_v15 = vpop.f32.mrb[70].mxu1 }
 0x2d8   : > { %1646 = vst [vmem:[%s2674_s28 + $0x130] sm:$0xff] %v1506_v0  ;;  %v1509_v16 = vadd.f32 %v2671_v52, %v1508_v15  ;;  %v1510_v19 = vpop.f32.mrb[71].mxu1 }
 0x2da   : > { %1647 = vst [vmem:[%s2674_s28 + $0x138] sm:$0xff] %v1509_v16 }
 0x2dd   : > { %v1513_v20 = vpop.f32.mrb[72].mxu1 }
 0x2de   : > { %v1514_v21 = vadd.f32 %v2671_v52, %v1513_v20  ;;  %v1515_v22 = vpop.f32.mrb[73].mxu1 }
 0x2df   : > { %v1516_v23 = vpop.f32.mrb[74].mxu1 }
 0x2e0   : > { %1648 = vst [vmem:[%s2674_s28 + $0x140] sm:$0xff] %v1514_v21  ;;  %v1517_v24 = vadd.f32 %v2671_v52, %v1516_v23  ;;  %v1518_v25 = vpop.f32.mrb[75].mxu1 }
 0x2e2   : > { %1649 = vst [vmem:[%s2674_s28 + $0x148] sm:$0xff] %v1517_v24 }
 0x2e5   : > { %v1521_v26 = vpop.f32.mrb[76].mxu1 }
 0x2e6   : > { %v1522_v27 = vadd.f32 %v2671_v52, %v1521_v26  ;;  %v1523_v28 = vpop.f32.mrb[77].mxu1 }
 0x2e7   : > { %v1524_v18 = vpop.f32.mrb[78].mxu1 }
 0x2e8   : > { %1650 = vst [vmem:[%s2674_s28 + $0x150] sm:$0xff] %v1522_v27  ;;  %v1525_v29 = vadd.f32 %v2671_v52, %v1524_v18  ;;  %v1526_v30 = vpop.f32.mrb[79].mxu1 }
 0x2ea   : > { %1651 = vst [vmem:[%s2674_s28 + $0x158] sm:$0xff] %v1525_v29 }
 0x2ed   : > { %v1529_v31 = vpop.f32.mrb[80].mxu1 }
 0x2ee   : > { %v1530_v34 = vadd.f32 %v2671_v52, %v1529_v31  ;;  %v1531_v35 = vpop.f32.mrb[81].mxu1 }
 0x2ef   : > { %v1532_v36 = vpop.f32.mrb[82].mxu1 }
 0x2f0   : > { %1652 = vst [vmem:[%s2674_s28 + $0x160] sm:$0xff] %v1530_v34  ;;  %v1533_v37 = vadd.f32 %v2671_v52, %v1532_v36  ;;  %v1534_v38 = vpop.f32.mrb[83].mxu1 }
 0x2f2   : > { %1653 = vst [vmem:[%s2674_s28 + $0x168] sm:$0xff] %v1533_v37 }
 0x2f5   : > { %v1537_v39 = vpop.f32.mrb[84].mxu1 }
 0x2f6   : > { %v1538_v40 = vadd.f32 %v2671_v52, %v1537_v39  ;;  %v1539_v17 = vpop.f32.mrb[85].mxu1 }
 0x2f7   : > { %v1540_v41 = vpop.f32.mrb[86].mxu1 }
 0x2f8   : > { %1654 = vst [vmem:[%s2674_s28 + $0x170] sm:$0xff] %v1538_v40  ;;  %v1541_v42 = vadd.f32 %v2671_v52, %v1540_v41  ;;  %v1542_v2 = vpop.f32.mrb[87].mxu1 }
 0x2fa   : > { %1655 = vst [vmem:[%s2674_s28 + $0x178] sm:$0xff] %v1541_v42 }
 0x2fd   : > { %v1545_v3 = vpop.f32.mrb[88].mxu1 }
 0x2fe   : > { %v1546_v33 = vadd.f32 %v2671_v52, %v1545_v3  ;;  %v1547_v43 = vpop.f32.mrb[89].mxu1 }
 0x2ff   : > { %v1548_v44 = vpop.f32.mrb[90].mxu1 }
 0x300   : > { %1656 = vst [vmem:[%s2674_s28 + $0x180] sm:$0xff] %v1546_v33  ;;  %v1549_v45 = vadd.f32 %v2671_v52, %v1548_v44  ;;  %v1550_v46 = vpop.f32.mrb[91].mxu1 }
 0x302   : > { %1657 = vst [vmem:[%s2674_s28 + $0x188] sm:$0xff] %v1549_v45 }
 0x305   : > { %v1553_v47 = vpop.f32.mrb[92].mxu1 }
 0x306   : > { %v1554_v48 = vadd.f32 %v2671_v52, %v1553_v47  ;;  %v1555_v49 = vpop.f32.mrb[93].mxu1 }
 0x307   : > { %v1556_v50 = vpop.f32.mrb[94].mxu1 }
 0x308   : > { %1658 = vst [vmem:[%s2674_s28 + $0x190] sm:$0xff] %v1554_v48  ;;  %v1557_v51 = vadd.f32 %v2671_v52, %v1556_v50  ;;  %v1558_v53 = vpop.f32.mrb[95].mxu1 }
 0x30a   : > { %1659 = vst [vmem:[%s2674_s28 + $0x198] sm:$0xff] %v1557_v51 }
 0x30d   : > { %v1561_v54 = vpop.f32.mrb[96].mxu1 }
 0x30e   : > { %v1562_v32 = vadd.f32 %v2671_v52, %v1561_v54  ;;  %v1563_v55 = vpop.f32.mrb[97].mxu1 }
 0x30f   : > { %v1564_v56 = vpop.f32.mrb[98].mxu1 }
 0x310   : > { %1660 = vst [vmem:[%s2674_s28 + $0x1a0] sm:$0xff] %v1562_v32  ;;  %v1565_v57 = vadd.f32 %v2671_v52, %v1564_v56  ;;  %v1566_v58 = vpop.f32.mrb[99].mxu1 }
 0x312   : > { %1661 = vst [vmem:[%s2674_s28 + $0x1a8] sm:$0xff] %v1565_v57 }
 0x315   : > { %v1569_v59 = vpop.f32.mrb[100].mxu1 }
 0x316   : > { %v1570_v60 = vadd.f32 %v2671_v52, %v1569_v59  ;;  %v1571_v61 = vpop.f32.mrb[101].mxu1 }
 0x317   : > { %v1572_v62 = vpop.f32.mrb[102].mxu1 }
 0x318   : > { %1662 = vst [vmem:[%s2674_s28 + $0x1b0] sm:$0xff] %v1570_v60  ;;  %v1573_v63 = vadd.f32 %v2671_v52, %v1572_v62  ;;  %v1574_v1 = vpop.f32.mrb[103].mxu1 }
 0x31a   : > { %1663 = vst [vmem:[%s2674_s28 + $0x1b8] sm:$0xff] %v1573_v63 }
 0x31d   : > { %v1577_v4 = vpop.f32.mrb[104].mxu1 }
 0x31e   : > { %v1578_v5 = vadd.f32 %v2671_v52, %v1577_v4  ;;  %v1579_v6 = vpop.f32.mrb[105].mxu1 }
 0x31f   : > { %v1580_v7 = vpop.f32.mrb[106].mxu1 }
 0x320   : > { %1664 = vst [vmem:[%s2674_s28 + $0x1c0] sm:$0xff] %v1578_v5  ;;  %v1581_v8 = vadd.f32 %v2671_v52, %v1580_v7  ;;  %v1582_v9 = vpop.f32.mrb[107].mxu1 }
 0x322   : > { %1665 = vst [vmem:[%s2674_s28 + $0x1c8] sm:$0xff] %v1581_v8 }
 0x325   : > { %v1585_v10 = vpop.f32.mrb[108].mxu1 }
 0x326   : > { %v1586_v11 = vadd.f32 %v2671_v52, %v1585_v10  ;;  %v1587_v12 = vpop.f32.mrb[109].mxu1 }
 0x327   : > { %v1588_v13 = vpop.f32.mrb[110].mxu1 }
 0x328   : > { %1666 = vst [vmem:[%s2674_s28 + $0x1d0] sm:$0xff] %v1586_v11  ;;  %v1589_v0 = vadd.f32 %v2671_v52, %v1588_v13  ;;  %v1590_v14 = vpop.f32.mrb[111].mxu1 }
 0x32a   : > { %1667 = vst [vmem:[%s2674_s28 + $0x1d8] sm:$0xff] %v1589_v0 }
 0x32d   : > { %v1593_v15 = vpop.f32.mrb[112].mxu1 }
 0x32e   : > { %v1594_v16 = vadd.f32 %v2671_v52, %v1593_v15  ;;  %v1595_v19 = vpop.f32.mrb[113].mxu1 }
 0x32f   : > { %v1596_v20 = vpop.f32.mrb[114].mxu1 }
 0x330   : > { %1668 = vst [vmem:[%s2674_s28 + $0x1e0] sm:$0xff] %v1594_v16  ;;  %v1597_v21 = vadd.f32 %v2671_v52, %v1596_v20  ;;  %v1598_v22 = vpop.f32.mrb[115].mxu1 }
 0x332   : > { %1669 = vst [vmem:[%s2674_s28 + $0x1e8] sm:$0xff] %v1597_v21 }
 0x335   : > { %v1601_v23 = vpop.f32.mrb[116].mxu1 }
 0x336   : > { %v1602_v24 = vadd.f32 %v2671_v52, %v1601_v23  ;;  %v1603_v25 = vpop.f32.mrb[117].mxu1 }
 0x337   : > { %v1604_v26 = vpop.f32.mrb[118].mxu1 }
 0x338   : > { %1670 = vst [vmem:[%s2674_s28 + $0x1f0] sm:$0xff] %v1602_v24  ;;  %v1605_v27 = vadd.f32 %v2671_v52, %v1604_v26  ;;  %v1606_v28 = vpop.f32.mrb[119].mxu1 }
 0x33a   : > { %1671 = vst [vmem:[%s2674_s28 + $0x1f8] sm:$0xff] %v1605_v27 }
 0x33b   : > { %2140 = shalt.err (!%p2137_p2)
}
 0x33c   : > { %s2141_s24 = scalar_lea.hbm %s2813_s23, 8192  ;;  %s2145_s13 = scalar_lea.hbm %s2867_s5, 16384 }
 0x33d   : > { %p2142_p13 = scmp.ne.s32.totalorder %s2813_s23, %s2141_s24  ;;  %p2146_p4 = scmp.lt.u32.totalorder %s2813_s23, %s2867_s5 }
 0x33e   : > { %p2147_p7 = scmp.lt.u32.totalorder %s2145_s13, %s2141_s24  ;;  %p2149_p11 = scmp.lt.u32.totalorder %s2141_s24, %s2813_s23 }
 0x33f   : > { %p2143_p6 = pnand %p2142_p13, %p2881_p0 }
 0x340   : > { %p2148_p8 = por %p2147_p7, %p2146_p4 }
 0x341   : > { %p2144_p10 = pneg %p2143_p6 }
 0x342   : > { %p2150_p1 = por %p2149_p11, %p2148_p8 }
 0x344   : > { %p2151_p3 = pnand %p2150_p1, %p2144_p10 }
 0x346   : > { %2154 = shalt.err (!%p2151_p3)
}
 0x347   : > { %s2208_s14 = smov 128   ;;  %s2209_s30 = smov 8  }
 0x348   : > { %1905 = dma.vmem_to_hbm [thread:$0]  (%p2881_p0), %s2815_s15, 8192, %s2813_s23, %s1673_s22, %s2208_s14, %s2208_s14, %s2209_s30  }
 0x349 PF: > { %s1701_s11 = sand.u32 1, %s2185_s18   ;;  %p2882_p5 = scmp.ne.s32.totalorder %s2872_s25, 0 }
 0x34a   : > { %p2883_p9 = scmp.ge.s32.totalorder %s2197_s21, 2  ;;  %s1702_s7 = scalar_lea.sflag [#allocation4], %s1701_s11 }
 0x34c   : > { %p1919_p12 = pnand %p2883_p9, %p2882_p5 }
 0x34e   : > { %2180 = dma.done.wait (!%p1919_p12), %s1702_s7, 8192  }
 0x34f   : > { %2182 = vsyncadd (!%p1919_p12), %s1702_s7, 4294959104  ;;  %p19_p2 = scmp.ge.s32.totalorder %s2353_s16, 4   ;;  %s2884_s18 = smov %s2189_s19 }
 0x350   : > { %s2885_s19 = smov %s2193_s20  ;;  %s2886_s20 = smov %s2362_s27 }
 0x351   : > { %s2887_s21 = smov %s2353_s16  ;;  %21 = sbr.rel (!%p19_p2) target bundleno = 6 (0x6), region = 93 }
 0x358   :  { %1707 = vsyncpa [#allocation3], 1 }
 0x359   :  { %1709 = vsyncpa [#allocation3 + $0x1], 1 }
 0x35a   :  { %1710 = vsyncpa [#allocation6], 1 }
 0x35b   :  { %1711 = vsyncpa [#allocation4], 1 }
 0x35c   :  { %1713 = vsyncpa [#allocation4 + $0x1], 1 }

// kernel: tpu_custom_call.1
= control target key start
LH: loop header
LB: loop body
LE: loop exit
PB: predicated region body
PF: predicated region fallthrough
CT: control target
= control target key end

     0   :  { %10 = vsyncpa [#allocation3], 0  ;;  %s2862_s0 = inlined_call_operand.hbm [shape: bf16[1024,128], index: 0, kind: input, shape index: {}]   ;;  %s2863_s1 = inlined_call_operand.hbm [shape: bf16[128,256], index: 1, kind: input, shape index: {}]   ;;  %s2864_s2 = inlined_call_operand.vmem [shape: f32[1,256], index: 2, kind: input, shape index: {}]   ;;  %s2865_s3 = inlined_call_operand.hbm [shape: bf16[256,128], index: 3, kind: input, shape index: {}]   ;;  %s2866_s4 = inlined_call_operand.vmem [shape: f32[1,128], index: 4, kind: input, shape index: {}]   ;;  %s2867_s5 = inlined_call_operand.hbm [shape: f32[1024,128], index: 5, kind: output, shape index: {}]  }
   0x1   :  { %12 = vsyncpa [#allocation3 + $0x1], 0 }
   0x2   :  { %13 = vsyncpa [#allocation6], 0 }
   0x3   :  { %14 = vsyncpa [#allocation4], 0 }
   0x4   :  { %16 = vsyncpa [#allocation4 + $0x1], 0  ;;  %s2240_s18 = smov 0   ;;  %s2242_s19 = smov 0  }
   0x5   :  { %s2244_s20 = smov 0   ;;  %s2246_s21 = smov 0  }
   0x6 LB: > { %s2261_s22 = sadd.s32 4294967295, %s2197_s21   ;;  %s1778_s23 = sadd.s32 4294967294, %s2197_s21   ;;  %s2197_s21 = sphi %s2246_s21, %s2887_s21   ;;  %s2193_s20 = sphi %s2244_s20, %s2886_s20   ;;  %s2189_s19 = sphi %s2242_s19, %s2885_s19   ;;  %s2185_s18 = sphi %s2240_s18, %s2884_s18  }
   0x7   : > { %p42_p0 = scmp.ne.s32.totalorder %s2189_s19, %s2185_s18  ;;  %p2868_p1 = scmp.eq.s32.totalorder %s2261_s22, 0 }
   0x8   : > { %p156_p3 = scmp.eq.s32.totalorder %s1778_s23, 1  ;;  %p1779_p5 = scmp.ge.s32.totalorder %s2197_s21, 1 }
   0x9   : > { %p2270_p4 = por %p2868_p1, %p42_p0  ;;  %p163_p7 = scmp.lt.s32.totalorder %s2197_s21, 3 }
   0xa   : > { %p2275_p6 = por %p156_p3, %p42_p0  ;;  %s2199_s27 = smov [#allocation5]  }
   0xb   : > { %s2871_s24 = scalar_select %p2270_p4, 1, 0 }
   0xc   : > { %s2872_s25 = scalar_select %p2275_p6, 1, 0 }
   0xd   : > { %p2280_p8 = pnand %p1779_p5, %p163_p7  ;;  %s175_s28 = sshll.u32 %s2199_s27, 4  ;;  %s2284_s28 = int_to_ptr.vmem [resolvable:$true] %s175_s28 }
   0xe   : > { %s2200_s30 = smov [#allocation7]   ;;  %s2041_s9 = scalar_lea.hbm %s2863_s1, 2048 }
   0xf   : > { %p1907_p9 = pneg %p2280_p8  ;;  %s191_s6 = sshll.u32 %s2200_s30, 4  ;;  %s2295_s6 = int_to_ptr.vmem [resolvable:$true] %s191_s6 }
  0x10   : > { %p2042_p12 = scmp.ne.s32.totalorder %s2863_s1, %s2041_s9  ;;  %p2048_p5 = scmp.lt.u32.totalorder %s2041_s9, %s2863_s1 }
  0x11   : > { %p2291_p11 = pnand %p1907_p9, %p2868_p1 }
  0x13   : > { %p2043_p13 = pneg %p2291_p11 }
  0x15   : > { %p2044_p0 = pnand %p2043_p13, %p2042_p12 }
  0x17   : > { %p2045_p3 = pneg %p2044_p0 }
  0x19   : > { %p2050_p7 = pnand %p2048_p5, %p2045_p3 }
  0x1b   : > { %2053 = shalt.err (!%p2050_p7)
}
  0x1c   : > { %s2054_s14 = scalar_lea.vmem %s2284_s28, 2048  ;;  %p2062_p2 = scmp.lt.s32.totalorder %s2284_s28, %s2284_s28 }
  0x1d   : > { %p2055_p9 = scmp.ne.s32.totalorder %s2284_s28, %s2054_s14  ;;  %p2063_p12 = scmp.lt.s32.totalorder %s2054_s14, %s2054_s14 }
  0x1f   : > { %p2057_p10 = pnand %p2055_p9, %p2043_p13  ;;  %p2064_p0 = por %p2063_p12, %p2062_p2 }
  0x21   : > { %p2058_p1 = pneg %p2057_p10 }
  0x23   : > { %p2065_p6 = pnand %p2064_p0, %p2058_p1 }
  0x25   : > { %2068 = shalt.err (!%p2065_p6)
}
  0x26   : > { %s2201_s15 = smov 128   ;;  %s2202_s16 = smov 8  }
  0x27   : > { %1910 = dma.hbm_to_vmem [thread:$0]  (!%p2291_p11), %s2863_s1, 2048, %s2284_s28, [#allocation6], %s2201_s15, %s2201_s15, %s2202_s16  }
  0x28   : > { %s2069_s7 = scalar_lea.hbm %s2865_s3, 2048 }
  0x29   : > { %p2070_p2 = scmp.ne.s32.totalorder %s2865_s3, %s2069_s7  ;;  %p2076_p10 = scmp.lt.u32.totalorder %s2069_s7, %s2865_s3 }
  0x2b   : > { %p2072_p1 = pnand %p2070_p2, %p2043_p13 }
  0x2d   : > { %p2073_p6 = pneg %p2072_p1 }
  0x2f   : > { %p2078_p3 = pnand %p2076_p10, %p2073_p6 }
  0x31   : > { %2081 = shalt.err (!%p2078_p3)
}
  0x32   : > { %s2082_s28 = scalar_lea.vmem %s2295_s6, 2048  ;;  %p2090_p12 = scmp.lt.s32.totalorder %s2295_s6, %s2295_s6 }
  0x33   : > { %p2083_p5 = scmp.ne.s32.totalorder %s2295_s6, %s2082_s28  ;;  %p2091_p0 = scmp.lt.s32.totalorder %s2082_s28, %s2082_s28 }
  0x35   : > { %p2085_p7 = pnand %p2083_p5, %p2043_p13  ;;  %p2092_p2 = por %p2091_p0, %p2090_p12 }
  0x37   : > { %p2086_p9 = pneg %p2085_p7 }
  0x39   : > { %p2093_p1 = pnand %p2092_p2, %p2086_p9 }
  0x3b   : > { %2096 = shalt.err (!%p2093_p1)
}
  0x3c   : > { %s2203_s12 = smov 64   ;;  %s2204_s13 = smov 4  }
  0x3d   : > { %1913 = dma.hbm_to_vmem [thread:$0]  (!%p2291_p11), %s2865_s3, 2048, %s2295_s6, [#allocation6], %s2203_s12, %s2203_s12, %s2204_s13  }
  0x3e   : > { %s2353_s16 = sadd.s32 1, %s2197_s21   ;;  %s29_s23 = sadd.s32 1, %s2193_s20 }
  0x3f   : > { %s26_s17 = ssub.s32 %s2197_s21, %s2353_s16  ;;  %p36_p6 = scmp.ne.s32.totalorder %s2193_s20, %s2189_s19 }
  0x40   : > { %p27_p13 = scmp.eq.s32.totalorder %s26_s17, 0  ;;  %p37_p10 = scmp.eq.s32.totalorder %s2197_s21, 0 }
  0x41   : > { %p2875_p5 = scmp.eq.s32.totalorder %s2261_s22, 1  ;;  %p1924_p9 = scmp.lt.s32.totalorder %s2197_s21, 2 }
  0x42   : > { %s2362_s27 = scalar_select %p27_p13, %s2193_s20, %s29_s23  }
  0x43   : > { %p38_p3 = por %p37_p10, %p36_p6  ;;  %p2366_p7 = por %p2875_p5, %p36_p6 }
  0x44   : > { %s208_s30 = sand.u32 1, %s2193_s20   ;;  %s1861_s6 = sshll.u32 %s2197_s21, 12 }
  0x45   : > { %s2876_s29 = scalar_select %p2366_p7, 1, 0 }
  0x46   : > { %s1783_s7 = sshll.u32 %s208_s30, 8  ;;  %s2376_s10 = scalar_lea.hbm %s2862_s0, %s1861_s6 }
  0x47   : > { %s212_s11 = scalar_lea.vmem [#allocation2], %s1783_s7  ;;  %p2380_p11 = pnand %p1924_p9, %p38_p3 }
  0x48   : > { %s219_s28 = sshll.u32 %s212_s11, 4  ;;  %s2384_s15 = scalar_lea.sflag [#allocation3], %s208_s30  ;;  %s2378_s28 = int_to_ptr.vmem [resolvable:$true] %s219_s28 }
  0x49   : > { %s2097_s17 = scalar_lea.hbm %s2376_s10, 4096  ;;  %p2099_p0 = pneg %p2380_p11 }
  0x4a   : > { %p2098_p12 = scmp.ne.s32.totalorder %s2376_s10, %s2097_s17  ;;  %s2102_s6 = scalar_lea.hbm %s2862_s0, 8192 }
  0x4b   : > { %p2103_p13 = scmp.lt.u32.totalorder %s2376_s10, %s2862_s0  ;;  %p2104_p6 = scmp.lt.u32.totalorder %s2102_s6, %s2097_s17 }
  0x4c   : > { %p2100_p2 = pnand %p2099_p0, %p2098_p12  ;;  %p2106_p3 = scmp.lt.u32.totalorder %s2097_s17, %s2376_s10 }
  0x4d   : > { %p2105_p10 = por %p2104_p6, %p2103_p13 }
  0x4e   : > { %p2101_p1 = pneg %p2100_p2 }
  0x4f   : > { %p2107_p5 = por %p2106_p3, %p2105_p10 }
  0x51   : > { %p2108_p9 = pnand %p2107_p5, %p2101_p1 }
  0x53   : > { %2111 = shalt.err (!%p2108_p9)
}
  0x54   : > { %s2112_s30 = scalar_lea.vmem %s2378_s28, 4096  ;;  %s2205_s11 = smov [#allocation2]  }
  0x55   : > { %p2113_p12 = scmp.ne.s32.totalorder %s2378_s28, %s2112_s30  ;;  %s2117_s23 = sshll.u32 %s2205_s11, 4  ;;  %s2118_s23 = int_to_ptr.vmem [resolvable:$false] %s2117_s23 }
  0x56   : > { %s2119_s7 = scalar_lea.vmem %s2118_s23, 8192  ;;  %p2120_p4 = scmp.lt.s32.totalorder %s2378_s28, %s2118_s23 }
  0x57   : > { %p2115_p2 = pnand %p2113_p12, %p2099_p0  ;;  %p2121_p13 = scmp.lt.s32.totalorder %s2119_s7, %s2112_s30 }
  0x59   : > { %p2116_p7 = pneg %p2115_p2  ;;  %p2122_p6 = por %p2121_p13, %p2120_p4 }
  0x5b   : > { %p2123_p10 = pnand %p2122_p6, %p2116_p7 }
  0x5d   : > { %2126 = shalt.err (!%p2123_p10)
}
  0x5e   : > { %1917 = dma.hbm_to_vmem [thread:$0]  (!%p2380_p11), %s2376_s10, 4096, %s2378_s28, %s2384_s15, %s2203_s12, %s2203_s12, %s2204_s13  }
  0x5f   : > { %231 = sbr.rel (%p2280_p8) target bundleno = 841 (0x349), region = 40  ;;  %s2418_s17 = sand.u32 (!%p2280_p8), 1, %s2189_s19  }
  0x60   : > { %s1787_s6 = sshll.u32 (!%p2280_p8), %s2418_s17, 8  ;;  %s234_s8 = scalar_lea.sflag (!%p2280_p8), [#allocation3], %s2418_s17 }
  0x61   : > { %s2422_s9 = scalar_lea.vmem (!%p2280_p8), [#allocation2], %s1787_s6  ;;  %p2878_p4 = scmp.ne.s32.totalorder (!%p2280_p8), %s2871_s24, 0 }
  0x66   : > { %2172 = dma.done.wait (%p2878_p4), %s234_s8, 4096  }
  0x67   : > { %2174 = vsyncadd (%p2878_p4), %s234_s8, 4294963200  ;;  %p2879_p7 = scmp.eq.s32.totalorder %s2261_s22, 0 }
  0x69   : > { %2176 = dma.done.wait (%p2879_p7), [#allocation6], 4096   ;;  %p2880_p8 = pmov %p2879_p7 }
  0x6a   : > { %v2206_v0 = vmov 0   ;;  %v1969_v1 = vld [vmem:[#allocation5 + $0x4] ss:$8 sps:$4 sm:$0xff]   ;;  %v1971_v2 = vld [vmem:[#allocation5] ss:$8 sps:$4 sm:$0xff]   ;;  %v1995_v19 = vld [vmem:[%s2422_s9 + $0x10] sm:$0xff]   ;;  %v357_v59 = vlaneseq }
  0x6b   : > { %2178 = vsyncadd (%p2880_p8), [#allocation6], 4294963200  ;;  %671 = vmatprep.mubr.bf16.mxu0 %v2206_v0  ;;  %1863 = vmatprep.subr.bf16.mxu1 %v2206_v0  ;;  %v1972_v3 = vld [vmem:[#allocation5 + $0x14] ss:$8 sps:$4 sm:$0xff]   ;;  %v1974_v4 = vld [vmem:[#allocation5 + $0x10] ss:$8 sps:$4 sm:$0xff]  }
  0x6c   : > { %639 = vmatprep.subr.bf16.mxu0 %v1969_v1  ;;  %v1975_v5 = vld [vmem:[#allocation5 + $0x24] ss:$8 sps:$4 sm:$0xff]   ;;  %v1977_v6 = vld [vmem:[#allocation5 + $0x20] ss:$8 sps:$4 sm:$0xff]   ;;  %v1978_v7 = vld [vmem:[#allocation5 + $0x34] ss:$8 sps:$4 sm:$0xff]  }
  0x6d   : > { %640 = vmatpush1.bf16.msra.mxu0 %v1971_v2  ;;  %v1980_v8 = vld [vmem:[#allocation5 + $0x30] ss:$8 sps:$4 sm:$0xff]   ;;  %v1981_v9 = vld [vmem:[#allocation5 + $0x44] ss:$8 sps:$4 sm:$0xff]   ;;  %v1983_v10 = vld [vmem:[#allocation5 + $0x40] ss:$8 sps:$4 sm:$0xff]  }
  0x6e   : > { %641 = vmatprep.subr.bf16.mxu0 %v1972_v3  ;;  %v1984_v11 = vld [vmem:[#allocation5 + $0x54] ss:$8 sps:$4 sm:$0xff]   ;;  %v1986_v12 = vld [vmem:[#allocation5 + $0x50] ss:$8 sps:$4 sm:$0xff]   ;;  %v1987_v13 = vld [vmem:[#allocation5 + $0x64] ss:$8 sps:$4 sm:$0xff]  }
  0x6f   : > { %v1989_v14 = vld [vmem:[#allocation5 + $0x60] ss:$8 sps:$4 sm:$0xff]   ;;  %v1990_v15 = vld [vmem:[#allocation5 + $0x74] ss:$8 sps:$4 sm:$0xff]   ;;  %v1992_v16 = vld [vmem:[#allocation5 + $0x70] ss:$8 sps:$4 sm:$0xff]  }
  0x70   : > { %v1993_v17 = vld [vmem:[%s2422_s9] sm:$0xff]   ;;  %v1994_v18 = vld [vmem:[%s2422_s9 + $0x8] sm:$0xff]   ;;  %v1996_v20 = vld [vmem:[%s2422_s9 + $0x18] sm:$0xff]   ;;  %v358_v60 = vshrl.u32 %v357_v59, 7  ;;  %s1790_s12 = sshll.u32 %s2418_s17, 9  ;;  %s1862_s14 = sshll.u32 %s2261_s22, 13 }
  0x71   : > { %642 = vmatpush1.bf16.msra.mxu0 %v1974_v4  ;;  %v1997_v21 = vld [vmem:[%s2422_s9 + $0x20] sm:$0xff]   ;;  %v1998_v22 = vld [vmem:[%s2422_s9 + $0x28] sm:$0xff]   ;;  %v1999_v24 = vld [vmem:[%s2422_s9 + $0x30] sm:$0xff]   ;;  %s2674_s28 = scalar_lea.vmem [#allocation8], %s1790_s12  ;;  %s2813_s23 = scalar_lea.hbm %s2867_s5, %s1862_s14 }
  0x72   : > { %643 = vmatprep.subr.bf16.mxu0 %v1975_v5  ;;  %v2015_v23 = vld [vmem:[#allocation7] sm:$0xff]   ;;  %v2017_v25 = vld [vmem:[#allocation7 + $0x8] sm:$0xff]   ;;  %v2018_v26 = vld [vmem:[#allocation7 + $0x10] sm:$0xff]   ;;  %v359_v62 = vsub.s32 0, %v358_v60  ;;  %v363_v1 = vsub.s32 1, %v358_v60  ;;  %s1686_s15 = sshll.u32 %s2674_s28, 4  ;;  %s2815_s15 = int_to_ptr.vmem [resolvable:$true] %s1686_s15 }
  0x73   : > { %1879 = vmatpush1.bf16.msra.mxu1 %v2015_v23  ;;  %v2000_v27 = vld [vmem:[%s2422_s9 + $0x38] sm:$0xff]   ;;  %v2021_v29 = vld [vmem:[#allocation7 + $0x20] sm:$0xff]   ;;  %v2023_v31 = vld [vmem:[#allocation7 + $0x28] sm:$0xff]   ;;  %s1673_s22 = scalar_lea.sflag [#allocation4], %s2418_s17  ;;  %s2127_s7 = scalar_lea.vmem %s2815_s15, 8192 }
  0x74   : > { %1864 = vmatprep.subr.bf16.mxu1 %v2206_v0  ;;  %v2020_v28 = vld [vmem:[#allocation7 + $0x18] sm:$0xff]   ;;  %v2001_v30 = vld [vmem:[%s2422_s9 + $0x40] sm:$0xff]   ;;  %v2024_v32 = vld [vmem:[#allocation7 + $0x30] sm:$0xff]   ;;  %p2128_p11 = scmp.ne.s32.totalorder %s2815_s15, %s2127_s7  ;;  %p2881_p0 = scmp.ne.s32.totalorder %s2876_s29, 0 }
  0x75   : > { %644 = vmatpush1.bf16.msra.mxu0 %v1977_v6  ;;  %v2002_v33 = vld [vmem:[%s2422_s9 + $0x48] sm:$0xff]   ;;  %v2026_v34 = vld [vmem:[#allocation7 + $0x38] sm:$0xff]   ;;  %v2027_v35 = vld [vmem:[#allocation7 + $0x40] sm:$0xff]   ;;  %s2207_s6 = smov [#allocation8]  }
  0x76   : > { %645 = vmatprep.subr.bf16.mxu0 %v1978_v7  ;;  %v2003_v36 = vld [vmem:[%s2422_s9 + $0x50] sm:$0xff]   ;;  %v2029_v37 = vld [vmem:[#allocation7 + $0x48] sm:$0xff]   ;;  %v2004_v38 = vld [vmem:[%s2422_s9 + $0x58] sm:$0xff]   ;;  %p2129_p1 = pnand %p2128_p11, %p2881_p0  ;;  %s2131_s8 = sshll.u32 %s2207_s6, 4  ;;  %s2132_s8 = int_to_ptr.vmem [resolvable:$false] %s2131_s8 }
  0x77   : > { %1880 = vmatpush1.bf16.msra.mxu1 %v2017_v25  ;;  %v2030_v39 = vld [vmem:[#allocation7 + $0x50] sm:$0xff]   ;;  %v2032_v40 = vld [vmem:[#allocation7 + $0x58] sm:$0xff]   ;;  %v2005_v41 = vld [vmem:[%s2422_s9 + $0x60] sm:$0xff]   ;;  %p2134_p5 = scmp.lt.s32.totalorder %s2815_s15, %s2132_s8 }
  0x78   : > { %1865 = vmatprep.subr.bf16.mxu1 %v2206_v0  ;;  %v2033_v42 = vld [vmem:[#allocation7 + $0x60] sm:$0xff]   ;;  %v2035_v43 = vld [vmem:[#allocation7 + $0x68] sm:$0xff]   ;;  %v2036_v45 = vld [vmem:[#allocation7 + $0x70] sm:$0xff]   ;;  %p2130_p3 = pneg %p2129_p1 }
  0x79   : > { %646 = vmatpush1.bf16.msra.mxu0 %v1980_v8  ;;  %v2006_v44 = vld [vmem:[%s2422_s9 + $0x68] sm:$0xff]   ;;  %v2038_v46 = vld [vmem:[#allocation7 + $0x78] sm:$0xff]   ;;  %v2007_v47 = vld [vmem:[%s2422_s9 + $0x70] sm:$0xff]  }
  0x7a   : > { %647 = vmatprep.subr.bf16.mxu0 %v1981_v9  ;;  %v2008_v48 = vld [vmem:[%s2422_s9 + $0x78] sm:$0xff]   ;;  %v2009_v49 = vld [vmem:[%s2422_s9 + $0x80] sm:$0xff]   ;;  %v2010_v50 = vld [vmem:[%s2422_s9 + $0x88] sm:$0xff]  }
  0x7b   : > { %1881 = vmatpush1.bf16.msra.mxu1 %v2018_v26  ;;  %v2011_v51 = vld [vmem:[%s2422_s9 + $0x90] sm:$0xff]   ;;  %v2012_v52 = vld [vmem:[%s2422_s9 + $0x98] sm:$0xff]   ;;  %v2013_v53 = vld [vmem:[%s2422_s9 + $0xa0] sm:$0xff]  }
  0x7c   : > { %1866 = vmatprep.subr.bf16.mxu1 %v2206_v0  ;;  %v2014_v54 = vld [vmem:[%s2422_s9 + $0xa8] sm:$0xff]   ;;  %v2016_v55 = vld [vmem:[%s2422_s9 + $0xb0] sm:$0xff]   ;;  %v2019_v56 = vld [vmem:[%s2422_s9 + $0xb8] sm:$0xff]  }
  0x7d   : > { %648 = vmatpush1.bf16.msra.mxu0 %v1983_v10  ;;  %v2022_v57 = vld [vmem:[%s2422_s9 + $0xc0] sm:$0xff]   ;;  %v2025_v58 = vld [vmem:[%s2422_s9 + $0xc8] sm:$0xff]   ;;  %v2028_v61 = vld [vmem:[%s2422_s9 + $0xd0] sm:$0xff]  }
  0x7e   : > { %649 = vmatprep.subr.bf16.mxu0 %v1984_v11  ;;  %v355_v63 = vld [vmem:[%s2864_s2] sm:$0x3]  ;;  %v2031_v7 = vld [vmem:[%s2422_s9 + $0xd8] sm:$0xff]  }
  0x7f   : > { %1882 = vmatpush1.bf16.msra.mxu1 %v2020_v28  ;;  %v2521_v2 = vrot.slane %v355_v63, %v359_v62  ;;  %v2523_v3 = vrot.slane %v355_v63, %v363_v1 }
  0x80   : > { %1867 = vmatprep.subr.bf16.mxu1 %v2206_v0 }
  0x81   : > { %650 = vmatpush1.bf16.msra.mxu0 %v1986_v12 }
  0x82   : > { %651 = vmatprep.subr.bf16.mxu0 %v1987_v13 }
  0x83   : > { %1883 = vmatpush1.bf16.msra.mxu1 %v2021_v29 }
  0x84   : > { %1868 = vmatprep.subr.bf16.mxu1 %v2206_v0 }
  0x85   : > { %652 = vmatpush1.bf16.msra.mxu0 %v1989_v14 }
  0x86   : > { %653 = vmatprep.subr.bf16.mxu0 %v1990_v15 }
  0x87   : > { %1884 = vmatpush1.bf16.msra.mxu1 %v2023_v31 }
  0x88   : > { %1869 = vmatprep.subr.bf16.mxu1 %v2206_v0 }
  0x89   : > { %654 = vmatpush1.bf16.msra.mxu0 %v1992_v16 }
  0x8a   : > { %1319 = vmatprep.subr.bf16.mxu0 %v2206_v0 }
  0x8b   : > { %1885 = vmatpush1.bf16.msra.mxu1 %v2024_v32 }
  0x8c   : > { %672 = vmatmul.mubr.bf16.vlgmr.msra.gmra.mrb[0].mxu0 %v1993_v17  ;;  %1870 = vmatprep.subr.bf16.mxu1 %v2206_v0 }
  0x8d   : > { %681 = vmatprep.mubr.bf16.mxu0 %v2206_v0  ;;  %1320 = vmatpush1.bf16.msra.mxu0 %v2015_v23 }
  0x8e   : > { %1321 = vmatprep.subr.bf16.mxu0 %v2206_v0 }
  0x8f   : > { %1886 = vmatpush1.bf16.msra.mxu1 %v2026_v34 }
  0x90   : > { %1871 = vmatprep.subr.bf16.mxu1 %v2206_v0 }
  0x91   : > { %1322 = vmatpush1.bf16.msra.mxu0 %v2017_v25 }
  0x92   : > { %1323 = vmatprep.subr.bf16.mxu0 %v2206_v0 }
  0x93   : > { %1887 = vmatpush1.bf16.msra.mxu1 %v2027_v35 }
  0x94   : > { %682 = vmatmul.mubr.bf16.gmra.mrb[4].mxu0 %v1994_v18  ;;  %1872 = vmatprep.subr.bf16.mxu1 %v2206_v0 }
  0x95   : > { %691 = vmatprep.mubr.bf16.mxu0 %v2206_v0  ;;  %1324 = vmatpush1.bf16.msra.mxu0 %v2018_v26 }
  0x96   : > { %1325 = vmatprep.subr.bf16.mxu0 %v2206_v0 }
  0x97   : > { %1888 = vmatpush1.bf16.msra.mxu1 %v2029_v37 }
  0x98   : > { %1873 = vmatprep.subr.bf16.mxu1 %v2206_v0 }
  0x99   : > { %1326 = vmatpush1.bf16.msra.mxu0 %v2020_v28 }
  0x9a   : > { %1327 = vmatprep.subr.bf16.mxu0 %v2206_v0 }
  0x9b   : > { %1889 = vmatpush1.bf16.msra.mxu1 %v2030_v39 }
  0x9c   : > { %692 = vmatmul.mubr.bf16.gmra.mrb[8].mxu0 %v1995_v19  ;;  %1874 = vmatprep.subr.bf16.mxu1 %v2206_v0 }
  0x9d   : > { %701 = vmatprep.mubr.bf16.mxu0 %v2206_v0  ;;  %1328 = vmatpush1.bf16.msra.mxu0 %v2021_v29 }
  0x9e   : > { %1329 = vmatprep.subr.bf16.mxu0 %v2206_v0 }
  0x9f   : > { %1890 = vmatpush1.bf16.msra.mxu1 %v2032_v40 }
  0xa0   : > { %1875 = vmatprep.subr.bf16.mxu1 %v2206_v0 }
  0xa1   : > { %1330 = vmatpush1.bf16.msra.mxu0 %v2023_v31 }
  0xa2   : > { %1331 = vmatprep.subr.bf16.mxu0 %v2206_v0 }
  0xa3   : > { %1891 = vmatpush1.bf16.msra.mxu1 %v2033_v42 }
  0xa4   : > { %702 = vmatmul.mubr.bf16.gmra.mrb[12].mxu0 %v1996_v20  ;;  %1876 = vmatprep.subr.bf16.mxu1 %v2206_v0 }
  0xa5   : > { %711 = vmatprep.mubr.bf16.mxu0 %v2206_v0  ;;  %1332 = vmatpush1.bf16.msra.mxu0 %v2024_v32 }
  0xa6   : > { %1333 = vmatprep.subr.bf16.mxu0 %v2206_v0 }
  0xa7   : > { %1892 = vmatpush1.bf16.msra.mxu1 %v2035_v43 }
  0xa8   : > { %1877 = vmatprep.subr.bf16.mxu1 %v2206_v0 }
  0xa9   : > { %1334 = vmatpush1.bf16.msra.mxu0 %v2026_v34 }
  0xaa   : > { %1335 = vmatprep.subr.bf16.mxu0 %v2206_v0 }
  0xab   : > { %1893 = vmatpush1.bf16.msra.mxu1 %v2036_v45 }
  0xac   : > { %712 = vmatmul.mubr.bf16.gmra.mrb[16].mxu0 %v1997_v21  ;;  %1878 = vmatprep.subr.bf16.mxu1 %v2206_v0 }
  0xad   : > { %721 = vmatprep.mubr.bf16.mxu0 %v2206_v0  ;;  %1336 = vmatpush1.bf16.msra.mxu0 %v2027_v35 }
  0xae   : > { %1337 = vmatprep.subr.bf16.mxu0 %v2206_v0 }
  0xaf   : > { %1894 = vmatpush1.bf16.msra.mxu1 %v2038_v46 }
  0xb1   : > { %1338 = vmatpush1.bf16.msra.mxu0 %v2029_v37  ;;  %v2037_v37 = vld [vmem:[%s2422_s9 + $0xe8] sm:$0xff]  }
  0xb2   : > { %1339 = vmatprep.subr.bf16.mxu0 %v2206_v0 }
  0xb4   : > { %722 = vmatmul.mubr.bf16.gmra.mrb[20].mxu0 %v1998_v22  ;;  %v2034_v22 = vld [vmem:[%s2422_s9 + $0xe0] sm:$0xff]  }
  0xb5   : > { %731 = vmatprep.mubr.bf16.mxu0 %v2206_v0  ;;  %1340 = vmatpush1.bf16.msra.mxu0 %v2030_v39 }
  0xb6   : > { %1341 = vmatprep.subr.bf16.mxu0 %v2206_v0 }
  0xb9   : > { %1342 = vmatpush1.bf16.msra.mxu0 %v2032_v40 }
  0xba   : > { %1343 = vmatprep.subr.bf16.mxu0 %v2206_v0 }
  0xbc   : > { %732 = vmatmul.mubr.bf16.gmra.mrb[24].mxu0 %v1999_v24 }
  0xbd   : > { %741 = vmatprep.mubr.bf16.mxu0 %v2206_v0  ;;  %1344 = vmatpush1.bf16.msra.mxu0 %v2033_v42 }
  0xbe   : > { %1345 = vmatprep.subr.bf16.mxu0 %v2206_v0 }
  0xc1   : > { %1346 = vmatpush1.bf16.msra.mxu0 %v2035_v43 }
  0xc2   : > { %1347 = vmatprep.subr.bf16.mxu0 %v2206_v0 }
  0xc4   : > { %742 = vmatmul.mubr.bf16.gmra.mrb[28].mxu0 %v2000_v27 }
  0xc5   : > { %751 = vmatprep.mubr.bf16.mxu0 %v2206_v0  ;;  %1348 = vmatpush1.bf16.msra.mxu0 %v2036_v45 }
  0xc6   : > { %1349 = vmatprep.subr.bf16.mxu0 %v2206_v0 }
  0xc9   : > { %1350 = vmatpush1.bf16.msra.mxu0 %v2038_v46 }
  0xcc   : > { %752 = vmatmul.mubr.bf16.gmra.mrb[32].mxu0 %v2001_v30 }
  0xcd   : > { %761 = vmatprep.mubr.bf16.mxu0 %v2206_v0 }
  0xd4   : > { %762 = vmatmul.mubr.bf16.gmra.mrb[36].mxu0 %v2002_v33 }
  0xd5   : > { %771 = vmatprep.mubr.bf16.mxu0 %v2206_v0 }
  0xdc   : > { %772 = vmatmul.mubr.bf16.gmra.mrb[40].mxu0 %v2003_v36 }
  0xdd   : > { %781 = vmatprep.mubr.bf16.mxu0 %v2206_v0 }
  0xe4   : > { %782 = vmatmul.mubr.bf16.gmra.mrb[44].mxu0 %v2004_v38 }
  0xe5   : > { %791 = vmatprep.mubr.bf16.mxu0 %v2206_v0 }
  0xec   : > { %792 = vmatmul.mubr.bf16.gmra.mrb[48].mxu0 %v2005_v41 }
  0xed   : > { %801 = vmatprep.mubr.bf16.mxu0 %v2206_v0 }
  0xf4   : > { %802 = vmatmul.mubr.bf16.gmra.mrb[52].mxu0 %v2006_v44 }
  0xf5   : > { %811 = vmatprep.mubr.bf16.mxu0 %v2206_v0 }
  0xfc   : > { %812 = vmatmul.mubr.bf16.gmra.mrb[56].mxu0 %v2007_v47 }
  0xfd   : > { %821 = vmatprep.mubr.bf16.mxu0 %v2206_v0 }
 0x104   : > { %822 = vmatmul.mubr.bf16.gmra.mrb[60].mxu0 %v2008_v48 }
 0x105   : > { %831 = vmatprep.mubr.bf16.mxu0 %v2206_v0 }
 0x10c   : > { %832 = vmatmul.mubr.bf16.gmra.mrb[64].mxu0 %v2009_v49 }
 0x10d   : > { %841 = vmatprep.mubr.bf16.mxu0 %v2206_v0 }
 0x114   : > { %842 = vmatmul.mubr.bf16.gmra.mrb[68].mxu0 %v2010_v50 }
 0x115   : > { %851 = vmatprep.mubr.bf16.mxu0 %v2206_v0 }
 0x11c   : > { %852 = vmatmul.mubr.bf16.gmra.mrb[72].mxu0 %v2011_v51 }
 0x11d   : > { %861 = vmatprep.mubr.bf16.mxu0 %v2206_v0 }
 0x124   : > { %862 = vmatmul.mubr.bf16.gmra.mrb[76].mxu0 %v2012_v52  ;;  %v2039_v52 = vld [vmem:[%s2422_s9 + $0xf0] sm:$0xff]  }
 0x125   : > { %871 = vmatprep.mubr.bf16.mxu0 %v2206_v0 }
 0x12c   : > { %872 = vmatmul.mubr.bf16.gmra.mrb[80].mxu0 %v2013_v53 }
 0x12d   : > { %881 = vmatprep.mubr.bf16.mxu0 %v2206_v0 }
 0x134   : > { %882 = vmatmul.mubr.bf16.gmra.mrb[84].mxu0 %v2014_v54 }
 0x135   : > { %891 = vmatprep.mubr.bf16.mxu0 %v2206_v0 }
 0x13c   : > { %892 = vmatmul.mubr.bf16.gmra.mrb[88].mxu0 %v2016_v55 }
 0x13d   : > { %901 = vmatprep.mubr.bf16.mxu0 %v2206_v0 }
 0x144   : > { %902 = vmatmul.mubr.bf16.gmra.mrb[92].mxu0 %v2019_v56 }
 0x145   : > { %911 = vmatprep.mubr.bf16.mxu0 %v2206_v0 }
 0x14c   : > { %912 = vmatmul.mubr.bf16.gmra.mrb[96].mxu0 %v2022_v57 }
 0x14d   : > { %921 = vmatprep.mubr.bf16.mxu0 %v2206_v0 }
 0x154   : > { %922 = vmatmul.mubr.bf16.gmra.mrb[100].mxu0 %v2025_v58 }
 0x155   : > { %931 = vmatprep.mubr.bf16.mxu0 %v2206_v0 }
 0x15c   : > { %932 = vmatmul.mubr.bf16.gmra.mrb[104].mxu0 %v2028_v61 }
 0x15d   : > { %941 = vmatprep.mubr.bf16.mxu0 %v2206_v0 }
 0x15f   : > { %v673_v4 = vpop.f32.mrb[0].mxu0 }
 0x160   : > { %v674_v5 = vadd.f32 %v673_v4, %v2521_v2  ;;  %v675_v6 = vpop.f32.mrb[1].mxu0 }
 0x161   : > { %v676_v8 = vadd.f32 %v675_v6, %v2523_v3  ;;  %v677_v9 = vpop.f32.mrb[2].mxu0  ;;  %v2040_v6 = vld [vmem:[%s2422_s9 + $0xf8] sm:$0xff]   ;;  %s2133_s9 = scalar_lea.vmem %s2132_s8, 16384 }
 0x162   : > { %v678_v10 = vadd.f32 %v677_v9, %v2521_v2  ;;  %v679_v11 = vpop.f32.mrb[3].mxu0  ;;  %v992_v13 = vmax.f32 %v674_v5, 0.0  ;;  %p2135_p9 = scmp.lt.s32.totalorder %s2133_s9, %s2127_s7 }
 0x163   : > { %v680_v12 = vadd.f32 %v679_v11, %v2523_v3  ;;  %v993_v15 = vmax.f32 %v676_v8, 0.0 }
 0x164   : > { %v994_v14 = vmax.f32 %v678_v10, 0.0  ;;  %942 = vmatmul.mubr.bf16.gmra.mrb[108].mxu0 %v2031_v7  ;;  %p2136_p12 = por %p2135_p9, %p2134_p5 }
 0x165   : > { %v995_v16 = vmax.f32 %v680_v12, 0.0  ;;  %951 = vmatprep.mubr.bf16.mxu0 %v2206_v0 }
 0x166   : > { %v2532_v17 = vpack.c.bf16 %v994_v14, %v992_v13  ;;  %p2137_p2 = pnand %p2136_p12, %p2130_p3 }
 0x167   : > { %v2534_v18 = vpack.c.bf16 %v995_v16, %v993_v15  ;;  %v683_v19 = vpop.f32.mrb[4].mxu0 }
 0x168   : > { %v684_v20 = vadd.f32 %v683_v19, %v2521_v2  ;;  %v685_v21 = vpop.f32.mrb[5].mxu0 }
 0x169   : > { %v686_v23 = vadd.f32 %v685_v21, %v2523_v3  ;;  %v687_v24 = vpop.f32.mrb[6].mxu0 }
 0x16a   : > { %v688_v25 = vadd.f32 %v687_v24, %v2521_v2  ;;  %v689_v26 = vpop.f32.mrb[7].mxu0  ;;  %v996_v28 = vmax.f32 %v684_v20, 0.0 }
 0x16b   : > { %v690_v27 = vadd.f32 %v689_v26, %v2523_v3  ;;  %v997_v30 = vmax.f32 %v686_v23, 0.0 }
 0x16c   : > { %v998_v29 = vmax.f32 %v688_v25, 0.0  ;;  %952 = vmatmul.mubr.bf16.gmra.mrb[112].mxu0 %v2034_v22 }
 0x16d   : > { %v999_v31 = vmax.f32 %v690_v27, 0.0  ;;  %961 = vmatprep.mubr.bf16.mxu0 %v2206_v0 }
 0x16e   : > { %v2542_v32 = vpack.c.bf16 %v998_v29, %v996_v28 }
 0x16f   : > { %v2544_v33 = vpack.c.bf16 %v999_v31, %v997_v30  ;;  %v693_v34 = vpop.f32.mrb[8].mxu0 }
 0x170   : > { %v694_v35 = vadd.f32 %v693_v34, %v2521_v2  ;;  %v695_v36 = vpop.f32.mrb[9].mxu0 }
 0x171   : > { %v696_v38 = vadd.f32 %v695_v36, %v2523_v3  ;;  %v697_v39 = vpop.f32.mrb[10].mxu0 }
 0x172   : > { %v698_v40 = vadd.f32 %v697_v39, %v2521_v2  ;;  %v699_v41 = vpop.f32.mrb[11].mxu0  ;;  %v1000_v43 = vmax.f32 %v694_v35, 0.0 }
 0x173   : > { %v700_v42 = vadd.f32 %v699_v41, %v2523_v3  ;;  %v1001_v45 = vmax.f32 %v696_v38, 0.0 }
 0x174   : > { %v1002_v44 = vmax.f32 %v698_v40, 0.0  ;;  %962 = vmatmul.mubr.bf16.gmra.mrb[116].mxu0 %v2037_v37 }
 0x175   : > { %v1003_v46 = vmax.f32 %v700_v42, 0.0  ;;  %971 = vmatprep.mubr.bf16.mxu0 %v2206_v0 }
 0x176   : > { %v1124_v47 = vpack.c.bf16 %v1002_v44, %v1000_v43 }
 0x177   : > { %v703_v48 = vpop.f32.mrb[12].mxu0  ;;  %v1125_v49 = vpack.c.bf16 %v1003_v46, %v1001_v45 }
 0x178   : > { %v704_v50 = vadd.f32 %v703_v48, %v2521_v2  ;;  %v705_v51 = vpop.f32.mrb[13].mxu0 }
 0x179   : > { %v706_v53 = vadd.f32 %v705_v51, %v2523_v3  ;;  %v707_v54 = vpop.f32.mrb[14].mxu0  ;;  %1367 = vmatprep.mubr.bf16.mxu1 %v1125_v49 }
 0x17a   : > { %v708_v55 = vadd.f32 %v707_v54, %v2521_v2  ;;  %v709_v56 = vpop.f32.mrb[15].mxu0  ;;  %1368 = vmatmul.mubr.bf16.vlgmr.msra.gmra.mrb[0].mxu1 %v1124_v47  ;;  %v1004_v58 = vmax.f32 %v704_v50, 0.0 }
 0x17b   : > { %v710_v57 = vadd.f32 %v709_v56, %v2523_v3  ;;  %v1005_v60 = vmax.f32 %v706_v53, 0.0 }
 0x17c   : > { %v1006_v59 = vmax.f32 %v708_v55, 0.0  ;;  %972 = vmatmul.mubr.bf16.gmra.mrb[120].mxu0 %v2039_v52 }
 0x17d   : > { %v1007_v61 = vmax.f32 %v710_v57, 0.0  ;;  %981 = vmatprep.mubr.bf16.mxu0 %v2206_v0 }
 0x17e   : > { %v1126_v62 = vpack.c.bf16 %v1006_v59, %v1004_v58 }
 0x17f   : > { %v1127_v63 = vpack.c.bf16 %v1007_v61, %v1005_v60  ;;  %v713_v1 = vpop.f32.mrb[16].mxu0 }
 0x180   : > { %v714_v4 = vadd.f32 %v713_v1, %v2521_v2  ;;  %v715_v5 = vpop.f32.mrb[17].mxu0 }
 0x181   : > { %v716_v7 = vadd.f32 %v715_v5, %v2523_v3  ;;  %v717_v8 = vpop.f32.mrb[18].mxu0  ;;  %1375 = vmatprep.mubr.bf16.mxu1 %v1127_v63 }
 0x182   : > { %v718_v9 = vadd.f32 %v717_v8, %v2521_v2  ;;  %v719_v10 = vpop.f32.mrb[19].mxu0  ;;  %1376 = vmatmul.mubr.bf16.gmra.mrb[4].mxu1 %v1126_v62  ;;  %v1008_v12 = vmax.f32 %v714_v4, 0.0 }
 0x183   : > { %v720_v11 = vadd.f32 %v719_v10, %v2523_v3  ;;  %v1009_v0 = vmax.f32 %v716_v7, 0.0 }
 0x184   : > { %v1010_v13 = vmax.f32 %v718_v9, 0.0  ;;  %982 = vmatmul.mubr.bf16.gmra.mrb[124].mxu0 %v2040_v6 }
 0x185   : > { %v1011_v14 = vmax.f32 %v720_v11, 0.0  ;;  %1351 = vmatprep.mubr.bf16.mxu0 %v2534_v18 }
 0x186   : > { %v1128_v15 = vpack.c.bf16 %v1010_v13, %v1008_v12 }
 0x187   : > { %v1129_v16 = vpack.c.bf16 %v1011_v14, %v1009_v0  ;;  %v723_v19 = vpop.f32.mrb[20].mxu0 }
 0x188   : > { %v724_v20 = vadd.f32 %v723_v19, %v2521_v2  ;;  %v725_v21 = vpop.f32.mrb[21].mxu0 }
 0x189   : > { %v726_v22 = vadd.f32 %v725_v21, %v2523_v3  ;;  %v727_v23 = vpop.f32.mrb[22].mxu0  ;;  %1383 = vmatprep.mubr.bf16.mxu1 %v1129_v16 }
 0x18a   : > { %v728_v24 = vadd.f32 %v727_v23, %v2521_v2  ;;  %v729_v25 = vpop.f32.mrb[23].mxu0  ;;  %1384 = vmatmul.mubr.bf16.gmra.mrb[8].mxu1 %v1128_v15  ;;  %v1012_v27 = vmax.f32 %v724_v20, 0.0 }
 0x18b   : > { %v730_v26 = vadd.f32 %v729_v25, %v2523_v3  ;;  %v1013_v18 = vmax.f32 %v726_v22, 0.0 }
 0x18c   : > { %v1014_v28 = vmax.f32 %v728_v24, 0.0  ;;  %1352 = vmatmul.mubr.bf16.vlgmr.msra.gmra.mrb[128].mxu0 %v2532_v17 }
 0x18d   : > { %v1015_v29 = vmax.f32 %v730_v26, 0.0  ;;  %1359 = vmatprep.mubr.bf16.mxu0 %v2544_v33 }
 0x18e   : > { %v1130_v30 = vpack.c.bf16 %v1014_v28, %v1012_v27 }
 0x18f   : > { %v1131_v31 = vpack.c.bf16 %v1015_v29, %v1013_v18  ;;  %v733_v34 = vpop.f32.mrb[24].mxu0 }
 0x190   : > { %v734_v35 = vadd.f32 %v733_v34, %v2521_v2  ;;  %v735_v36 = vpop.f32.mrb[25].mxu0 }
 0x191   : > { %v736_v37 = vadd.f32 %v735_v36, %v2523_v3  ;;  %v737_v38 = vpop.f32.mrb[26].mxu0  ;;  %1391 = vmatprep.mubr.bf16.mxu1 %v1131_v31 }
 0x192   : > { %v738_v39 = vadd.f32 %v737_v38, %v2521_v2  ;;  %v739_v40 = vpop.f32.mrb[27].mxu0  ;;  %1392 = vmatmul.mubr.bf16.gmra.mrb[12].mxu1 %v1130_v30  ;;  %v1016_v41 = vmax.f32 %v734_v35, 0.0 }
 0x193   : > { %v740_v17 = vadd.f32 %v739_v40, %v2523_v3  ;;  %v1017_v33 = vmax.f32 %v736_v37, 0.0 }
 0x194   : > { %v1018_v42 = vmax.f32 %v738_v39, 0.0  ;;  %1360 = vmatmul.mubr.bf16.gmra.mrb[132].mxu0 %v2542_v32 }
 0x195   : > { %v1019_v43 = vmax.f32 %v740_v17, 0.0 }
 0x196   : > { %v1132_v44 = vpack.c.bf16 %v1018_v42, %v1016_v41 }
 0x197   : > { %v1133_v45 = vpack.c.bf16 %v1019_v43, %v1017_v33  ;;  %v743_v46 = vpop.f32.mrb[28].mxu0 }
 0x198   : > { %v744_v47 = vadd.f32 %v743_v46, %v2521_v2  ;;  %v745_v48 = vpop.f32.mrb[29].mxu0 }
 0x199   : > { %v746_v49 = vadd.f32 %v745_v48, %v2523_v3  ;;  %v747_v50 = vpop.f32.mrb[30].mxu0  ;;  %1399 = vmatprep.mubr.bf16.mxu1 %v1133_v45 }
 0x19a   : > { %v748_v51 = vadd.f32 %v747_v50, %v2521_v2  ;;  %v749_v52 = vpop.f32.mrb[31].mxu0  ;;  %1400 = vmatmul.mubr.bf16.gmra.mrb[16].mxu1 %v1132_v44  ;;  %v1020_v54 = vmax.f32 %v744_v47, 0.0 }
 0x19b   : > { %v750_v53 = vadd.f32 %v749_v52, %v2523_v3  ;;  %v1021_v55 = vmax.f32 %v746_v49, 0.0 }
 0x19c   : > { %v1022_v32 = vmax.f32 %v748_v51, 0.0 }
 0x19d   : > { %v1023_v56 = vmax.f32 %v750_v53, 0.0 }
 0x19e   : > { %v1134_v57 = vpack.c.bf16 %v1022_v32, %v1020_v54 }
 0x19f   : > { %v1135_v58 = vpack.c.bf16 %v1023_v56, %v1021_v55  ;;  %v753_v59 = vpop.f32.mrb[32].mxu0 }
 0x1a0   : > { %v754_v60 = vadd.f32 %v753_v59, %v2521_v2  ;;  %v755_v61 = vpop.f32.mrb[33].mxu0 }
 0x1a1   : > { %v756_v62 = vadd.f32 %v755_v61, %v2523_v3  ;;  %v757_v63 = vpop.f32.mrb[34].mxu0  ;;  %1407 = vmatprep.mubr.bf16.mxu1 %v1135_v58 }
 0x1a2   : > { %v758_v1 = vadd.f32 %v757_v63, %v2521_v2  ;;  %v759_v4 = vpop.f32.mrb[35].mxu0  ;;  %1408 = vmatmul.mubr.bf16.gmra.mrb[20].mxu1 %v1134_v57  ;;  %v1024_v6 = vmax.f32 %v754_v60, 0.0 }
 0x1a3   : > { %v760_v5 = vadd.f32 %v759_v4, %v2523_v3  ;;  %v1025_v8 = vmax.f32 %v756_v62, 0.0 }
 0x1a4   : > { %v1026_v7 = vmax.f32 %v758_v1, 0.0 }
 0x1a5   : > { %v1027_v9 = vmax.f32 %v760_v5, 0.0 }
 0x1a6   : > { %v1136_v10 = vpack.c.bf16 %v1026_v7, %v1024_v6 }
 0x1a7   : > { %v1137_v11 = vpack.c.bf16 %v1027_v9, %v1025_v8  ;;  %v763_v12 = vpop.f32.mrb[36].mxu0 }
 0x1a8   : > { %v764_v13 = vadd.f32 %v763_v12, %v2521_v2  ;;  %v765_v0 = vpop.f32.mrb[37].mxu0 }
 0x1a9   : > { %v766_v14 = vadd.f32 %v765_v0, %v2523_v3  ;;  %v767_v15 = vpop.f32.mrb[38].mxu0  ;;  %1415 = vmatprep.mubr.bf16.mxu1 %v1137_v11 }
 0x1aa   : > { %v768_v16 = vadd.f32 %v767_v15, %v2521_v2  ;;  %v769_v19 = vpop.f32.mrb[39].mxu0  ;;  %1416 = vmatmul.mubr.bf16.gmra.mrb[24].mxu1 %v1136_v10  ;;  %v1028_v21 = vmax.f32 %v764_v13, 0.0 }
 0x1ab   : > { %v770_v20 = vadd.f32 %v769_v19, %v2523_v3  ;;  %v1029_v23 = vmax.f32 %v766_v14, 0.0 }
 0x1ac   : > { %v1030_v22 = vmax.f32 %v768_v16, 0.0 }
 0x1ad   : > { %v1031_v24 = vmax.f32 %v770_v20, 0.0 }
 0x1ae   : > { %v1138_v25 = vpack.c.bf16 %v1030_v22, %v1028_v21 }
 0x1af   : > { %v1139_v26 = vpack.c.bf16 %v1031_v24, %v1029_v23  ;;  %v773_v27 = vpop.f32.mrb[40].mxu0 }
 0x1b0   : > { %v774_v28 = vadd.f32 %v773_v27, %v2521_v2  ;;  %v775_v18 = vpop.f32.mrb[41].mxu0 }
 0x1b1   : > { %v776_v29 = vadd.f32 %v775_v18, %v2523_v3  ;;  %v777_v30 = vpop.f32.mrb[42].mxu0  ;;  %1423 = vmatprep.mubr.bf16.mxu1 %v1139_v26 }
 0x1b2   : > { %v778_v31 = vadd.f32 %v777_v30, %v2521_v2  ;;  %v779_v34 = vpop.f32.mrb[43].mxu0  ;;  %1424 = vmatmul.mubr.bf16.gmra.mrb[28].mxu1 %v1138_v25  ;;  %v1032_v36 = vmax.f32 %v774_v28, 0.0 }
 0x1b3   : > { %v780_v35 = vadd.f32 %v779_v34, %v2523_v3  ;;  %v1033_v38 = vmax.f32 %v776_v29, 0.0 }
 0x1b4   : > { %v1034_v37 = vmax.f32 %v778_v31, 0.0 }
 0x1b5   : > { %v1035_v39 = vmax.f32 %v780_v35, 0.0 }
 0x1b6   : > { %v1140_v40 = vpack.c.bf16 %v1034_v37, %v1032_v36 }
 0x1b7   : > { %v1141_v17 = vpack.c.bf16 %v1035_v39, %v1033_v38  ;;  %v783_v41 = vpop.f32.mrb[44].mxu0 }
 0x1b8   : > { %v784_v42 = vadd.f32 %v783_v41, %v2521_v2  ;;  %v785_v33 = vpop.f32.mrb[45].mxu0 }
 0x1b9   : > { %v786_v43 = vadd.f32 %v785_v33, %v2523_v3  ;;  %v787_v44 = vpop.f32.mrb[46].mxu0  ;;  %1431 = vmatprep.mubr.bf16.mxu1 %v1141_v17 }
 0x1ba   : > { %v788_v45 = vadd.f32 %v787_v44, %v2521_v2  ;;  %v789_v46 = vpop.f32.mrb[47].mxu0  ;;  %1432 = vmatmul.mubr.bf16.gmra.mrb[32].mxu1 %v1140_v40  ;;  %v1036_v48 = vmax.f32 %v784_v42, 0.0 }
 0x1bb   : > { %v790_v47 = vadd.f32 %v789_v46, %v2523_v3  ;;  %v1037_v50 = vmax.f32 %v786_v43, 0.0 }
 0x1bc   : > { %v1038_v49 = vmax.f32 %v788_v45, 0.0 }
 0x1bd   : > { %v1039_v51 = vmax.f32 %v790_v47, 0.0 }
 0x1be   : > { %v1142_v52 = vpack.c.bf16 %v1038_v49, %v1036_v48 }
 0x1bf   : > { %v1143_v53 = vpack.c.bf16 %v1039_v51, %v1037_v50  ;;  %v793_v54 = vpop.f32.mrb[48].mxu0 }
 0x1c0   : > { %v794_v32 = vadd.f32 %v793_v54, %v2521_v2  ;;  %v795_v55 = vpop.f32.mrb[49].mxu0 }
 0x1c1   : > { %v796_v56 = vadd.f32 %v795_v55, %v2523_v3  ;;  %v797_v57 = vpop.f32.mrb[50].mxu0  ;;  %1439 = vmatprep.mubr.bf16.mxu1 %v1143_v53 }
 0x1c2   : > { %v798_v58 = vadd.f32 %v797_v57, %v2521_v2  ;;  %v799_v59 = vpop.f32.mrb[51].mxu0  ;;  %1440 = vmatmul.mubr.bf16.gmra.mrb[36].mxu1 %v1142_v52  ;;  %v1040_v61 = vmax.f32 %v794_v32, 0.0 }
 0x1c3   : > { %v800_v60 = vadd.f32 %v799_v59, %v2523_v3  ;;  %v1041_v63 = vmax.f32 %v796_v56, 0.0 }
 0x1c4   : > { %v1042_v62 = vmax.f32 %v798_v58, 0.0 }
 0x1c5   : > { %v1043_v1 = vmax.f32 %v800_v60, 0.0 }
 0x1c6   : > { %v1144_v4 = vpack.c.bf16 %v1042_v62, %v1040_v61 }
 0x1c7   : > { %v1145_v5 = vpack.c.bf16 %v1043_v1, %v1041_v63  ;;  %v803_v6 = vpop.f32.mrb[52].mxu0 }
 0x1c8   : > { %v804_v7 = vadd.f32 %v803_v6, %v2521_v2  ;;  %v805_v8 = vpop.f32.mrb[53].mxu0 }
 0x1c9   : > { %v806_v9 = vadd.f32 %v805_v8, %v2523_v3  ;;  %v807_v10 = vpop.f32.mrb[54].mxu0  ;;  %1447 = vmatprep.mubr.bf16.mxu1 %v1145_v5 }
 0x1ca   : > { %v808_v11 = vadd.f32 %v807_v10, %v2521_v2  ;;  %v809_v12 = vpop.f32.mrb[55].mxu0  ;;  %1448 = vmatmul.mubr.bf16.gmra.mrb[40].mxu1 %v1144_v4  ;;  %v1044_v0 = vmax.f32 %v804_v7, 0.0 }
 0x1cb   : > { %v810_v13 = vadd.f32 %v809_v12, %v2523_v3  ;;  %v1045_v15 = vmax.f32 %v806_v9, 0.0 }
 0x1cc   : > { %v1046_v14 = vmax.f32 %v808_v11, 0.0 }
 0x1cd   : > { %v1047_v16 = vmax.f32 %v810_v13, 0.0 }
 0x1ce   : > { %v1146_v19 = vpack.c.bf16 %v1046_v14, %v1044_v0 }
 0x1cf   : > { %v1147_v20 = vpack.c.bf16 %v1047_v16, %v1045_v15  ;;  %v813_v21 = vpop.f32.mrb[56].mxu0 }
 0x1d0   : > { %v814_v22 = vadd.f32 %v813_v21, %v2521_v2  ;;  %v815_v23 = vpop.f32.mrb[57].mxu0 }
 0x1d1   : > { %v816_v24 = vadd.f32 %v815_v23, %v2523_v3  ;;  %v817_v25 = vpop.f32.mrb[58].mxu0  ;;  %1455 = vmatprep.mubr.bf16.mxu1 %v1147_v20 }
 0x1d2   : > { %v818_v26 = vadd.f32 %v817_v25, %v2521_v2  ;;  %v819_v27 = vpop.f32.mrb[59].mxu0  ;;  %1456 = vmatmul.mubr.bf16.gmra.mrb[44].mxu1 %v1146_v19  ;;  %v1048_v18 = vmax.f32 %v814_v22, 0.0 }
 0x1d3   : > { %v820_v28 = vadd.f32 %v819_v27, %v2523_v3  ;;  %v1049_v30 = vmax.f32 %v816_v24, 0.0 }
 0x1d4   : > { %v1050_v29 = vmax.f32 %v818_v26, 0.0 }
 0x1d5   : > { %v1051_v31 = vmax.f32 %v820_v28, 0.0 }
 0x1d6   : > { %v1148_v34 = vpack.c.bf16 %v1050_v29, %v1048_v18 }
 0x1d7   : > { %v1149_v35 = vpack.c.bf16 %v1051_v31, %v1049_v30  ;;  %v823_v36 = vpop.f32.mrb[60].mxu0 }
 0x1d8   : > { %v824_v37 = vadd.f32 %v823_v36, %v2521_v2  ;;  %v825_v38 = vpop.f32.mrb[61].mxu0 }
 0x1d9   : > { %v826_v39 = vadd.f32 %v825_v38, %v2523_v3  ;;  %v827_v40 = vpop.f32.mrb[62].mxu0  ;;  %1463 = vmatprep.mubr.bf16.mxu1 %v1149_v35 }
 0x1da   : > { %v828_v17 = vadd.f32 %v827_v40, %v2521_v2  ;;  %v829_v41 = vpop.f32.mrb[63].mxu0  ;;  %1464 = vmatmul.mubr.bf16.gmra.mrb[48].mxu1 %v1148_v34  ;;  %v1052_v33 = vmax.f32 %v824_v37, 0.0 }
 0x1db   : > { %v830_v42 = vadd.f32 %v829_v41, %v2523_v3  ;;  %v1053_v44 = vmax.f32 %v826_v39, 0.0 }
 0x1dc   : > { %v1054_v43 = vmax.f32 %v828_v17, 0.0 }
 0x1dd   : > { %v1055_v45 = vmax.f32 %v830_v42, 0.0 }
 0x1de   : > { %v1150_v46 = vpack.c.bf16 %v1054_v43, %v1052_v33 }
 0x1df   : > { %v1151_v47 = vpack.c.bf16 %v1055_v45, %v1053_v44  ;;  %v833_v48 = vpop.f32.mrb[64].mxu0 }
 0x1e0   : > { %v834_v49 = vadd.f32 %v833_v48, %v2521_v2  ;;  %v835_v50 = vpop.f32.mrb[65].mxu0 }
 0x1e1   : > { %v836_v51 = vadd.f32 %v835_v50, %v2523_v3  ;;  %v837_v52 = vpop.f32.mrb[66].mxu0  ;;  %1471 = vmatprep.mubr.bf16.mxu1 %v1151_v47 }
 0x1e2   : > { %v838_v53 = vadd.f32 %v837_v52, %v2521_v2  ;;  %v839_v54 = vpop.f32.mrb[67].mxu0  ;;  %1472 = vmatmul.mubr.bf16.gmra.mrb[52].mxu1 %v1150_v46  ;;  %v1056_v55 = vmax.f32 %v834_v49, 0.0 }
 0x1e3   : > { %v840_v32 = vadd.f32 %v839_v54, %v2523_v3  ;;  %v1057_v57 = vmax.f32 %v836_v51, 0.0 }
 0x1e4   : > { %v1058_v56 = vmax.f32 %v838_v53, 0.0 }
 0x1e5   : > { %v1059_v58 = vmax.f32 %v840_v32, 0.0 }
 0x1e6   : > { %v1152_v59 = vpack.c.bf16 %v1058_v56, %v1056_v55 }
 0x1e7   : > { %v1153_v60 = vpack.c.bf16 %v1059_v58, %v1057_v57  ;;  %v843_v61 = vpop.f32.mrb[68].mxu0 }
 0x1e8   : > { %v844_v62 = vadd.f32 %v843_v61, %v2521_v2  ;;  %v845_v63 = vpop.f32.mrb[69].mxu0 }
 0x1e9   : > { %v846_v1 = vadd.f32 %v845_v63, %v2523_v3  ;;  %v847_v4 = vpop.f32.mrb[70].mxu0  ;;  %1479 = vmatprep.mubr.bf16.mxu1 %v1153_v60 }
 0x1ea   : > { %v848_v5 = vadd.f32 %v847_v4, %v2521_v2  ;;  %v849_v6 = vpop.f32.mrb[71].mxu0  ;;  %1480 = vmatmul.mubr.bf16.gmra.mrb[56].mxu1 %v1152_v59  ;;  %v1060_v8 = vmax.f32 %v844_v62, 0.0 }
 0x1eb   : > { %v850_v7 = vadd.f32 %v849_v6, %v2523_v3  ;;  %v1061_v10 = vmax.f32 %v846_v1, 0.0 }
 0x1ec   : > { %v1062_v9 = vmax.f32 %v848_v5, 0.0 }
 0x1ed   : > { %v1063_v11 = vmax.f32 %v850_v7, 0.0 }
 0x1ee   : > { %v1154_v12 = vpack.c.bf16 %v1062_v9, %v1060_v8 }
 0x1ef   : > { %v1155_v13 = vpack.c.bf16 %v1063_v11, %v1061_v10  ;;  %v853_v0 = vpop.f32.mrb[72].mxu0 }
 0x1f0   : > { %v854_v14 = vadd.f32 %v853_v0, %v2521_v2  ;;  %v855_v15 = vpop.f32.mrb[73].mxu0 }
 0x1f1   : > { %v856_v16 = vadd.f32 %v855_v15, %v2523_v3  ;;  %v857_v19 = vpop.f32.mrb[74].mxu0  ;;  %1487 = vmatprep.mubr.bf16.mxu1 %v1155_v13 }
 0x1f2   : > { %v858_v20 = vadd.f32 %v857_v19, %v2521_v2  ;;  %v859_v21 = vpop.f32.mrb[75].mxu0  ;;  %1488 = vmatmul.mubr.bf16.gmra.mrb[60].mxu1 %v1154_v12  ;;  %v1064_v23 = vmax.f32 %v854_v14, 0.0 }
 0x1f3   : > { %v860_v22 = vadd.f32 %v859_v21, %v2523_v3  ;;  %v1065_v25 = vmax.f32 %v856_v16, 0.0 }
 0x1f4   : > { %v1066_v24 = vmax.f32 %v858_v20, 0.0 }
 0x1f5   : > { %v1067_v26 = vmax.f32 %v860_v22, 0.0 }
 0x1f6   : > { %v1156_v27 = vpack.c.bf16 %v1066_v24, %v1064_v23 }
 0x1f7   : > { %v1157_v28 = vpack.c.bf16 %v1067_v26, %v1065_v25  ;;  %v863_v18 = vpop.f32.mrb[76].mxu0 }
 0x1f8   : > { %v864_v29 = vadd.f32 %v863_v18, %v2521_v2  ;;  %v865_v30 = vpop.f32.mrb[77].mxu0 }
 0x1f9   : > { %v866_v31 = vadd.f32 %v865_v30, %v2523_v3  ;;  %v867_v34 = vpop.f32.mrb[78].mxu0  ;;  %1495 = vmatprep.mubr.bf16.mxu1 %v1157_v28 }
 0x1fa   : > { %v868_v35 = vadd.f32 %v867_v34, %v2521_v2  ;;  %v869_v36 = vpop.f32.mrb[79].mxu0  ;;  %1496 = vmatmul.mubr.bf16.gmra.mrb[64].mxu1 %v1156_v27  ;;  %v1068_v38 = vmax.f32 %v864_v29, 0.0 }
 0x1fb   : > { %v870_v37 = vadd.f32 %v869_v36, %v2523_v3  ;;  %v1069_v40 = vmax.f32 %v866_v31, 0.0 }
 0x1fc   : > { %v1070_v39 = vmax.f32 %v868_v35, 0.0 }
 0x1fd   : > { %v1071_v17 = vmax.f32 %v870_v37, 0.0 }
 0x1fe   : > { %v1158_v41 = vpack.c.bf16 %v1070_v39, %v1068_v38 }
 0x1ff   : > { %v1159_v42 = vpack.c.bf16 %v1071_v17, %v1069_v40  ;;  %v873_v33 = vpop.f32.mrb[80].mxu0 }
 0x200   : > { %v874_v43 = vadd.f32 %v873_v33, %v2521_v2  ;;  %v875_v44 = vpop.f32.mrb[81].mxu0 }
 0x201   : > { %v876_v45 = vadd.f32 %v875_v44, %v2523_v3  ;;  %v877_v46 = vpop.f32.mrb[82].mxu0  ;;  %1503 = vmatprep.mubr.bf16.mxu1 %v1159_v42 }
 0x202   : > { %v878_v47 = vadd.f32 %v877_v46, %v2521_v2  ;;  %v879_v48 = vpop.f32.mrb[83].mxu0  ;;  %1504 = vmatmul.mubr.bf16.gmra.mrb[68].mxu1 %v1158_v41  ;;  %v1072_v50 = vmax.f32 %v874_v43, 0.0 }
 0x203   : > { %v880_v49 = vadd.f32 %v879_v48, %v2523_v3  ;;  %v1073_v52 = vmax.f32 %v876_v45, 0.0 }
 0x204   : > { %v1074_v51 = vmax.f32 %v878_v47, 0.0 }
 0x205   : > { %v1075_v53 = vmax.f32 %v880_v49, 0.0 }
 0x206   : > { %v1160_v54 = vpack.c.bf16 %v1074_v51, %v1072_v50 }
 0x207   : > { %v1161_v32 = vpack.c.bf16 %v1075_v53, %v1073_v52  ;;  %v883_v55 = vpop.f32.mrb[84].mxu0 }
 0x208   : > { %v884_v56 = vadd.f32 %v883_v55, %v2521_v2  ;;  %v885_v57 = vpop.f32.mrb[85].mxu0 }
 0x209   : > { %v886_v58 = vadd.f32 %v885_v57, %v2523_v3  ;;  %v887_v59 = vpop.f32.mrb[86].mxu0  ;;  %1511 = vmatprep.mubr.bf16.mxu1 %v1161_v32 }
 0x20a   : > { %v888_v60 = vadd.f32 %v887_v59, %v2521_v2  ;;  %v889_v61 = vpop.f32.mrb[87].mxu0  ;;  %1512 = vmatmul.mubr.bf16.gmra.mrb[72].mxu1 %v1160_v54  ;;  %v1076_v63 = vmax.f32 %v884_v56, 0.0 }
 0x20b   : > { %v890_v62 = vadd.f32 %v889_v61, %v2523_v3  ;;  %v1077_v4 = vmax.f32 %v886_v58, 0.0 }
 0x20c   : > { %v1078_v1 = vmax.f32 %v888_v60, 0.0 }
 0x20d   : > { %v1079_v5 = vmax.f32 %v890_v62, 0.0 }
 0x20e   : > { %v1162_v6 = vpack.c.bf16 %v1078_v1, %v1076_v63 }
 0x20f   : > { %v1163_v7 = vpack.c.bf16 %v1079_v5, %v1077_v4  ;;  %v893_v8 = vpop.f32.mrb[88].mxu0 }
 0x210   : > { %v894_v9 = vadd.f32 %v893_v8, %v2521_v2  ;;  %v895_v10 = vpop.f32.mrb[89].mxu0 }
 0x211   : > { %v896_v11 = vadd.f32 %v895_v10, %v2523_v3  ;;  %v897_v12 = vpop.f32.mrb[90].mxu0  ;;  %1519 = vmatprep.mubr.bf16.mxu1 %v1163_v7 }
 0x212   : > { %v898_v13 = vadd.f32 %v897_v12, %v2521_v2  ;;  %v899_v0 = vpop.f32.mrb[91].mxu0  ;;  %1520 = vmatmul.mubr.bf16.gmra.mrb[76].mxu1 %v1162_v6  ;;  %v1080_v15 = vmax.f32 %v894_v9, 0.0 }
 0x213   : > { %v900_v14 = vadd.f32 %v899_v0, %v2523_v3  ;;  %v1081_v19 = vmax.f32 %v896_v11, 0.0 }
 0x214   : > { %v1082_v16 = vmax.f32 %v898_v13, 0.0 }
 0x215   : > { %v1083_v20 = vmax.f32 %v900_v14, 0.0 }
 0x216   : > { %v1164_v21 = vpack.c.bf16 %v1082_v16, %v1080_v15 }
 0x217   : > { %v1165_v22 = vpack.c.bf16 %v1083_v20, %v1081_v19  ;;  %v903_v23 = vpop.f32.mrb[92].mxu0 }
 0x218   : > { %v904_v24 = vadd.f32 %v903_v23, %v2521_v2  ;;  %v905_v25 = vpop.f32.mrb[93].mxu0 }
 0x219   : > { %v906_v26 = vadd.f32 %v905_v25, %v2523_v3  ;;  %v907_v27 = vpop.f32.mrb[94].mxu0  ;;  %1527 = vmatprep.mubr.bf16.mxu1 %v1165_v22 }
 0x21a   : > { %v908_v28 = vadd.f32 %v907_v27, %v2521_v2  ;;  %v909_v18 = vpop.f32.mrb[95].mxu0  ;;  %1528 = vmatmul.mubr.bf16.gmra.mrb[80].mxu1 %v1164_v21  ;;  %v1084_v30 = vmax.f32 %v904_v24, 0.0 }
 0x21b   : > { %v910_v29 = vadd.f32 %v909_v18, %v2523_v3  ;;  %v1085_v34 = vmax.f32 %v906_v26, 0.0 }
 0x21c   : > { %v1086_v31 = vmax.f32 %v908_v28, 0.0 }
 0x21d   : > { %v1087_v35 = vmax.f32 %v910_v29, 0.0 }
 0x21e   : > { %v1166_v36 = vpack.c.bf16 %v1086_v31, %v1084_v30 }
 0x21f   : > { %v1167_v37 = vpack.c.bf16 %v1087_v35, %v1085_v34  ;;  %v913_v38 = vpop.f32.mrb[96].mxu0 }
 0x220   : > { %v914_v39 = vadd.f32 %v913_v38, %v2521_v2  ;;  %v915_v40 = vpop.f32.mrb[97].mxu0 }
 0x221   : > { %v916_v17 = vadd.f32 %v915_v40, %v2523_v3  ;;  %v917_v41 = vpop.f32.mrb[98].mxu0  ;;  %1535 = vmatprep.mubr.bf16.mxu1 %v1167_v37 }
 0x222   : > { %v918_v42 = vadd.f32 %v917_v41, %v2521_v2  ;;  %v919_v33 = vpop.f32.mrb[99].mxu0  ;;  %1536 = vmatmul.mubr.bf16.gmra.mrb[84].mxu1 %v1166_v36  ;;  %v1088_v44 = vmax.f32 %v914_v39, 0.0 }
 0x223   : > { %v920_v43 = vadd.f32 %v919_v33, %v2523_v3  ;;  %v1089_v46 = vmax.f32 %v916_v17, 0.0 }
 0x224   : > { %v1090_v45 = vmax.f32 %v918_v42, 0.0 }
 0x225   : > { %v1091_v47 = vmax.f32 %v920_v43, 0.0 }
 0x226   : > { %v1168_v48 = vpack.c.bf16 %v1090_v45, %v1088_v44 }
 0x227   : > { %v1169_v49 = vpack.c.bf16 %v1091_v47, %v1089_v46  ;;  %v923_v50 = vpop.f32.mrb[100].mxu0 }
 0x228   : > { %v924_v51 = vadd.f32 %v923_v50, %v2521_v2  ;;  %v925_v52 = vpop.f32.mrb[101].mxu0 }
 0x229   : > { %v926_v53 = vadd.f32 %v925_v52, %v2523_v3  ;;  %v927_v54 = vpop.f32.mrb[102].mxu0  ;;  %1543 = vmatprep.mubr.bf16.mxu1 %v1169_v49  ;;  %v2671_v52 = vld [vmem:[%s2866_s4] ss:$0 sm:$0xff] }
 0x22a   : > { %v928_v32 = vadd.f32 %v927_v54, %v2521_v2  ;;  %v929_v55 = vpop.f32.mrb[103].mxu0  ;;  %1544 = vmatmul.mubr.bf16.gmra.mrb[88].mxu1 %v1168_v48  ;;  %v1092_v57 = vmax.f32 %v924_v51, 0.0 }
 0x22b   : > { %v930_v56 = vadd.f32 %v929_v55, %v2523_v3  ;;  %v1093_v59 = vmax.f32 %v926_v53, 0.0 }
 0x22c   : > { %v1094_v58 = vmax.f32 %v928_v32, 0.0 }
 0x22d   : > { %v1095_v60 = vmax.f32 %v930_v56, 0.0 }
 0x22e   : > { %v1170_v61 = vpack.c.bf16 %v1094_v58, %v1092_v57 }
 0x22f   : > { %v1171_v62 = vpack.c.bf16 %v1095_v60, %v1093_v59  ;;  %v933_v63 = vpop.f32.mrb[104].mxu0 }
 0x230   : > { %v934_v1 = vadd.f32 %v933_v63, %v2521_v2  ;;  %v935_v4 = vpop.f32.mrb[105].mxu0 }
 0x231   : > { %v936_v5 = vadd.f32 %v935_v4, %v2523_v3  ;;  %v937_v6 = vpop.f32.mrb[106].mxu0  ;;  %1551 = vmatprep.mubr.bf16.mxu1 %v1171_v62 }
 0x232   : > { %v938_v7 = vadd.f32 %v937_v6, %v2521_v2  ;;  %v939_v8 = vpop.f32.mrb[107].mxu0  ;;  %1552 = vmatmul.mubr.bf16.gmra.mrb[92].mxu1 %v1170_v61  ;;  %v1096_v10 = vmax.f32 %v934_v1, 0.0 }
 0x233   : > { %v940_v9 = vadd.f32 %v939_v8, %v2523_v3  ;;  %v1097_v12 = vmax.f32 %v936_v5, 0.0 }
 0x234   : > { %v1098_v11 = vmax.f32 %v938_v7, 0.0 }
 0x235   : > { %v1099_v13 = vmax.f32 %v940_v9, 0.0 }
 0x236   : > { %v1172_v0 = vpack.c.bf16 %v1098_v11, %v1096_v10 }
 0x237   : > { %v1173_v14 = vpack.c.bf16 %v1099_v13, %v1097_v12  ;;  %v943_v15 = vpop.f32.mrb[108].mxu0 }
 0x238   : > { %v944_v16 = vadd.f32 %v943_v15, %v2521_v2  ;;  %v945_v19 = vpop.f32.mrb[109].mxu0 }
 0x239   : > { %v946_v20 = vadd.f32 %v945_v19, %v2523_v3  ;;  %v947_v21 = vpop.f32.mrb[110].mxu0  ;;  %1559 = vmatprep.mubr.bf16.mxu1 %v1173_v14 }
 0x23a   : > { %v948_v22 = vadd.f32 %v947_v21, %v2521_v2  ;;  %v949_v23 = vpop.f32.mrb[111].mxu0  ;;  %1560 = vmatmul.mubr.bf16.gmra.mrb[96].mxu1 %v1172_v0  ;;  %v1100_v25 = vmax.f32 %v944_v16, 0.0 }
 0x23b   : > { %v950_v24 = vadd.f32 %v949_v23, %v2523_v3  ;;  %v1101_v27 = vmax.f32 %v946_v20, 0.0 }
 0x23c   : > { %v1102_v26 = vmax.f32 %v948_v22, 0.0 }
 0x23d   : > { %v1103_v28 = vmax.f32 %v950_v24, 0.0 }
 0x23e   : > { %v1174_v18 = vpack.c.bf16 %v1102_v26, %v1100_v25 }
 0x23f   : > { %v1175_v29 = vpack.c.bf16 %v1103_v28, %v1101_v27  ;;  %v953_v30 = vpop.f32.mrb[112].mxu0 }
 0x240   : > { %v954_v31 = vadd.f32 %v953_v30, %v2521_v2  ;;  %v955_v34 = vpop.f32.mrb[113].mxu0 }
 0x241   : > { %v956_v35 = vadd.f32 %v955_v34, %v2523_v3  ;;  %v957_v36 = vpop.f32.mrb[114].mxu0  ;;  %1567 = vmatprep.mubr.bf16.mxu1 %v1175_v29 }
 0x242   : > { %v958_v37 = vadd.f32 %v957_v36, %v2521_v2  ;;  %v959_v38 = vpop.f32.mrb[115].mxu0  ;;  %1568 = vmatmul.mubr.bf16.gmra.mrb[100].mxu1 %v1174_v18  ;;  %v1104_v40 = vmax.f32 %v954_v31, 0.0 }
 0x243   : > { %v960_v39 = vadd.f32 %v959_v38, %v2523_v3  ;;  %v1105_v41 = vmax.f32 %v956_v35, 0.0 }
 0x244   : > { %v1106_v17 = vmax.f32 %v958_v37, 0.0 }
 0x245   : > { %v1107_v42 = vmax.f32 %v960_v39, 0.0 }
 0x246   : > { %v1176_v33 = vpack.c.bf16 %v1106_v17, %v1104_v40 }
 0x247   : > { %v1177_v43 = vpack.c.bf16 %v1107_v42, %v1105_v41  ;;  %v963_v44 = vpop.f32.mrb[116].mxu0 }
 0x248   : > { %v964_v45 = vadd.f32 %v963_v44, %v2521_v2  ;;  %v965_v46 = vpop.f32.mrb[117].mxu0 }
 0x249   : > { %v966_v47 = vadd.f32 %v965_v46, %v2523_v3  ;;  %v967_v48 = vpop.f32.mrb[118].mxu0  ;;  %1575 = vmatprep.mubr.bf16.mxu1 %v1177_v43 }
 0x24a   : > { %v968_v49 = vadd.f32 %v967_v48, %v2521_v2  ;;  %v969_v50 = vpop.f32.mrb[119].mxu0  ;;  %1576 = vmatmul.mubr.bf16.gmra.mrb[104].mxu1 %v1176_v33  ;;  %v1108_v53 = vmax.f32 %v964_v45, 0.0 }
 0x24b   : > { %v970_v51 = vadd.f32 %v969_v50, %v2523_v3  ;;  %v1109_v32 = vmax.f32 %v966_v47, 0.0 }
 0x24c   : > { %v1110_v54 = vmax.f32 %v968_v49, 0.0 }
 0x24d   : > { %v1111_v55 = vmax.f32 %v970_v51, 0.0  ;;  %v1369_v56 = vpop.f32.mrb[0].mxu1 }
 0x24e   : > { %v1178_v57 = vpack.c.bf16 %v1110_v54, %v1108_v53  ;;  %v1370_v58 = vadd.f32 %v2671_v52, %v1369_v56  ;;  %v1371_v59 = vpop.f32.mrb[1].mxu1 }
 0x24f   : > { %v1179_v60 = vpack.c.bf16 %v1111_v55, %v1109_v32  ;;  %v973_v61 = vpop.f32.mrb[120].mxu0  ;;  %v1372_v62 = vpop.f32.mrb[2].mxu1 }
 0x250   : > { %1612 = vst [vmem:[%s2674_s28 + $0x20] sm:$0xff] %v1370_v58  ;;  %v974_v63 = vadd.f32 %v973_v61, %v2521_v2  ;;  %v1373_v1 = vadd.f32 %v2671_v52, %v1372_v62  ;;  %v975_v4 = vpop.f32.mrb[121].mxu0  ;;  %v1374_v5 = vpop.f32.mrb[3].mxu1 }
 0x251   : > { %v976_v6 = vadd.f32 %v975_v4, %v2523_v3  ;;  %v977_v7 = vpop.f32.mrb[122].mxu0  ;;  %1583 = vmatprep.mubr.bf16.mxu1 %v1179_v60 }
 0x252   : > { %1613 = vst [vmem:[%s2674_s28 + $0x28] sm:$0xff] %v1373_v1  ;;  %v978_v8 = vadd.f32 %v977_v7, %v2521_v2  ;;  %v979_v9 = vpop.f32.mrb[123].mxu0  ;;  %1584 = vmatmul.mubr.bf16.gmra.mrb[108].mxu1 %v1178_v57  ;;  %v1112_v11 = vmax.f32 %v974_v63, 0.0 }
 0x253   : > { %v980_v10 = vadd.f32 %v979_v9, %v2523_v3  ;;  %v1113_v13 = vmax.f32 %v976_v6, 0.0 }
 0x254   : > { %v1114_v12 = vmax.f32 %v978_v8, 0.0 }
 0x255   : > { %v1115_v0 = vmax.f32 %v980_v10, 0.0  ;;  %v1377_v14 = vpop.f32.mrb[4].mxu1 }
 0x256   : > { %v1180_v15 = vpack.c.bf16 %v1114_v12, %v1112_v11  ;;  %v1378_v16 = vadd.f32 %v2671_v52, %v1377_v14  ;;  %v1379_v19 = vpop.f32.mrb[5].mxu1 }
 0x257   : > { %v1181_v20 = vpack.c.bf16 %v1115_v0, %v1113_v13  ;;  %v983_v21 = vpop.f32.mrb[124].mxu0  ;;  %v1380_v22 = vpop.f32.mrb[6].mxu1 }
 0x258   : > { %1614 = vst [vmem:[%s2674_s28 + $0x30] sm:$0xff] %v1378_v16  ;;  %v984_v23 = vadd.f32 %v983_v21, %v2521_v2  ;;  %v1381_v24 = vadd.f32 %v2671_v52, %v1380_v22  ;;  %v985_v25 = vpop.f32.mrb[125].mxu0  ;;  %v1382_v26 = vpop.f32.mrb[7].mxu1 }
 0x259   : > { %v986_v27 = vadd.f32 %v985_v25, %v2523_v3  ;;  %v987_v28 = vpop.f32.mrb[126].mxu0  ;;  %1591 = vmatprep.mubr.bf16.mxu1 %v1181_v20 }
 0x25a   : > { %1615 = vst [vmem:[%s2674_s28 + $0x38] sm:$0xff] %v1381_v24  ;;  %v988_v18 = vadd.f32 %v987_v28, %v2521_v2  ;;  %v989_v29 = vpop.f32.mrb[127].mxu0  ;;  %1592 = vmatmul.mubr.bf16.gmra.mrb[112].mxu1 %v1180_v15  ;;  %v1116_v31 = vmax.f32 %v984_v23, 0.0 }
 0x25b   : > { %v990_v30 = vadd.f32 %v989_v29, %v2523_v3  ;;  %v1117_v35 = vmax.f32 %v986_v27, 0.0 }
 0x25c   : > { %v1118_v34 = vmax.f32 %v988_v18, 0.0 }
 0x25d   : > { %v1119_v36 = vmax.f32 %v990_v30, 0.0  ;;  %v1385_v37 = vpop.f32.mrb[8].mxu1 }
 0x25e   : > { %v1182_v38 = vpack.c.bf16 %v1118_v34, %v1116_v31  ;;  %v1386_v39 = vadd.f32 %v2671_v52, %v1385_v37  ;;  %v1387_v40 = vpop.f32.mrb[9].mxu1 }
 0x25f   : > { %v1183_v17 = vpack.c.bf16 %v1119_v36, %v1117_v35  ;;  %v1353_v41 = vpop.f32.mrb[128].mxu0  ;;  %v1388_v42 = vpop.f32.mrb[10].mxu1 }
 0x260   : > { %1616 = vst [vmem:[%s2674_s28 + $0x40] sm:$0xff] %v1386_v39  ;;  %v1354_v2 = vadd.f32 %v2671_v52, %v1353_v41  ;;  %v1389_v3 = vadd.f32 %v2671_v52, %v1388_v42  ;;  %v1355_v33 = vpop.f32.mrb[129].mxu0  ;;  %v1390_v43 = vpop.f32.mrb[11].mxu1 }
 0x261   : > { %v1356_v44 = vpop.f32.mrb[130].mxu0  ;;  %1599 = vmatprep.mubr.bf16.mxu1 %v1183_v17 }
 0x262   : > { %1608 = vst [vmem:[%s2674_s28] sm:$0xff] %v1354_v2  ;;  %1617 = vst [vmem:[%s2674_s28 + $0x48] sm:$0xff] %v1389_v3  ;;  %v1357_v45 = vadd.f32 %v2671_v52, %v1356_v44  ;;  %v1358_v46 = vpop.f32.mrb[131].mxu0  ;;  %1600 = vmatmul.mubr.bf16.gmra.mrb[116].mxu1 %v1182_v38 }
 0x264   : > { %1609 = vst [vmem:[%s2674_s28 + $0x8] sm:$0xff] %v1357_v45 }
 0x265   : > { %v1393_v47 = vpop.f32.mrb[12].mxu1 }
 0x266   : > { %v1394_v48 = vadd.f32 %v2671_v52, %v1393_v47  ;;  %v1395_v49 = vpop.f32.mrb[13].mxu1 }
 0x267   : > { %v1361_v50 = vpop.f32.mrb[132].mxu0  ;;  %v1396_v51 = vpop.f32.mrb[14].mxu1 }
 0x268   : > { %1618 = vst [vmem:[%s2674_s28 + $0x50] sm:$0xff] %v1394_v48  ;;  %v1362_v53 = vadd.f32 %v2671_v52, %v1361_v50  ;;  %v1397_v54 = vadd.f32 %v2671_v52, %v1396_v51  ;;  %v1363_v32 = vpop.f32.mrb[133].mxu0  ;;  %v1398_v55 = vpop.f32.mrb[15].mxu1 }
 0x269   : > { %v1364_v56 = vpop.f32.mrb[134].mxu0 }
 0x26a   : > { %1610 = vst [vmem:[%s2674_s28 + $0x10] sm:$0xff] %v1362_v53  ;;  %1619 = vst [vmem:[%s2674_s28 + $0x58] sm:$0xff] %v1397_v54  ;;  %v1365_v57 = vadd.f32 %v2671_v52, %v1364_v56  ;;  %v1366_v58 = vpop.f32.mrb[135].mxu0 }
 0x26c   : > { %1611 = vst [vmem:[%s2674_s28 + $0x18] sm:$0xff] %v1365_v57 }
 0x26d   : > { %v1401_v59 = vpop.f32.mrb[16].mxu1 }
 0x26e   : > { %v1402_v60 = vadd.f32 %v2671_v52, %v1401_v59  ;;  %v1403_v61 = vpop.f32.mrb[17].mxu1 }
 0x26f   : > { %v1404_v62 = vpop.f32.mrb[18].mxu1 }
 0x270   : > { %1620 = vst [vmem:[%s2674_s28 + $0x60] sm:$0xff] %v1402_v60  ;;  %v1405_v63 = vadd.f32 %v2671_v52, %v1404_v62  ;;  %v1406_v1 = vpop.f32.mrb[19].mxu1 }
 0x272   : > { %1621 = vst [vmem:[%s2674_s28 + $0x68] sm:$0xff] %v1405_v63 }
 0x275   : > { %v1409_v4 = vpop.f32.mrb[20].mxu1 }
 0x276   : > { %v1410_v5 = vadd.f32 %v2671_v52, %v1409_v4  ;;  %v1411_v6 = vpop.f32.mrb[21].mxu1 }
 0x277   : > { %v1412_v7 = vpop.f32.mrb[22].mxu1 }
 0x278   : > { %1622 = vst [vmem:[%s2674_s28 + $0x70] sm:$0xff] %v1410_v5  ;;  %v1413_v8 = vadd.f32 %v2671_v52, %v1412_v7  ;;  %v1414_v9 = vpop.f32.mrb[23].mxu1 }
 0x27a   : > { %1623 = vst [vmem:[%s2674_s28 + $0x78] sm:$0xff] %v1413_v8 }
 0x27d   : > { %v1417_v10 = vpop.f32.mrb[24].mxu1 }
 0x27e   : > { %v1418_v11 = vadd.f32 %v2671_v52, %v1417_v10  ;;  %v1419_v12 = vpop.f32.mrb[25].mxu1 }
 0x27f   : > { %v1420_v13 = vpop.f32.mrb[26].mxu1 }
 0x280   : > { %1624 = vst [vmem:[%s2674_s28 + $0x80] sm:$0xff] %v1418_v11  ;;  %v1421_v0 = vadd.f32 %v2671_v52, %v1420_v13  ;;  %v1422_v14 = vpop.f32.mrb[27].mxu1 }
 0x282   : > { %1625 = vst [vmem:[%s2674_s28 + $0x88] sm:$0xff] %v1421_v0 }
 0x285   : > { %v1425_v15 = vpop.f32.mrb[28].mxu1 }
 0x286   : > { %v1426_v16 = vadd.f32 %v2671_v52, %v1425_v15  ;;  %v1427_v19 = vpop.f32.mrb[29].mxu1 }
 0x287   : > { %v1428_v20 = vpop.f32.mrb[30].mxu1 }
 0x288   : > { %1626 = vst [vmem:[%s2674_s28 + $0x90] sm:$0xff] %v1426_v16  ;;  %v1429_v21 = vadd.f32 %v2671_v52, %v1428_v20  ;;  %v1430_v22 = vpop.f32.mrb[31].mxu1 }
 0x28a   : > { %1627 = vst [vmem:[%s2674_s28 + $0x98] sm:$0xff] %v1429_v21 }
 0x28d   : > { %v1433_v23 = vpop.f32.mrb[32].mxu1 }
 0x28e   : > { %v1434_v24 = vadd.f32 %v2671_v52, %v1433_v23  ;;  %v1435_v25 = vpop.f32.mrb[33].mxu1 }
 0x28f   : > { %v1436_v26 = vpop.f32.mrb[34].mxu1 }
 0x290   : > { %1628 = vst [vmem:[%s2674_s28 + $0xa0] sm:$0xff] %v1434_v24  ;;  %v1437_v27 = vadd.f32 %v2671_v52, %v1436_v26  ;;  %v1438_v28 = vpop.f32.mrb[35].mxu1 }
 0x292   : > { %1629 = vst [vmem:[%s2674_s28 + $0xa8] sm:$0xff] %v1437_v27 }
 0x295   : > { %v1441_v18 = vpop.f32.mrb[36].mxu1 }
 0x296   : > { %v1442_v29 = vadd.f32 %v2671_v52, %v1441_v18  ;;  %v1443_v30 = vpop.f32.mrb[37].mxu1 }
 0x297   : > { %v1444_v31 = vpop.f32.mrb[38].mxu1 }
 0x298   : > { %1630 = vst [vmem:[%s2674_s28 + $0xb0] sm:$0xff] %v1442_v29  ;;  %v1445_v34 = vadd.f32 %v2671_v52, %v1444_v31  ;;  %v1446_v35 = vpop.f32.mrb[39].mxu1 }
 0x29a   : > { %1631 = vst [vmem:[%s2674_s28 + $0xb8] sm:$0xff] %v1445_v34 }
 0x29d   : > { %v1449_v36 = vpop.f32.mrb[40].mxu1 }
 0x29e   : > { %v1450_v37 = vadd.f32 %v2671_v52, %v1449_v36  ;;  %v1451_v38 = vpop.f32.mrb[41].mxu1 }
 0x29f   : > { %v1452_v39 = vpop.f32.mrb[42].mxu1 }
 0x2a0   : > { %1632 = vst [vmem:[%s2674_s28 + $0xc0] sm:$0xff] %v1450_v37  ;;  %v1453_v40 = vadd.f32 %v2671_v52, %v1452_v39  ;;  %v1454_v17 = vpop.f32.mrb[43].mxu1 }
 0x2a2   : > { %1633 = vst [vmem:[%s2674_s28 + $0xc8] sm:$0xff] %v1453_v40 }
 0x2a5   : > { %v1457_v41 = vpop.f32.mrb[44].mxu1 }
 0x2a6   : > { %v1458_v42 = vadd.f32 %v2671_v52, %v1457_v41  ;;  %v1459_v2 = vpop.f32.mrb[45].mxu1 }
 0x2a7   : > { %v1460_v3 = vpop.f32.mrb[46].mxu1 }
 0x2a8   : > { %1634 = vst [vmem:[%s2674_s28 + $0xd0] sm:$0xff] %v1458_v42  ;;  %v1461_v33 = vadd.f32 %v2671_v52, %v1460_v3  ;;  %v1462_v43 = vpop.f32.mrb[47].mxu1 }
 0x2aa   : > { %1635 = vst [vmem:[%s2674_s28 + $0xd8] sm:$0xff] %v1461_v33 }
 0x2ad   : > { %v1465_v44 = vpop.f32.mrb[48].mxu1 }
 0x2ae   : > { %v1466_v45 = vadd.f32 %v2671_v52, %v1465_v44  ;;  %v1467_v46 = vpop.f32.mrb[49].mxu1 }
 0x2af   : > { %v1468_v47 = vpop.f32.mrb[50].mxu1 }
 0x2b0   : > { %1636 = vst [vmem:[%s2674_s28 + $0xe0] sm:$0xff] %v1466_v45  ;;  %v1469_v48 = vadd.f32 %v2671_v52, %v1468_v47  ;;  %v1470_v49 = vpop.f32.mrb[51].mxu1 }
 0x2b2   : > { %1637 = vst [vmem:[%s2674_s28 + $0xe8] sm:$0xff] %v1469_v48 }
 0x2b5   : > { %v1473_v50 = vpop.f32.mrb[52].mxu1 }
 0x2b6   : > { %v1474_v51 = vadd.f32 %v2671_v52, %v1473_v50  ;;  %v1475_v53 = vpop.f32.mrb[53].mxu1 }
 0x2b7   : > { %v1476_v54 = vpop.f32.mrb[54].mxu1 }
 0x2b8   : > { %1638 = vst [vmem:[%s2674_s28 + $0xf0] sm:$0xff] %v1474_v51  ;;  %v1477_v32 = vadd.f32 %v2671_v52, %v1476_v54  ;;  %v1478_v55 = vpop.f32.mrb[55].mxu1 }
 0x2ba   : > { %1639 = vst [vmem:[%s2674_s28 + $0xf8] sm:$0xff] %v1477_v32 }
 0x2bd   : > { %v1481_v56 = vpop.f32.mrb[56].mxu1 }
 0x2be   : > { %v1482_v57 = vadd.f32 %v2671_v52, %v1481_v56  ;;  %v1483_v58 = vpop.f32.mrb[57].mxu1 }
 0x2bf   : > { %v1484_v59 = vpop.f32.mrb[58].mxu1 }
 0x2c0   : > { %1640 = vst [vmem:[%s2674_s28 + $0x100] sm:$0xff] %v1482_v57  ;;  %v1485_v60 = vadd.f32 %v2671_v52, %v1484_v59  ;;  %v1486_v61 = vpop.f32.mrb[59].mxu1 }
 0x2c2   : > { %1641 = vst [vmem:[%s2674_s28 + $0x108] sm:$0xff] %v1485_v60 }
 0x2c5   : > { %v1489_v62 = vpop.f32.mrb[60].mxu1 }
 0x2c6   : > { %v1490_v63 = vadd.f32 %v2671_v52, %v1489_v62  ;;  %v1491_v1 = vpop.f32.mrb[61].mxu1 }
 0x2c7   : > { %v1492_v4 = vpop.f32.mrb[62].mxu1 }
 0x2c8   : > { %1642 = vst [vmem:[%s2674_s28 + $0x110] sm:$0xff] %v1490_v63  ;;  %v1493_v5 = vadd.f32 %v2671_v52, %v1492_v4  ;;  %v1494_v6 = vpop.f32.mrb[63].mxu1 }
 0x2ca   : > { %1643 = vst [vmem:[%s2674_s28 + $0x118] sm:$0xff] %v1493_v5 }
 0x2cd   : > { %v1497_v7 = vpop.f32.mrb[64].mxu1 }
 0x2ce   : > { %v1498_v8 = vadd.f32 %v2671_v52, %v1497_v7  ;;  %v1499_v9 = vpop.f32.mrb[65].mxu1 }
 0x2cf   : > { %v1500_v10 = vpop.f32.mrb[66].mxu1 }
 0x2d0   : > { %1644 = vst [vmem:[%s2674_s28 + $0x120] sm:$0xff] %v1498_v8  ;;  %v1501_v11 = vadd.f32 %v2671_v52, %v1500_v10  ;;  %v1502_v12 = vpop.f32.mrb[67].mxu1 }
 0x2d2   : > { %1645 = vst [vmem:[%s2674_s28 + $0x128] sm:$0xff] %v1501_v11 }
 0x2d5   : > { %v1505_v13 = vpop.f32.mrb[68].mxu1 }
 0x2d6   : > { %v1506_v0 = vadd.f32 %v2671_v52, %v1505_v13  ;;  %v1507_v14 = vpop.f32.mrb[69].mxu1 }
 0x2d7   : > { %v1508_v15 = vpop.f32.mrb[70].mxu1 }
 0x2d8   : > { %1646 = vst [vmem:[%s2674_s28 + $0x130] sm:$0xff] %v1506_v0  ;;  %v1509_v16 = vadd.f32 %v2671_v52, %v1508_v15  ;;  %v1510_v19 = vpop.f32.mrb[71].mxu1 }
 0x2da   : > { %1647 = vst [vmem:[%s2674_s28 + $0x138] sm:$0xff] %v1509_v16 }
 0x2dd   : > { %v1513_v20 = vpop.f32.mrb[72].mxu1 }
 0x2de   : > { %v1514_v21 = vadd.f32 %v2671_v52, %v1513_v20  ;;  %v1515_v22 = vpop.f32.mrb[73].mxu1 }
 0x2df   : > { %v1516_v23 = vpop.f32.mrb[74].mxu1 }
 0x2e0   : > { %1648 = vst [vmem:[%s2674_s28 + $0x140] sm:$0xff] %v1514_v21  ;;  %v1517_v24 = vadd.f32 %v2671_v52, %v1516_v23  ;;  %v1518_v25 = vpop.f32.mrb[75].mxu1 }
 0x2e2   : > { %1649 = vst [vmem:[%s2674_s28 + $0x148] sm:$0xff] %v1517_v24 }
 0x2e5   : > { %v1521_v26 = vpop.f32.mrb[76].mxu1 }
 0x2e6   : > { %v1522_v27 = vadd.f32 %v2671_v52, %v1521_v26  ;;  %v1523_v28 = vpop.f32.mrb[77].mxu1 }
 0x2e7   : > { %v1524_v18 = vpop.f32.mrb[78].mxu1 }
 0x2e8   : > { %1650 = vst [vmem:[%s2674_s28 + $0x150] sm:$0xff] %v1522_v27  ;;  %v1525_v29 = vadd.f32 %v2671_v52, %v1524_v18  ;;  %v1526_v30 = vpop.f32.mrb[79].mxu1 }
 0x2ea   : > { %1651 = vst [vmem:[%s2674_s28 + $0x158] sm:$0xff] %v1525_v29 }
 0x2ed   : > { %v1529_v31 = vpop.f32.mrb[80].mxu1 }
 0x2ee   : > { %v1530_v34 = vadd.f32 %v2671_v52, %v1529_v31  ;;  %v1531_v35 = vpop.f32.mrb[81].mxu1 }
 0x2ef   : > { %v1532_v36 = vpop.f32.mrb[82].mxu1 }
 0x2f0   : > { %1652 = vst [vmem:[%s2674_s28 + $0x160] sm:$0xff] %v1530_v34  ;;  %v1533_v37 = vadd.f32 %v2671_v52, %v1532_v36  ;;  %v1534_v38 = vpop.f32.mrb[83].mxu1 }
 0x2f2   : > { %1653 = vst [vmem:[%s2674_s28 + $0x168] sm:$0xff] %v1533_v37 }
 0x2f5   : > { %v1537_v39 = vpop.f32.mrb[84].mxu1 }
 0x2f6   : > { %v1538_v40 = vadd.f32 %v2671_v52, %v1537_v39  ;;  %v1539_v17 = vpop.f32.mrb[85].mxu1 }
 0x2f7   : > { %v1540_v41 = vpop.f32.mrb[86].mxu1 }
 0x2f8   : > { %1654 = vst [vmem:[%s2674_s28 + $0x170] sm:$0xff] %v1538_v40  ;;  %v1541_v42 = vadd.f32 %v2671_v52, %v1540_v41  ;;  %v1542_v2 = vpop.f32.mrb[87].mxu1 }
 0x2fa   : > { %1655 = vst [vmem:[%s2674_s28 + $0x178] sm:$0xff] %v1541_v42 }
 0x2fd   : > { %v1545_v3 = vpop.f32.mrb[88].mxu1 }
 0x2fe   : > { %v1546_v33 = vadd.f32 %v2671_v52, %v1545_v3  ;;  %v1547_v43 = vpop.f32.mrb[89].mxu1 }
 0x2ff   : > { %v1548_v44 = vpop.f32.mrb[90].mxu1 }
 0x300   : > { %1656 = vst [vmem:[%s2674_s28 + $0x180] sm:$0xff] %v1546_v33  ;;  %v1549_v45 = vadd.f32 %v2671_v52, %v1548_v44  ;;  %v1550_v46 = vpop.f32.mrb[91].mxu1 }
 0x302   : > { %1657 = vst [vmem:[%s2674_s28 + $0x188] sm:$0xff] %v1549_v45 }
 0x305   : > { %v1553_v47 = vpop.f32.mrb[92].mxu1 }
 0x306   : > { %v1554_v48 = vadd.f32 %v2671_v52, %v1553_v47  ;;  %v1555_v49 = vpop.f32.mrb[93].mxu1 }
 0x307   : > { %v1556_v50 = vpop.f32.mrb[94].mxu1 }
 0x308   : > { %1658 = vst [vmem:[%s2674_s28 + $0x190] sm:$0xff] %v1554_v48  ;;  %v1557_v51 = vadd.f32 %v2671_v52, %v1556_v50  ;;  %v1558_v53 = vpop.f32.mrb[95].mxu1 }
 0x30a   : > { %1659 = vst [vmem:[%s2674_s28 + $0x198] sm:$0xff] %v1557_v51 }
 0x30d   : > { %v1561_v54 = vpop.f32.mrb[96].mxu1 }
 0x30e   : > { %v1562_v32 = vadd.f32 %v2671_v52, %v1561_v54  ;;  %v1563_v55 = vpop.f32.mrb[97].mxu1 }
 0x30f   : > { %v1564_v56 = vpop.f32.mrb[98].mxu1 }
 0x310   : > { %1660 = vst [vmem:[%s2674_s28 + $0x1a0] sm:$0xff] %v1562_v32  ;;  %v1565_v57 = vadd.f32 %v2671_v52, %v1564_v56  ;;  %v1566_v58 = vpop.f32.mrb[99].mxu1 }
 0x312   : > { %1661 = vst [vmem:[%s2674_s28 + $0x1a8] sm:$0xff] %v1565_v57 }
 0x315   : > { %v1569_v59 = vpop.f32.mrb[100].mxu1 }
 0x316   : > { %v1570_v60 = vadd.f32 %v2671_v52, %v1569_v59  ;;  %v1571_v61 = vpop.f32.mrb[101].mxu1 }
 0x317   : > { %v1572_v62 = vpop.f32.mrb[102].mxu1 }
 0x318   : > { %1662 = vst [vmem:[%s2674_s28 + $0x1b0] sm:$0xff] %v1570_v60  ;;  %v1573_v63 = vadd.f32 %v2671_v52, %v1572_v62  ;;  %v1574_v1 = vpop.f32.mrb[103].mxu1 }
 0x31a   : > { %1663 = vst [vmem:[%s2674_s28 + $0x1b8] sm:$0xff] %v1573_v63 }
 0x31d   : > { %v1577_v4 = vpop.f32.mrb[104].mxu1 }
 0x31e   : > { %v1578_v5 = vadd.f32 %v2671_v52, %v1577_v4  ;;  %v1579_v6 = vpop.f32.mrb[105].mxu1 }
 0x31f   : > { %v1580_v7 = vpop.f32.mrb[106].mxu1 }
 0x320   : > { %1664 = vst [vmem:[%s2674_s28 + $0x1c0] sm:$0xff] %v1578_v5  ;;  %v1581_v8 = vadd.f32 %v2671_v52, %v1580_v7  ;;  %v1582_v9 = vpop.f32.mrb[107].mxu1 }
 0x322   : > { %1665 = vst [vmem:[%s2674_s28 + $0x1c8] sm:$0xff] %v1581_v8 }
 0x325   : > { %v1585_v10 = vpop.f32.mrb[108].mxu1 }
 0x326   : > { %v1586_v11 = vadd.f32 %v2671_v52, %v1585_v10  ;;  %v1587_v12 = vpop.f32.mrb[109].mxu1 }
 0x327   : > { %v1588_v13 = vpop.f32.mrb[110].mxu1 }
 0x328   : > { %1666 = vst [vmem:[%s2674_s28 + $0x1d0] sm:$0xff] %v1586_v11  ;;  %v1589_v0 = vadd.f32 %v2671_v52, %v1588_v13  ;;  %v1590_v14 = vpop.f32.mrb[111].mxu1 }
 0x32a   : > { %1667 = vst [vmem:[%s2674_s28 + $0x1d8] sm:$0xff] %v1589_v0 }
 0x32d   : > { %v1593_v15 = vpop.f32.mrb[112].mxu1 }
 0x32e   : > { %v1594_v16 = vadd.f32 %v2671_v52, %v1593_v15  ;;  %v1595_v19 = vpop.f32.mrb[113].mxu1 }
 0x32f   : > { %v1596_v20 = vpop.f32.mrb[114].mxu1 }
 0x330   : > { %1668 = vst [vmem:[%s2674_s28 + $0x1e0] sm:$0xff] %v1594_v16  ;;  %v1597_v21 = vadd.f32 %v2671_v52, %v1596_v20  ;;  %v1598_v22 = vpop.f32.mrb[115].mxu1 }
 0x332   : > { %1669 = vst [vmem:[%s2674_s28 + $0x1e8] sm:$0xff] %v1597_v21 }
 0x335   : > { %v1601_v23 = vpop.f32.mrb[116].mxu1 }
 0x336   : > { %v1602_v24 = vadd.f32 %v2671_v52, %v1601_v23  ;;  %v1603_v25 = vpop.f32.mrb[117].mxu1 }
 0x337   : > { %v1604_v26 = vpop.f32.mrb[118].mxu1 }
 0x338   : > { %1670 = vst [vmem:[%s2674_s28 + $0x1f0] sm:$0xff] %v1602_v24  ;;  %v1605_v27 = vadd.f32 %v2671_v52, %v1604_v26  ;;  %v1606_v28 = vpop.f32.mrb[119].mxu1 }
 0x33a   : > { %1671 = vst [vmem:[%s2674_s28 + $0x1f8] sm:$0xff] %v1605_v27 }
 0x33b   : > { %2140 = shalt.err (!%p2137_p2)
}
 0x33c   : > { %s2141_s24 = scalar_lea.hbm %s2813_s23, 8192  ;;  %s2145_s13 = scalar_lea.hbm %s2867_s5, 16384 }
 0x33d   : > { %p2142_p13 = scmp.ne.s32.totalorder %s2813_s23, %s2141_s24  ;;  %p2146_p4 = scmp.lt.u32.totalorder %s2813_s23, %s2867_s5 }
 0x33e   : > { %p2147_p7 = scmp.lt.u32.totalorder %s2145_s13, %s2141_s24  ;;  %p2149_p11 = scmp.lt.u32.totalorder %s2141_s24, %s2813_s23 }
 0x33f   : > { %p2143_p6 = pnand %p2142_p13, %p2881_p0 }
 0x340   : > { %p2148_p8 = por %p2147_p7, %p2146_p4 }
 0x341   : > { %p2144_p10 = pneg %p2143_p6 }
 0x342   : > { %p2150_p1 = por %p2149_p11, %p2148_p8 }
 0x344   : > { %p2151_p3 = pnand %p2150_p1, %p2144_p10 }
 0x346   : > { %2154 = shalt.err (!%p2151_p3)
}
 0x347   : > { %s2208_s14 = smov 128   ;;  %s2209_s30 = smov 8  }
 0x348   : > { %1905 = dma.vmem_to_hbm [thread:$0]  (%p2881_p0), %s2815_s15, 8192, %s2813_s23, %s1673_s22, %s2208_s14, %s2208_s14, %s2209_s30  }
 0x349 PF: > { %s1701_s11 = sand.u32 1, %s2185_s18   ;;  %p2882_p5 = scmp.ne.s32.totalorder %s2872_s25, 0 }
 0x34a   : > { %p2883_p9 = scmp.ge.s32.totalorder %s2197_s21, 2  ;;  %s1702_s7 = scalar_lea.sflag [#allocation4], %s1701_s11 }
 0x34c   : > { %p1919_p12 = pnand %p2883_p9, %p2882_p5 }
 0x34e   : > { %2180 = dma.done.wait (!%p1919_p12), %s1702_s7, 8192  }
 0x34f   : > { %2182 = vsyncadd (!%p1919_p12), %s1702_s7, 4294959104  ;;  %p19_p2 = scmp.ge.s32.totalorder %s2353_s16, 4   ;;  %s2884_s18 = smov %s2189_s19 }
 0x350   : > { %s2885_s19 = smov %s2193_s20  ;;  %s2886_s20 = smov %s2362_s27 }
 0x351   : > { %s2887_s21 = smov %s2353_s16  ;;  %21 = sbr.rel (!%p19_p2) target bundleno = 6 (0x6), region = 93 }
 0x358   :  { %1707 = vsyncpa [#allocation3], 1 }
 0x359   :  { %1709 = vsyncpa [#allocation3 + $0x1], 1 }
 0x35a   :  { %1710 = vsyncpa [#allocation6], 1 }
 0x35b   :  { %1711 = vsyncpa [#allocation4], 1 }
 0x35c   :  { %1713 = vsyncpa [#allocation4 + $0x1], 1 }

</bundles_post_ra>
